<compile_context>
chip_gen: v7x
topology: tpu7x:2x2x1
jax: 0.10.0
libtpu: 0.0.40
codegen_flags: <defaults>
</compile_context>

<pallas_src>
import functools

import jax
import jax.numpy as jnp
from jax.experimental import pallas as pl
from jax.experimental.pallas import tpu as pltpu


# ----------------------------------------------------------------------------
# Fused Pallas kernel
# ----------------------------------------------------------------------------

def _lstm_layer(xw_list, whh_bf16, T, B, H, wih_next_bf16=None, b_next=None):
    """Serial recurrence for one LSTM layer.

    xw_list:        list of T (B, 4H) f32 blocks = x_t @ W_ih + (b_ih + b_hh),
                    with the g-gate columns pre-scaled by 2.
    whh_bf16:       (H, 4H) bf16 hidden->gates weights (g columns pre-scaled).
    wih_next_bf16 / b_next: if given, the NEXT layer's input projection is
                    fused into this layer's time loop, so the inter-layer
                    hidden sequence never needs to be concatenated/stored.
    Returns (next layer's xw_list or None, last hidden state (B, H) f32).
    """
    h = jnp.zeros((B, H), jnp.float32)
    c = jnp.zeros((B, H), jnp.float32)
    next_xw = []
    for t in range(T):  # statically unrolled serial recurrence
        h_b = h.astype(jnp.bfloat16)
        gates = xw_list[t] + jnp.dot(h_b, whh_bf16,
                                     preferred_element_type=jnp.float32)  # (B,4H)
        # Single full-width EUP pass over all 4H gate columns.  Because the
        # g columns were pre-scaled by 2, tanh(g) == 2*sigmoid(2g) - 1 falls
        # out with one VPU multiply-add (no second transcendental on gates).
        s = jax.nn.sigmoid(gates)
        i_g = s[:, 0:H]
        f_g = s[:, H:2 * H]
        g_g = 2.0 * s[:, 2 * H:3 * H] - 1.0
        o_g = s[:, 3 * H:4 * H]
        c = f_g * c + i_g * g_g                # f32 state math
        h = o_g * jnp.tanh(c)
        if wih_next_bf16 is not None:
            # Fused next-layer input projection (rides MXU slack).
            next_xw.append(
                jnp.dot(h.astype(jnp.bfloat16), wih_next_bf16,
                        preferred_element_type=jnp.float32) + b_next)
    return (next_xw if wih_next_bf16 is not None else None), h


def fused_lstm_mlp_kernel(
    x_ref,                                   # (T*B, D_in) f32, time-major
    wih0_ref, whh0_ref, b0_ref,              # layer 0 (weights bf16, bias f32)
    wih1_ref, whh1_ref, b1_ref,              # layer 1
    wih2_ref, whh2_ref, b2_ref,              # layer 2
    wih3_ref, whh3_ref, b3_ref,              # layer 3
    w1_ref, fb1_ref,                         # fc1: (H, 128) bf16, (1, 128) f32
    w2_ref, fb2_ref,                         # fc2: (128, 64) bf16, (1, 64) f32
    w3_ref, fb3_ref,                         # fc3: (1, 64) f32,  (1, 1) f32
    out_ref,                                 # (B, 1) f32
    *, T, B, H):
    lstm = [
        (wih0_ref, whh0_ref, b0_ref),
        (wih1_ref, whh1_ref, b1_ref),
        (wih2_ref, whh2_ref, b2_ref),
        (wih3_ref, whh3_ref, b3_ref),
    ]
    num_layers = len(lstm)

    # Layer-0 input projection hoisted out of the recurrence: one
    # (T*B, D) x (D, 4H) bf16 matmul, accumulated in f32.
    xw0 = jnp.dot(x_ref[...].astype(jnp.bfloat16), wih0_ref[...],
                  preferred_element_type=jnp.float32) + b0_ref[...]    # (T*B, 4H)
    xw_list = [xw0[t * B:(t + 1) * B, :] for t in range(T)]            # B=8 rows: sublane-aligned slices

    h_last = None
    for layer in range(num_layers):
        whh = lstm[layer][1][...]
        if layer < num_layers - 1:
            wih_next = lstm[layer + 1][0][...]
            b_next = lstm[layer + 1][2][...]
        else:
            wih_next = None
            b_next = None
        xw_list, h_last = _lstm_layer(xw_list, whh, T, B, H, wih_next, b_next)
        # nn.LSTM inter-layer dropout: identity in eval mode

    # MLP head (nn.Dropout = identity in eval mode) on the last hidden state.
    x1 = jnp.maximum(
        jnp.dot(h_last.astype(jnp.bfloat16), w1_ref[...],
                preferred_element_type=jnp.float32) + fb1_ref[...], 0.0)   # (B, 128)
    x2 = jnp.maximum(
        jnp.dot(x1.astype(jnp.bfloat16), w2_ref[...],
                preferred_element_type=jnp.float32) + fb2_ref[...], 0.0)   # (B, 64)
    # fc3 (64 -> 1): elementwise multiply + lane reduction (VPU + XLU),
    # avoiding a 1-lane-wide MXU matmul.
    out_ref[...] = (jnp.sum(x2 * w3_ref[...], axis=-1, keepdims=True)
                    + fb3_ref[...])                                        # (B, 1)


# ----------------------------------------------------------------------------
# Wrapper
# ----------------------------------------------------------------------------

_VMEM = pl.BlockSpec(memory_space=pltpu.MemorySpace.VMEM)


def lstm_model_forward(params, x):
    """x: (B, T, input_size) batch-first, like the PyTorch module.

    Returns shape (B,) (matching `out.squeeze()` for B > 1)."""
    B, T, D = x.shape
    H = params["lstm"][0]["w_hh_t"].shape[0]

    # Host-side layout change only: batch-first -> time-major, flattened so the
    # kernel's per-time-step slices are contiguous sublane blocks.
    x_tm = jnp.transpose(x, (1, 0, 2)).reshape(T * B, D).astype(jnp.float32)

    args = [x_tm]
    for p in params["lstm"]:
        args += [p["w_ih_t"], p["w_hh_t"], p["bias"]]
    fc = params["fc"]
    args += [fc[0]["w_t"], fc[0]["b"],
             fc[1]["w_t"], fc[1]["b"],
             fc[2]["w"], fc[2]["b"]]

    out = pl.pallas_call(
        functools.partial(fused_lstm_mlp_kernel, T=T, B=B, H=H),
        out_shape=jax.ShapeDtypeStruct((B, 1), jnp.float32),
        in_specs=[_VMEM] * len(args),
        out_specs=_VMEM,
    )(*args)
    return jnp.squeeze(out, axis=-1)                            # (B,)


# ----------------------------------------------------------------------------
# Parameter init (PyTorch-matching shapes / init ranges, kernel-ready layout)
# ----------------------------------------------------------------------------

def init_params(key, input_size, hidden_size, num_layers):
    H = hidden_size
    params = {"lstm": [], "fc": []}
    k_lstm = 1.0 / jnp.sqrt(hidden_size)
    # Pre-scale the g-gate (cell candidate) columns by 2 so a single sigmoid
    # plus 2*s-1 reproduces tanh inside the kernel.  The 2x is a power of two,
    # so it stays exact through the bf16 cast.
    gate_scale = jnp.ones((1, 4 * H), jnp.float32).at[:, 2 * H:3 * H].set(2.0)
    for layer in range(num_layers):
        d_in = input_size if layer == 0 else H
        key, k1, k2, k3, k4 = jax.random.split(key, 5)
        w_ih = jax.random.uniform(k1, (4 * H, d_in), minval=-k_lstm, maxval=k_lstm)
        w_hh = jax.random.uniform(k2, (4 * H, H), minval=-k_lstm, maxval=k_lstm)
        b_ih = jax.random.uniform(k3, (4 * H,), minval=-k_lstm, maxval=k_lstm)
        b_hh = jax.random.uniform(k4, (4 * H,), minval=-k_lstm, maxval=k_lstm)
        params["lstm"].append({
            # pre-transposed to (in, out), g columns scaled, bf16 for the MXU
            "w_ih_t": (w_ih.T * gate_scale).astype(jnp.bfloat16),   # (d_in, 4H)
            "w_hh_t": (w_hh.T * gate_scale).astype(jnp.bfloat16),   # (H, 4H)
            # combined bias, g slice scaled, kept f32
            "bias": ((b_ih + b_hh).reshape(1, -1)
                     * gate_scale).astype(jnp.float32),             # (1, 4H)
        })
    # fc1: H -> 128, fc2: 128 -> 64 (stored transposed, bf16); fc3: 64 -> 1
    # stored as its natural (1, 64) f32 row for the multiply+reduce path.
    fc_dims = [(hidden_size, 128), (128, 64), (64, 1)]
    for idx, (fan_in, fan_out) in enumerate(fc_dims):
        key, k1, k2 = jax.random.split(key, 3)
        bound = 1.0 / jnp.sqrt(fan_in)
        w = jax.random.uniform(k1, (fan_out, fan_in), minval=-bound, maxval=bound)
        b = jax.random.uniform(k2, (fan_out,), minval=-bound, maxval=bound)
        entry = {"b": b.reshape(1, -1).astype(jnp.float32)}          # (1, fan_out)
        if idx < 2:
            entry["w_t"] = w.T.astype(jnp.bfloat16)                  # (fan_in, fan_out)
        else:
            entry["w"] = w.astype(jnp.float32)                       # (1, fan_in)
        params["fc"].append(entry)
    return params


# ----------------------------------------------------------------------------
# Main
# ----------------------------------------------------------------------------

if __name__ == "__main__":
    INPUT_SIZE = 16
    HIDDEN_SIZE = 32
    NUM_LAYERS = 4
    BATCH = 8
    SEQ = 8

    key = jax.random.PRNGKey(0)
    key, k_x, k_p = jax.random.split(key, 3)

    x = jax.random.normal(k_x, (BATCH, SEQ, INPUT_SIZE), dtype=jnp.float32)
    params = init_params(k_p, INPUT_SIZE, HIDDEN_SIZE, NUM_LAYERS)

    out = jax.jit(lambda x_: lstm_model_forward(params, x_))(x)
    out = jax.block_until_ready(out)

    assert out.shape == (BATCH,), out.shape
    assert jnp.all(jnp.isfinite(out))
    print("KERNEL_OK")
</pallas_src>

<mosaic_0001>
module attributes {stable_mosaic.version = 11 : i64} {
  func.func @fused_lstm_mlp_kernel(%arg0: memref<64x16xf32, #tpu.memory_space<vmem>>, %arg1: memref<16x128xbf16, #tpu.memory_space<vmem>>, %arg2: memref<32x128xbf16, #tpu.memory_space<vmem>>, %arg3: memref<1x128xf32, #tpu.memory_space<vmem>>, %arg4: memref<32x128xbf16, #tpu.memory_space<vmem>>, %arg5: memref<32x128xbf16, #tpu.memory_space<vmem>>, %arg6: memref<1x128xf32, #tpu.memory_space<vmem>>, %arg7: memref<32x128xbf16, #tpu.memory_space<vmem>>, %arg8: memref<32x128xbf16, #tpu.memory_space<vmem>>, %arg9: memref<1x128xf32, #tpu.memory_space<vmem>>, %arg10: memref<32x128xbf16, #tpu.memory_space<vmem>>, %arg11: memref<32x128xbf16, #tpu.memory_space<vmem>>, %arg12: memref<1x128xf32, #tpu.memory_space<vmem>>, %arg13: memref<32x128xbf16, #tpu.memory_space<vmem>>, %arg14: memref<1x128xf32, #tpu.memory_space<vmem>>, %arg15: memref<128x64xbf16, #tpu.memory_space<vmem>>, %arg16: memref<1x64xf32, #tpu.memory_space<vmem>>, %arg17: memref<1x64xf32, #tpu.memory_space<vmem>>, %arg18: memref<1x1xf32, #tpu.memory_space<vmem>>, %arg19: memref<8x1xf32, #tpu.memory_space<vmem>>) attributes {dimension_semantics = [], scalar_prefetch = 0 : i64, scratch_operands = 0 : i64, tpu.core_type = #tpu.core_type<tc>} {
    %c0 = arith.constant 0 : index
    %c0_0 = arith.constant 0 : index
    %0 = vector.load %arg0[%c0, %c0_0] : memref<64x16xf32, #tpu.memory_space<vmem>>, vector<64x16xf32>
    %1 = arith.truncf %0 : vector<64x16xf32> to vector<64x16xbf16>
    %c0_1 = arith.constant 0 : index
    %c0_2 = arith.constant 0 : index
    %2 = vector.load %arg1[%c0_1, %c0_2] : memref<16x128xbf16, #tpu.memory_space<vmem>>, vector<16x128xbf16>
    %cst = arith.constant dense<0.000000e+00> : vector<64x128xf32>
    %3 = tpu.matmul %1, %2, %cst {dimension_numbers = #tpu.dot_dimension_numbers<[1], [0], [0], [1], [0, 0, 1, 1], [], []>} : vector<64x16xbf16>, vector<16x128xbf16>, vector<64x128xf32> -> vector<64x128xf32>
    %c0_3 = arith.constant 0 : index
    %c0_4 = arith.constant 0 : index
    %4 = vector.load %arg3[%c0_3, %c0_4] : memref<1x128xf32, #tpu.memory_space<vmem>>, vector<1x128xf32>
    %5 = vector.broadcast %4 : vector<1x128xf32> to vector<64x128xf32>
    %6 = arith.addf %3, %5 : vector<64x128xf32>
    %7 = vector.extract_strided_slice %6 {offsets = [0, 0], sizes = [8, 128], strides = [1, 1]} : vector<64x128xf32> to vector<8x128xf32>
    %8 = vector.extract_strided_slice %6 {offsets = [8, 0], sizes = [8, 128], strides = [1, 1]} : vector<64x128xf32> to vector<8x128xf32>
    %9 = vector.extract_strided_slice %6 {offsets = [16, 0], sizes = [8, 128], strides = [1, 1]} : vector<64x128xf32> to vector<8x128xf32>
    %10 = vector.extract_strided_slice %6 {offsets = [24, 0], sizes = [8, 128], strides = [1, 1]} : vector<64x128xf32> to vector<8x128xf32>
    %11 = vector.extract_strided_slice %6 {offsets = [32, 0], sizes = [8, 128], strides = [1, 1]} : vector<64x128xf32> to vector<8x128xf32>
    %12 = vector.extract_strided_slice %6 {offsets = [40, 0], sizes = [8, 128], strides = [1, 1]} : vector<64x128xf32> to vector<8x128xf32>
    %13 = vector.extract_strided_slice %6 {offsets = [48, 0], sizes = [8, 128], strides = [1, 1]} : vector<64x128xf32> to vector<8x128xf32>
    %14 = vector.extract_strided_slice %6 {offsets = [56, 0], sizes = [8, 128], strides = [1, 1]} : vector<64x128xf32> to vector<8x128xf32>
    %c0_5 = arith.constant 0 : index
    %c0_6 = arith.constant 0 : index
    %15 = vector.load %arg2[%c0_5, %c0_6] : memref<32x128xbf16, #tpu.memory_space<vmem>>, vector<32x128xbf16>
    %c0_7 = arith.constant 0 : index
    %c0_8 = arith.constant 0 : index
    %16 = vector.load %arg4[%c0_7, %c0_8] : memref<32x128xbf16, #tpu.memory_space<vmem>>, vector<32x128xbf16>
    %c0_9 = arith.constant 0 : index
    %c0_10 = arith.constant 0 : index
    %17 = vector.load %arg6[%c0_9, %c0_10] : memref<1x128xf32, #tpu.memory_space<vmem>>, vector<1x128xf32>
    %cst_11 = arith.constant 0.000000e+00 : f32
    %18 = vector.broadcast %cst_11 : f32 to vector<8x32xf32>
    %cst_12 = arith.constant 0.000000e+00 : f32
    %19 = vector.broadcast %cst_12 : f32 to vector<8x32xf32>
    %20 = arith.truncf %18 : vector<8x32xf32> to vector<8x32xbf16>
    %cst_13 = arith.constant dense<0.000000e+00> : vector<8x128xf32>
    %21 = tpu.matmul %20, %15, %cst_13 {dimension_numbers = #tpu.dot_dimension_numbers<[1], [0], [0], [1], [0, 0, 1, 1], [], []>} : vector<8x32xbf16>, vector<32x128xbf16>, vector<8x128xf32> -> vector<8x128xf32>
    %22 = arith.addf %7, %21 : vector<8x128xf32>
    %23 = arith.negf %22 : vector<8x128xf32>
    %24 = math.exp %23 : vector<8x128xf32>
    %cst_14 = arith.constant 1.000000e+00 : f32
    %25 = vector.broadcast %cst_14 : f32 to vector<8x128xf32>
    %26 = arith.addf %25, %24 : vector<8x128xf32>
    %27 = arith.divf %25, %26 : vector<8x128xf32>
    %28 = vector.extract_strided_slice %27 {offsets = [0, 0], sizes = [8, 32], strides = [1, 1]} : vector<8x128xf32> to vector<8x32xf32>
    %29 = vector.extract_strided_slice %27 {offsets = [0, 32], sizes = [8, 32], strides = [1, 1]} : vector<8x128xf32> to vector<8x32xf32>
    %30 = vector.extract_strided_slice %27 {offsets = [0, 64], sizes = [8, 32], strides = [1, 1]} : vector<8x128xf32> to vector<8x32xf32>
    %cst_15 = arith.constant 2.000000e+00 : f32
    %31 = vector.broadcast %cst_15 : f32 to vector<8x32xf32>
    %32 = arith.mulf %31, %30 : vector<8x32xf32>
    %cst_16 = arith.constant 1.000000e+00 : f32
    %33 = vector.broadcast %cst_16 : f32 to vector<8x32xf32>
    %34 = arith.subf %32, %33 : vector<8x32xf32>
    %35 = vector.extract_strided_slice %27 {offsets = [0, 96], sizes = [8, 32], strides = [1, 1]} : vector<8x128xf32> to vector<8x32xf32>
    %36 = arith.mulf %29, %19 : vector<8x32xf32>
    %37 = arith.mulf %28, %34 : vector<8x32xf32>
    %38 = arith.addf %36, %37 : vector<8x32xf32>
    %39 = math.tanh %38 : vector<8x32xf32>
    %40 = arith.mulf %35, %39 : vector<8x32xf32>
    %41 = arith.truncf %40 : vector<8x32xf32> to vector<8x32xbf16>
    %cst_17 = arith.constant dense<0.000000e+00> : vector<8x128xf32>
    %42 = tpu.matmul %41, %16, %cst_17 {dimension_numbers = #tpu.dot_dimension_numbers<[1], [0], [0], [1], [0, 0, 1, 1], [], []>} : vector<8x32xbf16>, vector<32x128xbf16>, vector<8x128xf32> -> vector<8x128xf32>
    %43 = vector.broadcast %17 : vector<1x128xf32> to vector<8x128xf32>
    %44 = arith.addf %42, %43 : vector<8x128xf32>
    %45 = arith.truncf %40 : vector<8x32xf32> to vector<8x32xbf16>
    %cst_18 = arith.constant dense<0.000000e+00> : vector<8x128xf32>
    %46 = tpu.matmul %45, %15, %cst_18 {dimension_numbers = #tpu.dot_dimension_numbers<[1], [0], [0], [1], [0, 0, 1, 1], [], []>} : vector<8x32xbf16>, vector<32x128xbf16>, vector<8x128xf32> -> vector<8x128xf32>
    %47 = arith.addf %8, %46 : vector<8x128xf32>
    %48 = arith.negf %47 : vector<8x128xf32>
    %49 = math.exp %48 : vector<8x128xf32>
    %cst_19 = arith.constant 1.000000e+00 : f32
    %50 = vector.broadcast %cst_19 : f32 to vector<8x128xf32>
    %51 = arith.addf %50, %49 : vector<8x128xf32>
    %52 = arith.divf %50, %51 : vector<8x128xf32>
    %53 = vector.extract_strided_slice %52 {offsets = [0, 0], sizes = [8, 32], strides = [1, 1]} : vector<8x128xf32> to vector<8x32xf32>
    %54 = vector.extract_strided_slice %52 {offsets = [0, 32], sizes = [8, 32], strides = [1, 1]} : vector<8x128xf32> to vector<8x32xf32>
    %55 = vector.extract_strided_slice %52 {offsets = [0, 64], sizes = [8, 32], strides = [1, 1]} : vector<8x128xf32> to vector<8x32xf32>
    %cst_20 = arith.constant 2.000000e+00 : f32
    %56 = vector.broadcast %cst_20 : f32 to vector<8x32xf32>
    %57 = arith.mulf %56, %55 : vector<8x32xf32>
    %cst_21 = arith.constant 1.000000e+00 : f32
    %58 = vector.broadcast %cst_21 : f32 to vector<8x32xf32>
    %59 = arith.subf %57, %58 : vector<8x32xf32>
    %60 = vector.extract_strided_slice %52 {offsets = [0, 96], sizes = [8, 32], strides = [1, 1]} : vector<8x128xf32> to vector<8x32xf32>
    %61 = arith.mulf %54, %38 : vector<8x32xf32>
    %62 = arith.mulf %53, %59 : vector<8x32xf32>
    %63 = arith.addf %61, %62 : vector<8x32xf32>
    %64 = math.tanh %63 : vector<8x32xf32>
    %65 = arith.mulf %60, %64 : vector<8x32xf32>
    %66 = arith.truncf %65 : vector<8x32xf32> to vector<8x32xbf16>
    %cst_22 = arith.constant dense<0.000000e+00> : vector<8x128xf32>
    %67 = tpu.matmul %66, %16, %cst_22 {dimension_numbers = #tpu.dot_dimension_numbers<[1], [0], [0], [1], [0, 0, 1, 1], [], []>} : vector<8x32xbf16>, vector<32x128xbf16>, vector<8x128xf32> -> vector<8x128xf32>
    %68 = vector.broadcast %17 : vector<1x128xf32> to vector<8x128xf32>
    %69 = arith.addf %67, %68 : vector<8x128xf32>
    %70 = arith.truncf %65 : vector<8x32xf32> to vector<8x32xbf16>
    %cst_23 = arith.constant dense<0.000000e+00> : vector<8x128xf32>
    %71 = tpu.matmul %70, %15, %cst_23 {dimension_numbers = #tpu.dot_dimension_numbers<[1], [0], [0], [1], [0, 0, 1, 1], [], []>} : vector<8x32xbf16>, vector<32x128xbf16>, vector<8x128xf32> -> vector<8x128xf32>
    %72 = arith.addf %9, %71 : vector<8x128xf32>
    %73 = arith.negf %72 : vector<8x128xf32>
    %74 = math.exp %73 : vector<8x128xf32>
    %cst_24 = arith.constant 1.000000e+00 : f32
    %75 = vector.broadcast %cst_24 : f32 to vector<8x128xf32>
    %76 = arith.addf %75, %74 : vector<8x128xf32>
    %77 = arith.divf %75, %76 : vector<8x128xf32>
    %78 = vector.extract_strided_slice %77 {offsets = [0, 0], sizes = [8, 32], strides = [1, 1]} : vector<8x128xf32> to vector<8x32xf32>
    %79 = vector.extract_strided_slice %77 {offsets = [0, 32], sizes = [8, 32], strides = [1, 1]} : vector<8x128xf32> to vector<8x32xf32>
    %80 = vector.extract_strided_slice %77 {offsets = [0, 64], sizes = [8, 32], strides = [1, 1]} : vector<8x128xf32> to vector<8x32xf32>
    %cst_25 = arith.constant 2.000000e+00 : f32
    %81 = vector.broadcast %cst_25 : f32 to vector<8x32xf32>
    %82 = arith.mulf %81, %80 : vector<8x32xf32>
    %cst_26 = arith.constant 1.000000e+00 : f32
    %83 = vector.broadcast %cst_26 : f32 to vector<8x32xf32>
    %84 = arith.subf %82, %83 : vector<8x32xf32>
    %85 = vector.extract_strided_slice %77 {offsets = [0, 96], sizes = [8, 32], strides = [1, 1]} : vector<8x128xf32> to vector<8x32xf32>
    %86 = arith.mulf %79, %63 : vector<8x32xf32>
    %87 = arith.mulf %78, %84 : vector<8x32xf32>
    %88 = arith.addf %86, %87 : vector<8x32xf32>
    %89 = math.tanh %88 : vector<8x32xf32>
    %90 = arith.mulf %85, %89 : vector<8x32xf32>
    %91 = arith.truncf %90 : vector<8x32xf32> to vector<8x32xbf16>
    %cst_27 = arith.constant dense<0.000000e+00> : vector<8x128xf32>
    %92 = tpu.matmul %91, %16, %cst_27 {dimension_numbers = #tpu.dot_dimension_numbers<[1], [0], [0], [1], [0, 0, 1, 1], [], []>} : vector<8x32xbf16>, vector<32x128xbf16>, vector<8x128xf32> -> vector<8x128xf32>
    %93 = vector.broadcast %17 : vector<1x128xf32> to vector<8x128xf32>
    %94 = arith.addf %92, %93 : vector<8x128xf32>
    %95 = arith.truncf %90 : vector<8x32xf32> to vector<8x32xbf16>
    %cst_28 = arith.constant dense<0.000000e+00> : vector<8x128xf32>
    %96 = tpu.matmul %95, %15, %cst_28 {dimension_numbers = #tpu.dot_dimension_numbers<[1], [0], [0], [1], [0, 0, 1, 1], [], []>} : vector<8x32xbf16>, vector<32x128xbf16>, vector<8x128xf32> -> vector<8x128xf32>
    %97 = arith.addf %10, %96 : vector<8x128xf32>
    %98 = arith.negf %97 : vector<8x128xf32>
    %99 = math.exp %98 : vector<8x128xf32>
    %cst_29 = arith.constant 1.000000e+00 : f32
    %100 = vector.broadcast %cst_29 : f32 to vector<8x128xf32>
    %101 = arith.addf %100, %99 : vector<8x128xf32>
    %102 = arith.divf %100, %101 : vector<8x128xf32>
    %103 = vector.extract_strided_slice %102 {offsets = [0, 0], sizes = [8, 32], strides = [1, 1]} : vector<8x128xf32> to vector<8x32xf32>
    %104 = vector.extract_strided_slice %102 {offsets = [0, 32], sizes = [8, 32], strides = [1, 1]} : vector<8x128xf32> to vector<8x32xf32>
    %105 = vector.extract_strided_slice %102 {offsets = [0, 64], sizes = [8, 32], strides = [1, 1]} : vector<8x128xf32> to vector<8x32xf32>
    %cst_30 = arith.constant 2.000000e+00 : f32
    %106 = vector.broadcast %cst_30 : f32 to vector<8x32xf32>
    %107 = arith.mulf %106, %105 : vector<8x32xf32>
    %cst_31 = arith.constant 1.000000e+00 : f32
    %108 = vector.broadcast %cst_31 : f32 to vector<8x32xf32>
    %109 = arith.subf %107, %108 : vector<8x32xf32>
    %110 = vector.extract_strided_slice %102 {offsets = [0, 96], sizes = [8, 32], strides = [1, 1]} : vector<8x128xf32> to vector<8x32xf32>
    %111 = arith.mulf %104, %88 : vector<8x32xf32>
    %112 = arith.mulf %103, %109 : vector<8x32xf32>
    %113 = arith.addf %111, %112 : vector<8x32xf32>
    %114 = math.tanh %113 : vector<8x32xf32>
    %115 = arith.mulf %110, %114 : vector<8x32xf32>
    %116 = arith.truncf %115 : vector<8x32xf32> to vector<8x32xbf16>
    %cst_32 = arith.constant dense<0.000000e+00> : vector<8x128xf32>
    %117 = tpu.matmul %116, %16, %cst_32 {dimension_numbers = #tpu.dot_dimension_numbers<[1], [0], [0], [1], [0, 0, 1, 1], [], []>} : vector<8x32xbf16>, vector<32x128xbf16>, vector<8x128xf32> -> vector<8x128xf32>
    %118 = vector.broadcast %17 : vector<1x128xf32> to vector<8x128xf32>
    %119 = arith.addf %117, %118 : vector<8x128xf32>
    %120 = arith.truncf %115 : vector<8x32xf32> to vector<8x32xbf16>
    %cst_33 = arith.constant dense<0.000000e+00> : vector<8x128xf32>
    %121 = tpu.matmul %120, %15, %cst_33 {dimension_numbers = #tpu.dot_dimension_numbers<[1], [0], [0], [1], [0, 0, 1, 1], [], []>} : vector<8x32xbf16>, vector<32x128xbf16>, vector<8x128xf32> -> vector<8x128xf32>
    %122 = arith.addf %11, %121 : vector<8x128xf32>
    %123 = arith.negf %122 : vector<8x128xf32>
    %124 = math.exp %123 : vector<8x128xf32>
    %cst_34 = arith.constant 1.000000e+00 : f32
    %125 = vector.broadcast %cst_34 : f32 to vector<8x128xf32>
    %126 = arith.addf %125, %124 : vector<8x128xf32>
    %127 = arith.divf %125, %126 : vector<8x128xf32>
    %128 = vector.extract_strided_slice %127 {offsets = [0, 0], sizes = [8, 32], strides = [1, 1]} : vector<8x128xf32> to vector<8x32xf32>
    %129 = vector.extract_strided_slice %127 {offsets = [0, 32], sizes = [8, 32], strides = [1, 1]} : vector<8x128xf32> to vector<8x32xf32>
    %130 = vector.extract_strided_slice %127 {offsets = [0, 64], sizes = [8, 32], strides = [1, 1]} : vector<8x128xf32> to vector<8x32xf32>
    %cst_35 = arith.constant 2.000000e+00 : f32
    %131 = vector.broadcast %cst_35 : f32 to vector<8x32xf32>
    %132 = arith.mulf %131, %130 : vector<8x32xf32>
    %cst_36 = arith.constant 1.000000e+00 : f32
    %133 = vector.broadcast %cst_36 : f32 to vector<8x32xf32>
    %134 = arith.subf %132, %133 : vector<8x32xf32>
    %135 = vector.extract_strided_slice %127 {offsets = [0, 96], sizes = [8, 32], strides = [1, 1]} : vector<8x128xf32> to vector<8x32xf32>
    %136 = arith.mulf %129, %113 : vector<8x32xf32>
    %137 = arith.mulf %128, %134 : vector<8x32xf32>
    %138 = arith.addf %136, %137 : vector<8x32xf32>
    %139 = math.tanh %138 : vector<8x32xf32>
    %140 = arith.mulf %135, %139 : vector<8x32xf32>
    %141 = arith.truncf %140 : vector<8x32xf32> to vector<8x32xbf16>
    %cst_37 = arith.constant dense<0.000000e+00> : vector<8x128xf32>
    %142 = tpu.matmul %141, %16, %cst_37 {dimension_numbers = #tpu.dot_dimension_numbers<[1], [0], [0], [1], [0, 0, 1, 1], [], []>} : vector<8x32xbf16>, vector<32x128xbf16>, vector<8x128xf32> -> vector<8x128xf32>
    %143 = vector.broadcast %17 : vector<1x128xf32> to vector<8x128xf32>
    %144 = arith.addf %142, %143 : vector<8x128xf32>
    %145 = arith.truncf %140 : vector<8x32xf32> to vector<8x32xbf16>
    %cst_38 = arith.constant dense<0.000000e+00> : vector<8x128xf32>
    %146 = tpu.matmul %145, %15, %cst_38 {dimension_numbers = #tpu.dot_dimension_numbers<[1], [0], [0], [1], [0, 0, 1, 1], [], []>} : vector<8x32xbf16>, vector<32x128xbf16>, vector<8x128xf32> -> vector<8x128xf32>
    %147 = arith.addf %12, %146 : vector<8x128xf32>
    %148 = arith.negf %147 : vector<8x128xf32>
    %149 = math.exp %148 : vector<8x128xf32>
    %cst_39 = arith.constant 1.000000e+00 : f32
    %150 = vector.broadcast %cst_39 : f32 to vector<8x128xf32>
    %151 = arith.addf %150, %149 : vector<8x128xf32>
    %152 = arith.divf %150, %151 : vector<8x128xf32>
    %153 = vector.extract_strided_slice %152 {offsets = [0, 0], sizes = [8, 32], strides = [1, 1]} : vector<8x128xf32> to vector<8x32xf32>
    %154 = vector.extract_strided_slice %152 {offsets = [0, 32], sizes = [8, 32], strides = [1, 1]} : vector<8x128xf32> to vector<8x32xf32>
    %155 = vector.extract_strided_slice %152 {offsets = [0, 64], sizes = [8, 32], strides = [1, 1]} : vector<8x128xf32> to vector<8x32xf32>
    %cst_40 = arith.constant 2.000000e+00 : f32
    %156 = vector.broadcast %cst_40 : f32 to vector<8x32xf32>
    %157 = arith.mulf %156, %155 : vector<8x32xf32>
    %cst_41 = arith.constant 1.000000e+00 : f32
    %158 = vector.broadcast %cst_41 : f32 to vector<8x32xf32>
    %159 = arith.subf %157, %158 : vector<8x32xf32>
    %160 = vector.extract_strided_slice %152 {offsets = [0, 96], sizes = [8, 32], strides = [1, 1]} : vector<8x128xf32> to vector<8x32xf32>
    %161 = arith.mulf %154, %138 : vector<8x32xf32>
    %162 = arith.mulf %153, %159 : vector<8x32xf32>
    %163 = arith.addf %161, %162 : vector<8x32xf32>
    %164 = math.tanh %163 : vector<8x32xf32>
    %165 = arith.mulf %160, %164 : vector<8x32xf32>
    %166 = arith.truncf %165 : vector<8x32xf32> to vector<8x32xbf16>
    %cst_42 = arith.constant dense<0.000000e+00> : vector<8x128xf32>
    %167 = tpu.matmul %166, %16, %cst_42 {dimension_numbers = #tpu.dot_dimension_numbers<[1], [0], [0], [1], [0, 0, 1, 1], [], []>} : vector<8x32xbf16>, vector<32x128xbf16>, vector<8x128xf32> -> vector<8x128xf32>
    %168 = vector.broadcast %17 : vector<1x128xf32> to vector<8x128xf32>
    %169 = arith.addf %167, %168 : vector<8x128xf32>
    %170 = arith.truncf %165 : vector<8x32xf32> to vector<8x32xbf16>
    %cst_43 = arith.constant dense<0.000000e+00> : vector<8x128xf32>
    %171 = tpu.matmul %170, %15, %cst_43 {dimension_numbers = #tpu.dot_dimension_numbers<[1], [0], [0], [1], [0, 0, 1, 1], [], []>} : vector<8x32xbf16>, vector<32x128xbf16>, vector<8x128xf32> -> vector<8x128xf32>
    %172 = arith.addf %13, %171 : vector<8x128xf32>
    %173 = arith.negf %172 : vector<8x128xf32>
    %174 = math.exp %173 : vector<8x128xf32>
    %cst_44 = arith.constant 1.000000e+00 : f32
    %175 = vector.broadcast %cst_44 : f32 to vector<8x128xf32>
    %176 = arith.addf %175, %174 : vector<8x128xf32>
    %177 = arith.divf %175, %176 : vector<8x128xf32>
    %178 = vector.extract_strided_slice %177 {offsets = [0, 0], sizes = [8, 32], strides = [1, 1]} : vector<8x128xf32> to vector<8x32xf32>
    %179 = vector.extract_strided_slice %177 {offsets = [0, 32], sizes = [8, 32], strides = [1, 1]} : vector<8x128xf32> to vector<8x32xf32>
    %180 = vector.extract_strided_slice %177 {offsets = [0, 64], sizes = [8, 32], strides = [1, 1]} : vector<8x128xf32> to vector<8x32xf32>
    %cst_45 = arith.constant 2.000000e+00 : f32
    %181 = vector.broadcast %cst_45 : f32 to vector<8x32xf32>
    %182 = arith.mulf %181, %180 : vector<8x32xf32>
    %cst_46 = arith.constant 1.000000e+00 : f32
    %183 = vector.broadcast %cst_46 : f32 to vector<8x32xf32>
    %184 = arith.subf %182, %183 : vector<8x32xf32>
    %185 = vector.extract_strided_slice %177 {offsets = [0, 96], sizes = [8, 32], strides = [1, 1]} : vector<8x128xf32> to vector<8x32xf32>
    %186 = arith.mulf %179, %163 : vector<8x32xf32>
    %187 = arith.mulf %178, %184 : vector<8x32xf32>
    %188 = arith.addf %186, %187 : vector<8x32xf32>
    %189 = math.tanh %188 : vector<8x32xf32>
    %190 = arith.mulf %185, %189 : vector<8x32xf32>
    %191 = arith.truncf %190 : vector<8x32xf32> to vector<8x32xbf16>
    %cst_47 = arith.constant dense<0.000000e+00> : vector<8x128xf32>
    %192 = tpu.matmul %191, %16, %cst_47 {dimension_numbers = #tpu.dot_dimension_numbers<[1], [0], [0], [1], [0, 0, 1, 1], [], []>} : vector<8x32xbf16>, vector<32x128xbf16>, vector<8x128xf32> -> vector<8x128xf32>
    %193 = vector.broadcast %17 : vector<1x128xf32> to vector<8x128xf32>
    %194 = arith.addf %192, %193 : vector<8x128xf32>
    %195 = arith.truncf %190 : vector<8x32xf32> to vector<8x32xbf16>
    %cst_48 = arith.constant dense<0.000000e+00> : vector<8x128xf32>
    %196 = tpu.matmul %195, %15, %cst_48 {dimension_numbers = #tpu.dot_dimension_numbers<[1], [0], [0], [1], [0, 0, 1, 1], [], []>} : vector<8x32xbf16>, vector<32x128xbf16>, vector<8x128xf32> -> vector<8x128xf32>
    %197 = arith.addf %14, %196 : vector<8x128xf32>
    %198 = arith.negf %197 : vector<8x128xf32>
    %199 = math.exp %198 : vector<8x128xf32>
    %cst_49 = arith.constant 1.000000e+00 : f32
    %200 = vector.broadcast %cst_49 : f32 to vector<8x128xf32>
    %201 = arith.addf %200, %199 : vector<8x128xf32>
    %202 = arith.divf %200, %201 : vector<8x128xf32>
    %203 = vector.extract_strided_slice %202 {offsets = [0, 0], sizes = [8, 32], strides = [1, 1]} : vector<8x128xf32> to vector<8x32xf32>
    %204 = vector.extract_strided_slice %202 {offsets = [0, 32], sizes = [8, 32], strides = [1, 1]} : vector<8x128xf32> to vector<8x32xf32>
    %205 = vector.extract_strided_slice %202 {offsets = [0, 64], sizes = [8, 32], strides = [1, 1]} : vector<8x128xf32> to vector<8x32xf32>
    %cst_50 = arith.constant 2.000000e+00 : f32
    %206 = vector.broadcast %cst_50 : f32 to vector<8x32xf32>
    %207 = arith.mulf %206, %205 : vector<8x32xf32>
    %cst_51 = arith.constant 1.000000e+00 : f32
    %208 = vector.broadcast %cst_51 : f32 to vector<8x32xf32>
    %209 = arith.subf %207, %208 : vector<8x32xf32>
    %210 = vector.extract_strided_slice %202 {offsets = [0, 96], sizes = [8, 32], strides = [1, 1]} : vector<8x128xf32> to vector<8x32xf32>
    %211 = arith.mulf %204, %188 : vector<8x32xf32>
    %212 = arith.mulf %203, %209 : vector<8x32xf32>
    %213 = arith.addf %211, %212 : vector<8x32xf32>
    %214 = math.tanh %213 : vector<8x32xf32>
    %215 = arith.mulf %210, %214 : vector<8x32xf32>
    %216 = arith.truncf %215 : vector<8x32xf32> to vector<8x32xbf16>
    %cst_52 = arith.constant dense<0.000000e+00> : vector<8x128xf32>
    %217 = tpu.matmul %216, %16, %cst_52 {dimension_numbers = #tpu.dot_dimension_numbers<[1], [0], [0], [1], [0, 0, 1, 1], [], []>} : vector<8x32xbf16>, vector<32x128xbf16>, vector<8x128xf32> -> vector<8x128xf32>
    %218 = vector.broadcast %17 : vector<1x128xf32> to vector<8x128xf32>
    %219 = arith.addf %217, %218 : vector<8x128xf32>
    %c0_53 = arith.constant 0 : index
    %c0_54 = arith.constant 0 : index
    %220 = vector.load %arg5[%c0_53, %c0_54] : memref<32x128xbf16, #tpu.memory_space<vmem>>, vector<32x128xbf16>
    %c0_55 = arith.constant 0 : index
    %c0_56 = arith.constant 0 : index
    %221 = vector.load %arg7[%c0_55, %c0_56] : memref<32x128xbf16, #tpu.memory_space<vmem>>, vector<32x128xbf16>
    %c0_57 = arith.constant 0 : index
    %c0_58 = arith.constant 0 : index
    %222 = vector.load %arg9[%c0_57, %c0_58] : memref<1x128xf32, #tpu.memory_space<vmem>>, vector<1x128xf32>
    %cst_59 = arith.constant 0.000000e+00 : f32
    %223 = vector.broadcast %cst_59 : f32 to vector<8x32xf32>
    %cst_60 = arith.constant 0.000000e+00 : f32
    %224 = vector.broadcast %cst_60 : f32 to vector<8x32xf32>
    %225 = arith.truncf %223 : vector<8x32xf32> to vector<8x32xbf16>
    %cst_61 = arith.constant dense<0.000000e+00> : vector<8x128xf32>
    %226 = tpu.matmul %225, %220, %cst_61 {dimension_numbers = #tpu.dot_dimension_numbers<[1], [0], [0], [1], [0, 0, 1, 1], [], []>} : vector<8x32xbf16>, vector<32x128xbf16>, vector<8x128xf32> -> vector<8x128xf32>
    %227 = arith.addf %44, %226 : vector<8x128xf32>
    %228 = arith.negf %227 : vector<8x128xf32>
    %229 = math.exp %228 : vector<8x128xf32>
    %cst_62 = arith.constant 1.000000e+00 : f32
    %230 = vector.broadcast %cst_62 : f32 to vector<8x128xf32>
    %231 = arith.addf %230, %229 : vector<8x128xf32>
    %232 = arith.divf %230, %231 : vector<8x128xf32>
    %233 = vector.extract_strided_slice %232 {offsets = [0, 0], sizes = [8, 32], strides = [1, 1]} : vector<8x128xf32> to vector<8x32xf32>
    %234 = vector.extract_strided_slice %232 {offsets = [0, 32], sizes = [8, 32], strides = [1, 1]} : vector<8x128xf32> to vector<8x32xf32>
    %235 = vector.extract_strided_slice %232 {offsets = [0, 64], sizes = [8, 32], strides = [1, 1]} : vector<8x128xf32> to vector<8x32xf32>
    %cst_63 = arith.constant 2.000000e+00 : f32
    %236 = vector.broadcast %cst_63 : f32 to vector<8x32xf32>
    %237 = arith.mulf %236, %235 : vector<8x32xf32>
    %cst_64 = arith.constant 1.000000e+00 : f32
    %238 = vector.broadcast %cst_64 : f32 to vector<8x32xf32>
    %239 = arith.subf %237, %238 : vector<8x32xf32>
    %240 = vector.extract_strided_slice %232 {offsets = [0, 96], sizes = [8, 32], strides = [1, 1]} : vector<8x128xf32> to vector<8x32xf32>
    %241 = arith.mulf %234, %224 : vector<8x32xf32>
    %242 = arith.mulf %233, %239 : vector<8x32xf32>
    %243 = arith.addf %241, %242 : vector<8x32xf32>
    %244 = math.tanh %243 : vector<8x32xf32>
    %245 = arith.mulf %240, %244 : vector<8x32xf32>
    %246 = arith.truncf %245 : vector<8x32xf32> to vector<8x32xbf16>
    %cst_65 = arith.constant dense<0.000000e+00> : vector<8x128xf32>
    %247 = tpu.matmul %246, %221, %cst_65 {dimension_numbers = #tpu.dot_dimension_numbers<[1], [0], [0], [1], [0, 0, 1, 1], [], []>} : vector<8x32xbf16>, vector<32x128xbf16>, vector<8x128xf32> -> vector<8x128xf32>
    %248 = vector.broadcast %222 : vector<1x128xf32> to vector<8x128xf32>
    %249 = arith.addf %247, %248 : vector<8x128xf32>
    %250 = arith.truncf %245 : vector<8x32xf32> to vector<8x32xbf16>
    %cst_66 = arith.constant dense<0.000000e+00> : vector<8x128xf32>
    %251 = tpu.matmul %250, %220, %cst_66 {dimension_numbers = #tpu.dot_dimension_numbers<[1], [0], [0], [1], [0, 0, 1, 1], [], []>} : vector<8x32xbf16>, vector<32x128xbf16>, vector<8x128xf32> -> vector<8x128xf32>
    %252 = arith.addf %69, %251 : vector<8x128xf32>
    %253 = arith.negf %252 : vector<8x128xf32>
    %254 = math.exp %253 : vector<8x128xf32>
    %cst_67 = arith.constant 1.000000e+00 : f32
    %255 = vector.broadcast %cst_67 : f32 to vector<8x128xf32>
    %256 = arith.addf %255, %254 : vector<8x128xf32>
    %257 = arith.divf %255, %256 : vector<8x128xf32>
    %258 = vector.extract_strided_slice %257 {offsets = [0, 0], sizes = [8, 32], strides = [1, 1]} : vector<8x128xf32> to vector<8x32xf32>
    %259 = vector.extract_strided_slice %257 {offsets = [0, 32], sizes = [8, 32], strides = [1, 1]} : vector<8x128xf32> to vector<8x32xf32>
    %260 = vector.extract_strided_slice %257 {offsets = [0, 64], sizes = [8, 32], strides = [1, 1]} : vector<8x128xf32> to vector<8x32xf32>
    %cst_68 = arith.constant 2.000000e+00 : f32
    %261 = vector.broadcast %cst_68 : f32 to vector<8x32xf32>
    %262 = arith.mulf %261, %260 : vector<8x32xf32>
    %cst_69 = arith.constant 1.000000e+00 : f32
    %263 = vector.broadcast %cst_69 : f32 to vector<8x32xf32>
    %264 = arith.subf %262, %263 : vector<8x32xf32>
    %265 = vector.extract_strided_slice %257 {offsets = [0, 96], sizes = [8, 32], strides = [1, 1]} : vector<8x128xf32> to vector<8x32xf32>
    %266 = arith.mulf %259, %243 : vector<8x32xf32>
    %267 = arith.mulf %258, %264 : vector<8x32xf32>
    %268 = arith.addf %266, %267 : vector<8x32xf32>
    %269 = math.tanh %268 : vector<8x32xf32>
    %270 = arith.mulf %265, %269 : vector<8x32xf32>
    %271 = arith.truncf %270 : vector<8x32xf32> to vector<8x32xbf16>
    %cst_70 = arith.constant dense<0.000000e+00> : vector<8x128xf32>
    %272 = tpu.matmul %271, %221, %cst_70 {dimension_numbers = #tpu.dot_dimension_numbers<[1], [0], [0], [1], [0, 0, 1, 1], [], []>} : vector<8x32xbf16>, vector<32x128xbf16>, vector<8x128xf32> -> vector<8x128xf32>
    %273 = vector.broadcast %222 : vector<1x128xf32> to vector<8x128xf32>
    %274 = arith.addf %272, %273 : vector<8x128xf32>
    %275 = arith.truncf %270 : vector<8x32xf32> to vector<8x32xbf16>
    %cst_71 = arith.constant dense<0.000000e+00> : vector<8x128xf32>
    %276 = tpu.matmul %275, %220, %cst_71 {dimension_numbers = #tpu.dot_dimension_numbers<[1], [0], [0], [1], [0, 0, 1, 1], [], []>} : vector<8x32xbf16>, vector<32x128xbf16>, vector<8x128xf32> -> vector<8x128xf32>
    %277 = arith.addf %94, %276 : vector<8x128xf32>
    %278 = arith.negf %277 : vector<8x128xf32>
    %279 = math.exp %278 : vector<8x128xf32>
    %cst_72 = arith.constant 1.000000e+00 : f32
    %280 = vector.broadcast %cst_72 : f32 to vector<8x128xf32>
    %281 = arith.addf %280, %279 : vector<8x128xf32>
    %282 = arith.divf %280, %281 : vector<8x128xf32>
    %283 = vector.extract_strided_slice %282 {offsets = [0, 0], sizes = [8, 32], strides = [1, 1]} : vector<8x128xf32> to vector<8x32xf32>
    %284 = vector.extract_strided_slice %282 {offsets = [0, 32], sizes = [8, 32], strides = [1, 1]} : vector<8x128xf32> to vector<8x32xf32>
    %285 = vector.extract_strided_slice %282 {offsets = [0, 64], sizes = [8, 32], strides = [1, 1]} : vector<8x128xf32> to vector<8x32xf32>
    %cst_73 = arith.constant 2.000000e+00 : f32
    %286 = vector.broadcast %cst_73 : f32 to vector<8x32xf32>
    %287 = arith.mulf %286, %285 : vector<8x32xf32>
    %cst_74 = arith.constant 1.000000e+00 : f32
    %288 = vector.broadcast %cst_74 : f32 to vector<8x32xf32>
    %289 = arith.subf %287, %288 : vector<8x32xf32>
    %290 = vector.extract_strided_slice %282 {offsets = [0, 96], sizes = [8, 32], strides = [1, 1]} : vector<8x128xf32> to vector<8x32xf32>
    %291 = arith.mulf %284, %268 : vector<8x32xf32>
    %292 = arith.mulf %283, %289 : vector<8x32xf32>
    %293 = arith.addf %291, %292 : vector<8x32xf32>
    %294 = math.tanh %293 : vector<8x32xf32>
    %295 = arith.mulf %290, %294 : vector<8x32xf32>
    %296 = arith.truncf %295 : vector<8x32xf32> to vector<8x32xbf16>
    %cst_75 = arith.constant dense<0.000000e+00> : vector<8x128xf32>
    %297 = tpu.matmul %296, %221, %cst_75 {dimension_numbers = #tpu.dot_dimension_numbers<[1], [0], [0], [1], [0, 0, 1, 1], [], []>} : vector<8x32xbf16>, vector<32x128xbf16>, vector<8x128xf32> -> vector<8x128xf32>
    %298 = vector.broadcast %222 : vector<1x128xf32> to vector<8x128xf32>
    %299 = arith.addf %297, %298 : vector<8x128xf32>
    %300 = arith.truncf %295 : vector<8x32xf32> to vector<8x32xbf16>
    %cst_76 = arith.constant dense<0.000000e+00> : vector<8x128xf32>
    %301 = tpu.matmul %300, %220, %cst_76 {dimension_numbers = #tpu.dot_dimension_numbers<[1], [0], [0], [1], [0, 0, 1, 1], [], []>} : vector<8x32xbf16>, vector<32x128xbf16>, vector<8x128xf32> -> vector<8x128xf32>
    %302 = arith.addf %119, %301 : vector<8x128xf32>
    %303 = arith.negf %302 : vector<8x128xf32>
    %304 = math.exp %303 : vector<8x128xf32>
    %cst_77 = arith.constant 1.000000e+00 : f32
    %305 = vector.broadcast %cst_77 : f32 to vector<8x128xf32>
    %306 = arith.addf %305, %304 : vector<8x128xf32>
    %307 = arith.divf %305, %306 : vector<8x128xf32>
    %308 = vector.extract_strided_slice %307 {offsets = [0, 0], sizes = [8, 32], strides = [1, 1]} : vector<8x128xf32> to vector<8x32xf32>
    %309 = vector.extract_strided_slice %307 {offsets = [0, 32], sizes = [8, 32], strides = [1, 1]} : vector<8x128xf32> to vector<8x32xf32>
    %310 = vector.extract_strided_slice %307 {offsets = [0, 64], sizes = [8, 32], strides = [1, 1]} : vector<8x128xf32> to vector<8x32xf32>
    %cst_78 = arith.constant 2.000000e+00 : f32
    %311 = vector.broadcast %cst_78 : f32 to vector<8x32xf32>
    %312 = arith.mulf %311, %310 : vector<8x32xf32>
    %cst_79 = arith.constant 1.000000e+00 : f32
    %313 = vector.broadcast %cst_79 : f32 to vector<8x32xf32>
    %314 = arith.subf %312, %313 : vector<8x32xf32>
    %315 = vector.extract_strided_slice %307 {offsets = [0, 96], sizes = [8, 32], strides = [1, 1]} : vector<8x128xf32> to vector<8x32xf32>
    %316 = arith.mulf %309, %293 : vector<8x32xf32>
    %317 = arith.mulf %308, %314 : vector<8x32xf32>
    %318 = arith.addf %316, %317 : vector<8x32xf32>
    %319 = math.tanh %318 : vector<8x32xf32>
    %320 = arith.mulf %315, %319 : vector<8x32xf32>
    %321 = arith.truncf %320 : vector<8x32xf32> to vector<8x32xbf16>
    %cst_80 = arith.constant dense<0.000000e+00> : vector<8x128xf32>
    %322 = tpu.matmul %321, %221, %cst_80 {dimension_numbers = #tpu.dot_dimension_numbers<[1], [0], [0], [1], [0, 0, 1, 1], [], []>} : vector<8x32xbf16>, vector<32x128xbf16>, vector<8x128xf32> -> vector<8x128xf32>
    %323 = vector.broadcast %222 : vector<1x128xf32> to vector<8x128xf32>
    %324 = arith.addf %322, %323 : vector<8x128xf32>
    %325 = arith.truncf %320 : vector<8x32xf32> to vector<8x32xbf16>
    %cst_81 = arith.constant dense<0.000000e+00> : vector<8x128xf32>
    %326 = tpu.matmul %325, %220, %cst_81 {dimension_numbers = #tpu.dot_dimension_numbers<[1], [0], [0], [1], [0, 0, 1, 1], [], []>} : vector<8x32xbf16>, vector<32x128xbf16>, vector<8x128xf32> -> vector<8x128xf32>
    %327 = arith.addf %144, %326 : vector<8x128xf32>
    %328 = arith.negf %327 : vector<8x128xf32>
    %329 = math.exp %328 : vector<8x128xf32>
    %cst_82 = arith.constant 1.000000e+00 : f32
    %330 = vector.broadcast %cst_82 : f32 to vector<8x128xf32>
    %331 = arith.addf %330, %329 : vector<8x128xf32>
    %332 = arith.divf %330, %331 : vector<8x128xf32>
    %333 = vector.extract_strided_slice %332 {offsets = [0, 0], sizes = [8, 32], strides = [1, 1]} : vector<8x128xf32> to vector<8x32xf32>
    %334 = vector.extract_strided_slice %332 {offsets = [0, 32], sizes = [8, 32], strides = [1, 1]} : vector<8x128xf32> to vector<8x32xf32>
    %335 = vector.extract_strided_slice %332 {offsets = [0, 64], sizes = [8, 32], strides = [1, 1]} : vector<8x128xf32> to vector<8x32xf32>
    %cst_83 = arith.constant 2.000000e+00 : f32
    %336 = vector.broadcast %cst_83 : f32 to vector<8x32xf32>
    %337 = arith.mulf %336, %335 : vector<8x32xf32>
    %cst_84 = arith.constant 1.000000e+00 : f32
    %338 = vector.broadcast %cst_84 : f32 to vector<8x32xf32>
    %339 = arith.subf %337, %338 : vector<8x32xf32>
    %340 = vector.extract_strided_slice %332 {offsets = [0, 96], sizes = [8, 32], strides = [1, 1]} : vector<8x128xf32> to vector<8x32xf32>
    %341 = arith.mulf %334, %318 : vector<8x32xf32>
    %342 = arith.mulf %333, %339 : vector<8x32xf32>
    %343 = arith.addf %341, %342 : vector<8x32xf32>
    %344 = math.tanh %343 : vector<8x32xf32>
    %345 = arith.mulf %340, %344 : vector<8x32xf32>
    %346 = arith.truncf %345 : vector<8x32xf32> to vector<8x32xbf16>
    %cst_85 = arith.constant dense<0.000000e+00> : vector<8x128xf32>
    %347 = tpu.matmul %346, %221, %cst_85 {dimension_numbers = #tpu.dot_dimension_numbers<[1], [0], [0], [1], [0, 0, 1, 1], [], []>} : vector<8x32xbf16>, vector<32x128xbf16>, vector<8x128xf32> -> vector<8x128xf32>
    %348 = vector.broadcast %222 : vector<1x128xf32> to vector<8x128xf32>
    %349 = arith.addf %347, %348 : vector<8x128xf32>
    %350 = arith.truncf %345 : vector<8x32xf32> to vector<8x32xbf16>
    %cst_86 = arith.constant dense<0.000000e+00> : vector<8x128xf32>
    %351 = tpu.matmul %350, %220, %cst_86 {dimension_numbers = #tpu.dot_dimension_numbers<[1], [0], [0], [1], [0, 0, 1, 1], [], []>} : vector<8x32xbf16>, vector<32x128xbf16>, vector<8x128xf32> -> vector<8x128xf32>
    %352 = arith.addf %169, %351 : vector<8x128xf32>
    %353 = arith.negf %352 : vector<8x128xf32>
    %354 = math.exp %353 : vector<8x128xf32>
    %cst_87 = arith.constant 1.000000e+00 : f32
    %355 = vector.broadcast %cst_87 : f32 to vector<8x128xf32>
    %356 = arith.addf %355, %354 : vector<8x128xf32>
    %357 = arith.divf %355, %356 : vector<8x128xf32>
    %358 = vector.extract_strided_slice %357 {offsets = [0, 0], sizes = [8, 32], strides = [1, 1]} : vector<8x128xf32> to vector<8x32xf32>
    %359 = vector.extract_strided_slice %357 {offsets = [0, 32], sizes = [8, 32], strides = [1, 1]} : vector<8x128xf32> to vector<8x32xf32>
    %360 = vector.extract_strided_slice %357 {offsets = [0, 64], sizes = [8, 32], strides = [1, 1]} : vector<8x128xf32> to vector<8x32xf32>
    %cst_88 = arith.constant 2.000000e+00 : f32
    %361 = vector.broadcast %cst_88 : f32 to vector<8x32xf32>
    %362 = arith.mulf %361, %360 : vector<8x32xf32>
    %cst_89 = arith.constant 1.000000e+00 : f32
    %363 = vector.broadcast %cst_89 : f32 to vector<8x32xf32>
    %364 = arith.subf %362, %363 : vector<8x32xf32>
    %365 = vector.extract_strided_slice %357 {offsets = [0, 96], sizes = [8, 32], strides = [1, 1]} : vector<8x128xf32> to vector<8x32xf32>
    %366 = arith.mulf %359, %343 : vector<8x32xf32>
    %367 = arith.mulf %358, %364 : vector<8x32xf32>
    %368 = arith.addf %366, %367 : vector<8x32xf32>
    %369 = math.tanh %368 : vector<8x32xf32>
    %370 = arith.mulf %365, %369 : vector<8x32xf32>
    %371 = arith.truncf %370 : vector<8x32xf32> to vector<8x32xbf16>
    %cst_90 = arith.constant dense<0.000000e+00> : vector<8x128xf32>
    %372 = tpu.matmul %371, %221, %cst_90 {dimension_numbers = #tpu.dot_dimension_numbers<[1], [0], [0], [1], [0, 0, 1, 1], [], []>} : vector<8x32xbf16>, vector<32x128xbf16>, vector<8x128xf32> -> vector<8x128xf32>
    %373 = vector.broadcast %222 : vector<1x128xf32> to vector<8x128xf32>
    %374 = arith.addf %372, %373 : vector<8x128xf32>
    %375 = arith.truncf %370 : vector<8x32xf32> to vector<8x32xbf16>
    %cst_91 = arith.constant dense<0.000000e+00> : vector<8x128xf32>
    %376 = tpu.matmul %375, %220, %cst_91 {dimension_numbers = #tpu.dot_dimension_numbers<[1], [0], [0], [1], [0, 0, 1, 1], [], []>} : vector<8x32xbf16>, vector<32x128xbf16>, vector<8x128xf32> -> vector<8x128xf32>
    %377 = arith.addf %194, %376 : vector<8x128xf32>
    %378 = arith.negf %377 : vector<8x128xf32>
    %379 = math.exp %378 : vector<8x128xf32>
    %cst_92 = arith.constant 1.000000e+00 : f32
    %380 = vector.broadcast %cst_92 : f32 to vector<8x128xf32>
    %381 = arith.addf %380, %379 : vector<8x128xf32>
    %382 = arith.divf %380, %381 : vector<8x128xf32>
    %383 = vector.extract_strided_slice %382 {offsets = [0, 0], sizes = [8, 32], strides = [1, 1]} : vector<8x128xf32> to vector<8x32xf32>
    %384 = vector.extract_strided_slice %382 {offsets = [0, 32], sizes = [8, 32], strides = [1, 1]} : vector<8x128xf32> to vector<8x32xf32>
    %385 = vector.extract_strided_slice %382 {offsets = [0, 64], sizes = [8, 32], strides = [1, 1]} : vector<8x128xf32> to vector<8x32xf32>
    %cst_93 = arith.constant 2.000000e+00 : f32
    %386 = vector.broadcast %cst_93 : f32 to vector<8x32xf32>
    %387 = arith.mulf %386, %385 : vector<8x32xf32>
    %cst_94 = arith.constant 1.000000e+00 : f32
    %388 = vector.broadcast %cst_94 : f32 to vector<8x32xf32>
    %389 = arith.subf %387, %388 : vector<8x32xf32>
    %390 = vector.extract_strided_slice %382 {offsets = [0, 96], sizes = [8, 32], strides = [1, 1]} : vector<8x128xf32> to vector<8x32xf32>
    %391 = arith.mulf %384, %368 : vector<8x32xf32>
    %392 = arith.mulf %383, %389 : vector<8x32xf32>
    %393 = arith.addf %391, %392 : vector<8x32xf32>
    %394 = math.tanh %393 : vector<8x32xf32>
    %395 = arith.mulf %390, %394 : vector<8x32xf32>
    %396 = arith.truncf %395 : vector<8x32xf32> to vector<8x32xbf16>
    %cst_95 = arith.constant dense<0.000000e+00> : vector<8x128xf32>
    %397 = tpu.matmul %396, %221, %cst_95 {dimension_numbers = #tpu.dot_dimension_numbers<[1], [0], [0], [1], [0, 0, 1, 1], [], []>} : vector<8x32xbf16>, vector<32x128xbf16>, vector<8x128xf32> -> vector<8x128xf32>
    %398 = vector.broadcast %222 : vector<1x128xf32> to vector<8x128xf32>
    %399 = arith.addf %397, %398 : vector<8x128xf32>
    %400 = arith.truncf %395 : vector<8x32xf32> to vector<8x32xbf16>
    %cst_96 = arith.constant dense<0.000000e+00> : vector<8x128xf32>
    %401 = tpu.matmul %400, %220, %cst_96 {dimension_numbers = #tpu.dot_dimension_numbers<[1], [0], [0], [1], [0, 0, 1, 1], [], []>} : vector<8x32xbf16>, vector<32x128xbf16>, vector<8x128xf32> -> vector<8x128xf32>
    %402 = arith.addf %219, %401 : vector<8x128xf32>
    %403 = arith.negf %402 : vector<8x128xf32>
    %404 = math.exp %403 : vector<8x128xf32>
    %cst_97 = arith.constant 1.000000e+00 : f32
    %405 = vector.broadcast %cst_97 : f32 to vector<8x128xf32>
    %406 = arith.addf %405, %404 : vector<8x128xf32>
    %407 = arith.divf %405, %406 : vector<8x128xf32>
    %408 = vector.extract_strided_slice %407 {offsets = [0, 0], sizes = [8, 32], strides = [1, 1]} : vector<8x128xf32> to vector<8x32xf32>
    %409 = vector.extract_strided_slice %407 {offsets = [0, 32], sizes = [8, 32], strides = [1, 1]} : vector<8x128xf32> to vector<8x32xf32>
    %410 = vector.extract_strided_slice %407 {offsets = [0, 64], sizes = [8, 32], strides = [1, 1]} : vector<8x128xf32> to vector<8x32xf32>
    %cst_98 = arith.constant 2.000000e+00 : f32
    %411 = vector.broadcast %cst_98 : f32 to vector<8x32xf32>
    %412 = arith.mulf %411, %410 : vector<8x32xf32>
    %cst_99 = arith.constant 1.000000e+00 : f32
    %413 = vector.broadcast %cst_99 : f32 to vector<8x32xf32>
    %414 = arith.subf %412, %413 : vector<8x32xf32>
    %415 = vector.extract_strided_slice %407 {offsets = [0, 96], sizes = [8, 32], strides = [1, 1]} : vector<8x128xf32> to vector<8x32xf32>
    %416 = arith.mulf %409, %393 : vector<8x32xf32>
    %417 = arith.mulf %408, %414 : vector<8x32xf32>
    %418 = arith.addf %416, %417 : vector<8x32xf32>
    %419 = math.tanh %418 : vector<8x32xf32>
    %420 = arith.mulf %415, %419 : vector<8x32xf32>
    %421 = arith.truncf %420 : vector<8x32xf32> to vector<8x32xbf16>
    %cst_100 = arith.constant dense<0.000000e+00> : vector<8x128xf32>
    %422 = tpu.matmul %421, %221, %cst_100 {dimension_numbers = #tpu.dot_dimension_numbers<[1], [0], [0], [1], [0, 0, 1, 1], [], []>} : vector<8x32xbf16>, vector<32x128xbf16>, vector<8x128xf32> -> vector<8x128xf32>
    %423 = vector.broadcast %222 : vector<1x128xf32> to vector<8x128xf32>
    %424 = arith.addf %422, %423 : vector<8x128xf32>
    %c0_101 = arith.constant 0 : index
    %c0_102 = arith.constant 0 : index
    %425 = vector.load %arg8[%c0_101, %c0_102] : memref<32x128xbf16, #tpu.memory_space<vmem>>, vector<32x128xbf16>
    %c0_103 = arith.constant 0 : index
    %c0_104 = arith.constant 0 : index
    %426 = vector.load %arg10[%c0_103, %c0_104] : memref<32x128xbf16, #tpu.memory_space<vmem>>, vector<32x128xbf16>
    %c0_105 = arith.constant 0 : index
    %c0_106 = arith.constant 0 : index
    %427 = vector.load %arg12[%c0_105, %c0_106] : memref<1x128xf32, #tpu.memory_space<vmem>>, vector<1x128xf32>
    %cst_107 = arith.constant 0.000000e+00 : f32
    %428 = vector.broadcast %cst_107 : f32 to vector<8x32xf32>
    %cst_108 = arith.constant 0.000000e+00 : f32
    %429 = vector.broadcast %cst_108 : f32 to vector<8x32xf32>
    %430 = arith.truncf %428 : vector<8x32xf32> to vector<8x32xbf16>
    %cst_109 = arith.constant dense<0.000000e+00> : vector<8x128xf32>
    %431 = tpu.matmul %430, %425, %cst_109 {dimension_numbers = #tpu.dot_dimension_numbers<[1], [0], [0], [1], [0, 0, 1, 1], [], []>} : vector<8x32xbf16>, vector<32x128xbf16>, vector<8x128xf32> -> vector<8x128xf32>
    %432 = arith.addf %249, %431 : vector<8x128xf32>
    %433 = arith.negf %432 : vector<8x128xf32>
    %434 = math.exp %433 : vector<8x128xf32>
    %cst_110 = arith.constant 1.000000e+00 : f32
    %435 = vector.broadcast %cst_110 : f32 to vector<8x128xf32>
    %436 = arith.addf %435, %434 : vector<8x128xf32>
    %437 = arith.divf %435, %436 : vector<8x128xf32>
    %438 = vector.extract_strided_slice %437 {offsets = [0, 0], sizes = [8, 32], strides = [1, 1]} : vector<8x128xf32> to vector<8x32xf32>
    %439 = vector.extract_strided_slice %437 {offsets = [0, 32], sizes = [8, 32], strides = [1, 1]} : vector<8x128xf32> to vector<8x32xf32>
    %440 = vector.extract_strided_slice %437 {offsets = [0, 64], sizes = [8, 32], strides = [1, 1]} : vector<8x128xf32> to vector<8x32xf32>
    %cst_111 = arith.constant 2.000000e+00 : f32
    %441 = vector.broadcast %cst_111 : f32 to vector<8x32xf32>
    %442 = arith.mulf %441, %440 : vector<8x32xf32>
    %cst_112 = arith.constant 1.000000e+00 : f32
    %443 = vector.broadcast %cst_112 : f32 to vector<8x32xf32>
    %444 = arith.subf %442, %443 : vector<8x32xf32>
    %445 = vector.extract_strided_slice %437 {offsets = [0, 96], sizes = [8, 32], strides = [1, 1]} : vector<8x128xf32> to vector<8x32xf32>
    %446 = arith.mulf %439, %429 : vector<8x32xf32>
    %447 = arith.mulf %438, %444 : vector<8x32xf32>
    %448 = arith.addf %446, %447 : vector<8x32xf32>
    %449 = math.tanh %448 : vector<8x32xf32>
    %450 = arith.mulf %445, %449 : vector<8x32xf32>
    %451 = arith.truncf %450 : vector<8x32xf32> to vector<8x32xbf16>
    %cst_113 = arith.constant dense<0.000000e+00> : vector<8x128xf32>
    %452 = tpu.matmul %451, %426, %cst_113 {dimension_numbers = #tpu.dot_dimension_numbers<[1], [0], [0], [1], [0, 0, 1, 1], [], []>} : vector<8x32xbf16>, vector<32x128xbf16>, vector<8x128xf32> -> vector<8x128xf32>
    %453 = vector.broadcast %427 : vector<1x128xf32> to vector<8x128xf32>
    %454 = arith.addf %452, %453 : vector<8x128xf32>
    %455 = arith.truncf %450 : vector<8x32xf32> to vector<8x32xbf16>
    %cst_114 = arith.constant dense<0.000000e+00> : vector<8x128xf32>
    %456 = tpu.matmul %455, %425, %cst_114 {dimension_numbers = #tpu.dot_dimension_numbers<[1], [0], [0], [1], [0, 0, 1, 1], [], []>} : vector<8x32xbf16>, vector<32x128xbf16>, vector<8x128xf32> -> vector<8x128xf32>
    %457 = arith.addf %274, %456 : vector<8x128xf32>
    %458 = arith.negf %457 : vector<8x128xf32>
    %459 = math.exp %458 : vector<8x128xf32>
    %cst_115 = arith.constant 1.000000e+00 : f32
    %460 = vector.broadcast %cst_115 : f32 to vector<8x128xf32>
    %461 = arith.addf %460, %459 : vector<8x128xf32>
    %462 = arith.divf %460, %461 : vector<8x128xf32>
    %463 = vector.extract_strided_slice %462 {offsets = [0, 0], sizes = [8, 32], strides = [1, 1]} : vector<8x128xf32> to vector<8x32xf32>
    %464 = vector.extract_strided_slice %462 {offsets = [0, 32], sizes = [8, 32], strides = [1, 1]} : vector<8x128xf32> to vector<8x32xf32>
    %465 = vector.extract_strided_slice %462 {offsets = [0, 64], sizes = [8, 32], strides = [1, 1]} : vector<8x128xf32> to vector<8x32xf32>
    %cst_116 = arith.constant 2.000000e+00 : f32
    %466 = vector.broadcast %cst_116 : f32 to vector<8x32xf32>
    %467 = arith.mulf %466, %465 : vector<8x32xf32>
    %cst_117 = arith.constant 1.000000e+00 : f32
    %468 = vector.broadcast %cst_117 : f32 to vector<8x32xf32>
    %469 = arith.subf %467, %468 : vector<8x32xf32>
    %470 = vector.extract_strided_slice %462 {offsets = [0, 96], sizes = [8, 32], strides = [1, 1]} : vector<8x128xf32> to vector<8x32xf32>
    %471 = arith.mulf %464, %448 : vector<8x32xf32>
    %472 = arith.mulf %463, %469 : vector<8x32xf32>
    %473 = arith.addf %471, %472 : vector<8x32xf32>
    %474 = math.tanh %473 : vector<8x32xf32>
    %475 = arith.mulf %470, %474 : vector<8x32xf32>
    %476 = arith.truncf %475 : vector<8x32xf32> to vector<8x32xbf16>
    %cst_118 = arith.constant dense<0.000000e+00> : vector<8x128xf32>
    %477 = tpu.matmul %476, %426, %cst_118 {dimension_numbers = #tpu.dot_dimension_numbers<[1], [0], [0], [1], [0, 0, 1, 1], [], []>} : vector<8x32xbf16>, vector<32x128xbf16>, vector<8x128xf32> -> vector<8x128xf32>
    %478 = vector.broadcast %427 : vector<1x128xf32> to vector<8x128xf32>
    %479 = arith.addf %477, %478 : vector<8x128xf32>
    %480 = arith.truncf %475 : vector<8x32xf32> to vector<8x32xbf16>
    %cst_119 = arith.constant dense<0.000000e+00> : vector<8x128xf32>
    %481 = tpu.matmul %480, %425, %cst_119 {dimension_numbers = #tpu.dot_dimension_numbers<[1], [0], [0], [1], [0, 0, 1, 1], [], []>} : vector<8x32xbf16>, vector<32x128xbf16>, vector<8x128xf32> -> vector<8x128xf32>
    %482 = arith.addf %299, %481 : vector<8x128xf32>
    %483 = arith.negf %482 : vector<8x128xf32>
    %484 = math.exp %483 : vector<8x128xf32>
    %cst_120 = arith.constant 1.000000e+00 : f32
    %485 = vector.broadcast %cst_120 : f32 to vector<8x128xf32>
    %486 = arith.addf %485, %484 : vector<8x128xf32>
    %487 = arith.divf %485, %486 : vector<8x128xf32>
    %488 = vector.extract_strided_slice %487 {offsets = [0, 0], sizes = [8, 32], strides = [1, 1]} : vector<8x128xf32> to vector<8x32xf32>
    %489 = vector.extract_strided_slice %487 {offsets = [0, 32], sizes = [8, 32], strides = [1, 1]} : vector<8x128xf32> to vector<8x32xf32>
    %490 = vector.extract_strided_slice %487 {offsets = [0, 64], sizes = [8, 32], strides = [1, 1]} : vector<8x128xf32> to vector<8x32xf32>
    %cst_121 = arith.constant 2.000000e+00 : f32
    %491 = vector.broadcast %cst_121 : f32 to vector<8x32xf32>
    %492 = arith.mulf %491, %490 : vector<8x32xf32>
    %cst_122 = arith.constant 1.000000e+00 : f32
    %493 = vector.broadcast %cst_122 : f32 to vector<8x32xf32>
    %494 = arith.subf %492, %493 : vector<8x32xf32>
    %495 = vector.extract_strided_slice %487 {offsets = [0, 96], sizes = [8, 32], strides = [1, 1]} : vector<8x128xf32> to vector<8x32xf32>
    %496 = arith.mulf %489, %473 : vector<8x32xf32>
    %497 = arith.mulf %488, %494 : vector<8x32xf32>
    %498 = arith.addf %496, %497 : vector<8x32xf32>
    %499 = math.tanh %498 : vector<8x32xf32>
    %500 = arith.mulf %495, %499 : vector<8x32xf32>
    %501 = arith.truncf %500 : vector<8x32xf32> to vector<8x32xbf16>
    %cst_123 = arith.constant dense<0.000000e+00> : vector<8x128xf32>
    %502 = tpu.matmul %501, %426, %cst_123 {dimension_numbers = #tpu.dot_dimension_numbers<[1], [0], [0], [1], [0, 0, 1, 1], [], []>} : vector<8x32xbf16>, vector<32x128xbf16>, vector<8x128xf32> -> vector<8x128xf32>
    %503 = vector.broadcast %427 : vector<1x128xf32> to vector<8x128xf32>
    %504 = arith.addf %502, %503 : vector<8x128xf32>
    %505 = arith.truncf %500 : vector<8x32xf32> to vector<8x32xbf16>
    %cst_124 = arith.constant dense<0.000000e+00> : vector<8x128xf32>
    %506 = tpu.matmul %505, %425, %cst_124 {dimension_numbers = #tpu.dot_dimension_numbers<[1], [0], [0], [1], [0, 0, 1, 1], [], []>} : vector<8x32xbf16>, vector<32x128xbf16>, vector<8x128xf32> -> vector<8x128xf32>
    %507 = arith.addf %324, %506 : vector<8x128xf32>
    %508 = arith.negf %507 : vector<8x128xf32>
    %509 = math.exp %508 : vector<8x128xf32>
    %cst_125 = arith.constant 1.000000e+00 : f32
    %510 = vector.broadcast %cst_125 : f32 to vector<8x128xf32>
    %511 = arith.addf %510, %509 : vector<8x128xf32>
    %512 = arith.divf %510, %511 : vector<8x128xf32>
    %513 = vector.extract_strided_slice %512 {offsets = [0, 0], sizes = [8, 32], strides = [1, 1]} : vector<8x128xf32> to vector<8x32xf32>
    %514 = vector.extract_strided_slice %512 {offsets = [0, 32], sizes = [8, 32], strides = [1, 1]} : vector<8x128xf32> to vector<8x32xf32>
    %515 = vector.extract_strided_slice %512 {offsets = [0, 64], sizes = [8, 32], strides = [1, 1]} : vector<8x128xf32> to vector<8x32xf32>
    %cst_126 = arith.constant 2.000000e+00 : f32
    %516 = vector.broadcast %cst_126 : f32 to vector<8x32xf32>
    %517 = arith.mulf %516, %515 : vector<8x32xf32>
    %cst_127 = arith.constant 1.000000e+00 : f32
    %518 = vector.broadcast %cst_127 : f32 to vector<8x32xf32>
    %519 = arith.subf %517, %518 : vector<8x32xf32>
    %520 = vector.extract_strided_slice %512 {offsets = [0, 96], sizes = [8, 32], strides = [1, 1]} : vector<8x128xf32> to vector<8x32xf32>
    %521 = arith.mulf %514, %498 : vector<8x32xf32>
    %522 = arith.mulf %513, %519 : vector<8x32xf32>
    %523 = arith.addf %521, %522 : vector<8x32xf32>
    %524 = math.tanh %523 : vector<8x32xf32>
    %525 = arith.mulf %520, %524 : vector<8x32xf32>
    %526 = arith.truncf %525 : vector<8x32xf32> to vector<8x32xbf16>
    %cst_128 = arith.constant dense<0.000000e+00> : vector<8x128xf32>
    %527 = tpu.matmul %526, %426, %cst_128 {dimension_numbers = #tpu.dot_dimension_numbers<[1], [0], [0], [1], [0, 0, 1, 1], [], []>} : vector<8x32xbf16>, vector<32x128xbf16>, vector<8x128xf32> -> vector<8x128xf32>
    %528 = vector.broadcast %427 : vector<1x128xf32> to vector<8x128xf32>
    %529 = arith.addf %527, %528 : vector<8x128xf32>
    %530 = arith.truncf %525 : vector<8x32xf32> to vector<8x32xbf16>
    %cst_129 = arith.constant dense<0.000000e+00> : vector<8x128xf32>
    %531 = tpu.matmul %530, %425, %cst_129 {dimension_numbers = #tpu.dot_dimension_numbers<[1], [0], [0], [1], [0, 0, 1, 1], [], []>} : vector<8x32xbf16>, vector<32x128xbf16>, vector<8x128xf32> -> vector<8x128xf32>
    %532 = arith.addf %349, %531 : vector<8x128xf32>
    %533 = arith.negf %532 : vector<8x128xf32>
    %534 = math.exp %533 : vector<8x128xf32>
    %cst_130 = arith.constant 1.000000e+00 : f32
    %535 = vector.broadcast %cst_130 : f32 to vector<8x128xf32>
    %536 = arith.addf %535, %534 : vector<8x128xf32>
    %537 = arith.divf %535, %536 : vector<8x128xf32>
    %538 = vector.extract_strided_slice %537 {offsets = [0, 0], sizes = [8, 32], strides = [1, 1]} : vector<8x128xf32> to vector<8x32xf32>
    %539 = vector.extract_strided_slice %537 {offsets = [0, 32], sizes = [8, 32], strides = [1, 1]} : vector<8x128xf32> to vector<8x32xf32>
    %540 = vector.extract_strided_slice %537 {offsets = [0, 64], sizes = [8, 32], strides = [1, 1]} : vector<8x128xf32> to vector<8x32xf32>
    %cst_131 = arith.constant 2.000000e+00 : f32
    %541 = vector.broadcast %cst_131 : f32 to vector<8x32xf32>
    %542 = arith.mulf %541, %540 : vector<8x32xf32>
    %cst_132 = arith.constant 1.000000e+00 : f32
    %543 = vector.broadcast %cst_132 : f32 to vector<8x32xf32>
    %544 = arith.subf %542, %543 : vector<8x32xf32>
    %545 = vector.extract_strided_slice %537 {offsets = [0, 96], sizes = [8, 32], strides = [1, 1]} : vector<8x128xf32> to vector<8x32xf32>
    %546 = arith.mulf %539, %523 : vector<8x32xf32>
    %547 = arith.mulf %538, %544 : vector<8x32xf32>
    %548 = arith.addf %546, %547 : vector<8x32xf32>
    %549 = math.tanh %548 : vector<8x32xf32>
    %550 = arith.mulf %545, %549 : vector<8x32xf32>
    %551 = arith.truncf %550 : vector<8x32xf32> to vector<8x32xbf16>
    %cst_133 = arith.constant dense<0.000000e+00> : vector<8x128xf32>
    %552 = tpu.matmul %551, %426, %cst_133 {dimension_numbers = #tpu.dot_dimension_numbers<[1], [0], [0], [1], [0, 0, 1, 1], [], []>} : vector<8x32xbf16>, vector<32x128xbf16>, vector<8x128xf32> -> vector<8x128xf32>
    %553 = vector.broadcast %427 : vector<1x128xf32> to vector<8x128xf32>
    %554 = arith.addf %552, %553 : vector<8x128xf32>
    %555 = arith.truncf %550 : vector<8x32xf32> to vector<8x32xbf16>
    %cst_134 = arith.constant dense<0.000000e+00> : vector<8x128xf32>
    %556 = tpu.matmul %555, %425, %cst_134 {dimension_numbers = #tpu.dot_dimension_numbers<[1], [0], [0], [1], [0, 0, 1, 1], [], []>} : vector<8x32xbf16>, vector<32x128xbf16>, vector<8x128xf32> -> vector<8x128xf32>
    %557 = arith.addf %374, %556 : vector<8x128xf32>
    %558 = arith.negf %557 : vector<8x128xf32>
    %559 = math.exp %558 : vector<8x128xf32>
    %cst_135 = arith.constant 1.000000e+00 : f32
    %560 = vector.broadcast %cst_135 : f32 to vector<8x128xf32>
    %561 = arith.addf %560, %559 : vector<8x128xf32>
    %562 = arith.divf %560, %561 : vector<8x128xf32>
    %563 = vector.extract_strided_slice %562 {offsets = [0, 0], sizes = [8, 32], strides = [1, 1]} : vector<8x128xf32> to vector<8x32xf32>
    %564 = vector.extract_strided_slice %562 {offsets = [0, 32], sizes = [8, 32], strides = [1, 1]} : vector<8x128xf32> to vector<8x32xf32>
    %565 = vector.extract_strided_slice %562 {offsets = [0, 64], sizes = [8, 32], strides = [1, 1]} : vector<8x128xf32> to vector<8x32xf32>
    %cst_136 = arith.constant 2.000000e+00 : f32
    %566 = vector.broadcast %cst_136 : f32 to vector<8x32xf32>
    %567 = arith.mulf %566, %565 : vector<8x32xf32>
    %cst_137 = arith.constant 1.000000e+00 : f32
    %568 = vector.broadcast %cst_137 : f32 to vector<8x32xf32>
    %569 = arith.subf %567, %568 : vector<8x32xf32>
    %570 = vector.extract_strided_slice %562 {offsets = [0, 96], sizes = [8, 32], strides = [1, 1]} : vector<8x128xf32> to vector<8x32xf32>
    %571 = arith.mulf %564, %548 : vector<8x32xf32>
    %572 = arith.mulf %563, %569 : vector<8x32xf32>
    %573 = arith.addf %571, %572 : vector<8x32xf32>
    %574 = math.tanh %573 : vector<8x32xf32>
    %575 = arith.mulf %570, %574 : vector<8x32xf32>
    %576 = arith.truncf %575 : vector<8x32xf32> to vector<8x32xbf16>
    %cst_138 = arith.constant dense<0.000000e+00> : vector<8x128xf32>
    %577 = tpu.matmul %576, %426, %cst_138 {dimension_numbers = #tpu.dot_dimension_numbers<[1], [0], [0], [1], [0, 0, 1, 1], [], []>} : vector<8x32xbf16>, vector<32x128xbf16>, vector<8x128xf32> -> vector<8x128xf32>
    %578 = vector.broadcast %427 : vector<1x128xf32> to vector<8x128xf32>
    %579 = arith.addf %577, %578 : vector<8x128xf32>
    %580 = arith.truncf %575 : vector<8x32xf32> to vector<8x32xbf16>
    %cst_139 = arith.constant dense<0.000000e+00> : vector<8x128xf32>
    %581 = tpu.matmul %580, %425, %cst_139 {dimension_numbers = #tpu.dot_dimension_numbers<[1], [0], [0], [1], [0, 0, 1, 1], [], []>} : vector<8x32xbf16>, vector<32x128xbf16>, vector<8x128xf32> -> vector<8x128xf32>
    %582 = arith.addf %399, %581 : vector<8x128xf32>
    %583 = arith.negf %582 : vector<8x128xf32>
    %584 = math.exp %583 : vector<8x128xf32>
    %cst_140 = arith.constant 1.000000e+00 : f32
    %585 = vector.broadcast %cst_140 : f32 to vector<8x128xf32>
    %586 = arith.addf %585, %584 : vector<8x128xf32>
    %587 = arith.divf %585, %586 : vector<8x128xf32>
    %588 = vector.extract_strided_slice %587 {offsets = [0, 0], sizes = [8, 32], strides = [1, 1]} : vector<8x128xf32> to vector<8x32xf32>
    %589 = vector.extract_strided_slice %587 {offsets = [0, 32], sizes = [8, 32], strides = [1, 1]} : vector<8x128xf32> to vector<8x32xf32>
    %590 = vector.extract_strided_slice %587 {offsets = [0, 64], sizes = [8, 32], strides = [1, 1]} : vector<8x128xf32> to vector<8x32xf32>
    %cst_141 = arith.constant 2.000000e+00 : f32
    %591 = vector.broadcast %cst_141 : f32 to vector<8x32xf32>
    %592 = arith.mulf %591, %590 : vector<8x32xf32>
    %cst_142 = arith.constant 1.000000e+00 : f32
    %593 = vector.broadcast %cst_142 : f32 to vector<8x32xf32>
    %594 = arith.subf %592, %593 : vector<8x32xf32>
    %595 = vector.extract_strided_slice %587 {offsets = [0, 96], sizes = [8, 32], strides = [1, 1]} : vector<8x128xf32> to vector<8x32xf32>
    %596 = arith.mulf %589, %573 : vector<8x32xf32>
    %597 = arith.mulf %588, %594 : vector<8x32xf32>
    %598 = arith.addf %596, %597 : vector<8x32xf32>
    %599 = math.tanh %598 : vector<8x32xf32>
    %600 = arith.mulf %595, %599 : vector<8x32xf32>
    %601 = arith.truncf %600 : vector<8x32xf32> to vector<8x32xbf16>
    %cst_143 = arith.constant dense<0.000000e+00> : vector<8x128xf32>
    %602 = tpu.matmul %601, %426, %cst_143 {dimension_numbers = #tpu.dot_dimension_numbers<[1], [0], [0], [1], [0, 0, 1, 1], [], []>} : vector<8x32xbf16>, vector<32x128xbf16>, vector<8x128xf32> -> vector<8x128xf32>
    %603 = vector.broadcast %427 : vector<1x128xf32> to vector<8x128xf32>
    %604 = arith.addf %602, %603 : vector<8x128xf32>
    %605 = arith.truncf %600 : vector<8x32xf32> to vector<8x32xbf16>
    %cst_144 = arith.constant dense<0.000000e+00> : vector<8x128xf32>
    %606 = tpu.matmul %605, %425, %cst_144 {dimension_numbers = #tpu.dot_dimension_numbers<[1], [0], [0], [1], [0, 0, 1, 1], [], []>} : vector<8x32xbf16>, vector<32x128xbf16>, vector<8x128xf32> -> vector<8x128xf32>
    %607 = arith.addf %424, %606 : vector<8x128xf32>
    %608 = arith.negf %607 : vector<8x128xf32>
    %609 = math.exp %608 : vector<8x128xf32>
    %cst_145 = arith.constant 1.000000e+00 : f32
    %610 = vector.broadcast %cst_145 : f32 to vector<8x128xf32>
    %611 = arith.addf %610, %609 : vector<8x128xf32>
    %612 = arith.divf %610, %611 : vector<8x128xf32>
    %613 = vector.extract_strided_slice %612 {offsets = [0, 0], sizes = [8, 32], strides = [1, 1]} : vector<8x128xf32> to vector<8x32xf32>
    %614 = vector.extract_strided_slice %612 {offsets = [0, 32], sizes = [8, 32], strides = [1, 1]} : vector<8x128xf32> to vector<8x32xf32>
    %615 = vector.extract_strided_slice %612 {offsets = [0, 64], sizes = [8, 32], strides = [1, 1]} : vector<8x128xf32> to vector<8x32xf32>
    %cst_146 = arith.constant 2.000000e+00 : f32
    %616 = vector.broadcast %cst_146 : f32 to vector<8x32xf32>
    %617 = arith.mulf %616, %615 : vector<8x32xf32>
    %cst_147 = arith.constant 1.000000e+00 : f32
    %618 = vector.broadcast %cst_147 : f32 to vector<8x32xf32>
    %619 = arith.subf %617, %618 : vector<8x32xf32>
    %620 = vector.extract_strided_slice %612 {offsets = [0, 96], sizes = [8, 32], strides = [1, 1]} : vector<8x128xf32> to vector<8x32xf32>
    %621 = arith.mulf %614, %598 : vector<8x32xf32>
    %622 = arith.mulf %613, %619 : vector<8x32xf32>
    %623 = arith.addf %621, %622 : vector<8x32xf32>
    %624 = math.tanh %623 : vector<8x32xf32>
    %625 = arith.mulf %620, %624 : vector<8x32xf32>
    %626 = arith.truncf %625 : vector<8x32xf32> to vector<8x32xbf16>
    %cst_148 = arith.constant dense<0.000000e+00> : vector<8x128xf32>
    %627 = tpu.matmul %626, %426, %cst_148 {dimension_numbers = #tpu.dot_dimension_numbers<[1], [0], [0], [1], [0, 0, 1, 1], [], []>} : vector<8x32xbf16>, vector<32x128xbf16>, vector<8x128xf32> -> vector<8x128xf32>
    %628 = vector.broadcast %427 : vector<1x128xf32> to vector<8x128xf32>
    %629 = arith.addf %627, %628 : vector<8x128xf32>
    %c0_149 = arith.constant 0 : index
    %c0_150 = arith.constant 0 : index
    %630 = vector.load %arg11[%c0_149, %c0_150] : memref<32x128xbf16, #tpu.memory_space<vmem>>, vector<32x128xbf16>
    %cst_151 = arith.constant 0.000000e+00 : f32
    %631 = vector.broadcast %cst_151 : f32 to vector<8x32xf32>
    %cst_152 = arith.constant 0.000000e+00 : f32
    %632 = vector.broadcast %cst_152 : f32 to vector<8x32xf32>
    %633 = arith.truncf %631 : vector<8x32xf32> to vector<8x32xbf16>
    %cst_153 = arith.constant dense<0.000000e+00> : vector<8x128xf32>
    %634 = tpu.matmul %633, %630, %cst_153 {dimension_numbers = #tpu.dot_dimension_numbers<[1], [0], [0], [1], [0, 0, 1, 1], [], []>} : vector<8x32xbf16>, vector<32x128xbf16>, vector<8x128xf32> -> vector<8x128xf32>
    %635 = arith.addf %454, %634 : vector<8x128xf32>
    %636 = arith.negf %635 : vector<8x128xf32>
    %637 = math.exp %636 : vector<8x128xf32>
    %cst_154 = arith.constant 1.000000e+00 : f32
    %638 = vector.broadcast %cst_154 : f32 to vector<8x128xf32>
    %639 = arith.addf %638, %637 : vector<8x128xf32>
    %640 = arith.divf %638, %639 : vector<8x128xf32>
    %641 = vector.extract_strided_slice %640 {offsets = [0, 0], sizes = [8, 32], strides = [1, 1]} : vector<8x128xf32> to vector<8x32xf32>
    %642 = vector.extract_strided_slice %640 {offsets = [0, 32], sizes = [8, 32], strides = [1, 1]} : vector<8x128xf32> to vector<8x32xf32>
    %643 = vector.extract_strided_slice %640 {offsets = [0, 64], sizes = [8, 32], strides = [1, 1]} : vector<8x128xf32> to vector<8x32xf32>
    %cst_155 = arith.constant 2.000000e+00 : f32
    %644 = vector.broadcast %cst_155 : f32 to vector<8x32xf32>
    %645 = arith.mulf %644, %643 : vector<8x32xf32>
    %cst_156 = arith.constant 1.000000e+00 : f32
    %646 = vector.broadcast %cst_156 : f32 to vector<8x32xf32>
    %647 = arith.subf %645, %646 : vector<8x32xf32>
    %648 = vector.extract_strided_slice %640 {offsets = [0, 96], sizes = [8, 32], strides = [1, 1]} : vector<8x128xf32> to vector<8x32xf32>
    %649 = arith.mulf %642, %632 : vector<8x32xf32>
    %650 = arith.mulf %641, %647 : vector<8x32xf32>
    %651 = arith.addf %649, %650 : vector<8x32xf32>
    %652 = math.tanh %651 : vector<8x32xf32>
    %653 = arith.mulf %648, %652 : vector<8x32xf32>
    %654 = arith.truncf %653 : vector<8x32xf32> to vector<8x32xbf16>
    %cst_157 = arith.constant dense<0.000000e+00> : vector<8x128xf32>
    %655 = tpu.matmul %654, %630, %cst_157 {dimension_numbers = #tpu.dot_dimension_numbers<[1], [0], [0], [1], [0, 0, 1, 1], [], []>} : vector<8x32xbf16>, vector<32x128xbf16>, vector<8x128xf32> -> vector<8x128xf32>
    %656 = arith.addf %479, %655 : vector<8x128xf32>
    %657 = arith.negf %656 : vector<8x128xf32>
    %658 = math.exp %657 : vector<8x128xf32>
    %cst_158 = arith.constant 1.000000e+00 : f32
    %659 = vector.broadcast %cst_158 : f32 to vector<8x128xf32>
    %660 = arith.addf %659, %658 : vector<8x128xf32>
    %661 = arith.divf %659, %660 : vector<8x128xf32>
    %662 = vector.extract_strided_slice %661 {offsets = [0, 0], sizes = [8, 32], strides = [1, 1]} : vector<8x128xf32> to vector<8x32xf32>
    %663 = vector.extract_strided_slice %661 {offsets = [0, 32], sizes = [8, 32], strides = [1, 1]} : vector<8x128xf32> to vector<8x32xf32>
    %664 = vector.extract_strided_slice %661 {offsets = [0, 64], sizes = [8, 32], strides = [1, 1]} : vector<8x128xf32> to vector<8x32xf32>
    %cst_159 = arith.constant 2.000000e+00 : f32
    %665 = vector.broadcast %cst_159 : f32 to vector<8x32xf32>
    %666 = arith.mulf %665, %664 : vector<8x32xf32>
    %cst_160 = arith.constant 1.000000e+00 : f32
    %667 = vector.broadcast %cst_160 : f32 to vector<8x32xf32>
    %668 = arith.subf %666, %667 : vector<8x32xf32>
    %669 = vector.extract_strided_slice %661 {offsets = [0, 96], sizes = [8, 32], strides = [1, 1]} : vector<8x128xf32> to vector<8x32xf32>
    %670 = arith.mulf %663, %651 : vector<8x32xf32>
    %671 = arith.mulf %662, %668 : vector<8x32xf32>
    %672 = arith.addf %670, %671 : vector<8x32xf32>
    %673 = math.tanh %672 : vector<8x32xf32>
    %674 = arith.mulf %669, %673 : vector<8x32xf32>
    %675 = arith.truncf %674 : vector<8x32xf32> to vector<8x32xbf16>
    %cst_161 = arith.constant dense<0.000000e+00> : vector<8x128xf32>
    %676 = tpu.matmul %675, %630, %cst_161 {dimension_numbers = #tpu.dot_dimension_numbers<[1], [0], [0], [1], [0, 0, 1, 1], [], []>} : vector<8x32xbf16>, vector<32x128xbf16>, vector<8x128xf32> -> vector<8x128xf32>
    %677 = arith.addf %504, %676 : vector<8x128xf32>
    %678 = arith.negf %677 : vector<8x128xf32>
    %679 = math.exp %678 : vector<8x128xf32>
    %cst_162 = arith.constant 1.000000e+00 : f32
    %680 = vector.broadcast %cst_162 : f32 to vector<8x128xf32>
    %681 = arith.addf %680, %679 : vector<8x128xf32>
    %682 = arith.divf %680, %681 : vector<8x128xf32>
    %683 = vector.extract_strided_slice %682 {offsets = [0, 0], sizes = [8, 32], strides = [1, 1]} : vector<8x128xf32> to vector<8x32xf32>
    %684 = vector.extract_strided_slice %682 {offsets = [0, 32], sizes = [8, 32], strides = [1, 1]} : vector<8x128xf32> to vector<8x32xf32>
    %685 = vector.extract_strided_slice %682 {offsets = [0, 64], sizes = [8, 32], strides = [1, 1]} : vector<8x128xf32> to vector<8x32xf32>
    %cst_163 = arith.constant 2.000000e+00 : f32
    %686 = vector.broadcast %cst_163 : f32 to vector<8x32xf32>
    %687 = arith.mulf %686, %685 : vector<8x32xf32>
    %cst_164 = arith.constant 1.000000e+00 : f32
    %688 = vector.broadcast %cst_164 : f32 to vector<8x32xf32>
    %689 = arith.subf %687, %688 : vector<8x32xf32>
    %690 = vector.extract_strided_slice %682 {offsets = [0, 96], sizes = [8, 32], strides = [1, 1]} : vector<8x128xf32> to vector<8x32xf32>
    %691 = arith.mulf %684, %672 : vector<8x32xf32>
    %692 = arith.mulf %683, %689 : vector<8x32xf32>
    %693 = arith.addf %691, %692 : vector<8x32xf32>
    %694 = math.tanh %693 : vector<8x32xf32>
    %695 = arith.mulf %690, %694 : vector<8x32xf32>
    %696 = arith.truncf %695 : vector<8x32xf32> to vector<8x32xbf16>
    %cst_165 = arith.constant dense<0.000000e+00> : vector<8x128xf32>
    %697 = tpu.matmul %696, %630, %cst_165 {dimension_numbers = #tpu.dot_dimension_numbers<[1], [0], [0], [1], [0, 0, 1, 1], [], []>} : vector<8x32xbf16>, vector<32x128xbf16>, vector<8x128xf32> -> vector<8x128xf32>
    %698 = arith.addf %529, %697 : vector<8x128xf32>
    %699 = arith.negf %698 : vector<8x128xf32>
    %700 = math.exp %699 : vector<8x128xf32>
    %cst_166 = arith.constant 1.000000e+00 : f32
    %701 = vector.broadcast %cst_166 : f32 to vector<8x128xf32>
    %702 = arith.addf %701, %700 : vector<8x128xf32>
    %703 = arith.divf %701, %702 : vector<8x128xf32>
    %704 = vector.extract_strided_slice %703 {offsets = [0, 0], sizes = [8, 32], strides = [1, 1]} : vector<8x128xf32> to vector<8x32xf32>
    %705 = vector.extract_strided_slice %703 {offsets = [0, 32], sizes = [8, 32], strides = [1, 1]} : vector<8x128xf32> to vector<8x32xf32>
    %706 = vector.extract_strided_slice %703 {offsets = [0, 64], sizes = [8, 32], strides = [1, 1]} : vector<8x128xf32> to vector<8x32xf32>
    %cst_167 = arith.constant 2.000000e+00 : f32
    %707 = vector.broadcast %cst_167 : f32 to vector<8x32xf32>
    %708 = arith.mulf %707, %706 : vector<8x32xf32>
    %cst_168 = arith.constant 1.000000e+00 : f32
    %709 = vector.broadcast %cst_168 : f32 to vector<8x32xf32>
    %710 = arith.subf %708, %709 : vector<8x32xf32>
    %711 = vector.extract_strided_slice %703 {offsets = [0, 96], sizes = [8, 32], strides = [1, 1]} : vector<8x128xf32> to vector<8x32xf32>
    %712 = arith.mulf %705, %693 : vector<8x32xf32>
    %713 = arith.mulf %704, %710 : vector<8x32xf32>
    %714 = arith.addf %712, %713 : vector<8x32xf32>
    %715 = math.tanh %714 : vector<8x32xf32>
    %716 = arith.mulf %711, %715 : vector<8x32xf32>
    %717 = arith.truncf %716 : vector<8x32xf32> to vector<8x32xbf16>
    %cst_169 = arith.constant dense<0.000000e+00> : vector<8x128xf32>
    %718 = tpu.matmul %717, %630, %cst_169 {dimension_numbers = #tpu.dot_dimension_numbers<[1], [0], [0], [1], [0, 0, 1, 1], [], []>} : vector<8x32xbf16>, vector<32x128xbf16>, vector<8x128xf32> -> vector<8x128xf32>
    %719 = arith.addf %554, %718 : vector<8x128xf32>
    %720 = arith.negf %719 : vector<8x128xf32>
    %721 = math.exp %720 : vector<8x128xf32>
    %cst_170 = arith.constant 1.000000e+00 : f32
    %722 = vector.broadcast %cst_170 : f32 to vector<8x128xf32>
    %723 = arith.addf %722, %721 : vector<8x128xf32>
    %724 = arith.divf %722, %723 : vector<8x128xf32>
    %725 = vector.extract_strided_slice %724 {offsets = [0, 0], sizes = [8, 32], strides = [1, 1]} : vector<8x128xf32> to vector<8x32xf32>
    %726 = vector.extract_strided_slice %724 {offsets = [0, 32], sizes = [8, 32], strides = [1, 1]} : vector<8x128xf32> to vector<8x32xf32>
    %727 = vector.extract_strided_slice %724 {offsets = [0, 64], sizes = [8, 32], strides = [1, 1]} : vector<8x128xf32> to vector<8x32xf32>
    %cst_171 = arith.constant 2.000000e+00 : f32
    %728 = vector.broadcast %cst_171 : f32 to vector<8x32xf32>
    %729 = arith.mulf %728, %727 : vector<8x32xf32>
    %cst_172 = arith.constant 1.000000e+00 : f32
    %730 = vector.broadcast %cst_172 : f32 to vector<8x32xf32>
    %731 = arith.subf %729, %730 : vector<8x32xf32>
    %732 = vector.extract_strided_slice %724 {offsets = [0, 96], sizes = [8, 32], strides = [1, 1]} : vector<8x128xf32> to vector<8x32xf32>
    %733 = arith.mulf %726, %714 : vector<8x32xf32>
    %734 = arith.mulf %725, %731 : vector<8x32xf32>
    %735 = arith.addf %733, %734 : vector<8x32xf32>
    %736 = math.tanh %735 : vector<8x32xf32>
    %737 = arith.mulf %732, %736 : vector<8x32xf32>
    %738 = arith.truncf %737 : vector<8x32xf32> to vector<8x32xbf16>
    %cst_173 = arith.constant dense<0.000000e+00> : vector<8x128xf32>
    %739 = tpu.matmul %738, %630, %cst_173 {dimension_numbers = #tpu.dot_dimension_numbers<[1], [0], [0], [1], [0, 0, 1, 1], [], []>} : vector<8x32xbf16>, vector<32x128xbf16>, vector<8x128xf32> -> vector<8x128xf32>
    %740 = arith.addf %579, %739 : vector<8x128xf32>
    %741 = arith.negf %740 : vector<8x128xf32>
    %742 = math.exp %741 : vector<8x128xf32>
    %cst_174 = arith.constant 1.000000e+00 : f32
    %743 = vector.broadcast %cst_174 : f32 to vector<8x128xf32>
    %744 = arith.addf %743, %742 : vector<8x128xf32>
    %745 = arith.divf %743, %744 : vector<8x128xf32>
    %746 = vector.extract_strided_slice %745 {offsets = [0, 0], sizes = [8, 32], strides = [1, 1]} : vector<8x128xf32> to vector<8x32xf32>
    %747 = vector.extract_strided_slice %745 {offsets = [0, 32], sizes = [8, 32], strides = [1, 1]} : vector<8x128xf32> to vector<8x32xf32>
    %748 = vector.extract_strided_slice %745 {offsets = [0, 64], sizes = [8, 32], strides = [1, 1]} : vector<8x128xf32> to vector<8x32xf32>
    %cst_175 = arith.constant 2.000000e+00 : f32
    %749 = vector.broadcast %cst_175 : f32 to vector<8x32xf32>
    %750 = arith.mulf %749, %748 : vector<8x32xf32>
    %cst_176 = arith.constant 1.000000e+00 : f32
    %751 = vector.broadcast %cst_176 : f32 to vector<8x32xf32>
    %752 = arith.subf %750, %751 : vector<8x32xf32>
    %753 = vector.extract_strided_slice %745 {offsets = [0, 96], sizes = [8, 32], strides = [1, 1]} : vector<8x128xf32> to vector<8x32xf32>
    %754 = arith.mulf %747, %735 : vector<8x32xf32>
    %755 = arith.mulf %746, %752 : vector<8x32xf32>
    %756 = arith.addf %754, %755 : vector<8x32xf32>
    %757 = math.tanh %756 : vector<8x32xf32>
    %758 = arith.mulf %753, %757 : vector<8x32xf32>
    %759 = arith.truncf %758 : vector<8x32xf32> to vector<8x32xbf16>
    %cst_177 = arith.constant dense<0.000000e+00> : vector<8x128xf32>
    %760 = tpu.matmul %759, %630, %cst_177 {dimension_numbers = #tpu.dot_dimension_numbers<[1], [0], [0], [1], [0, 0, 1, 1], [], []>} : vector<8x32xbf16>, vector<32x128xbf16>, vector<8x128xf32> -> vector<8x128xf32>
    %761 = arith.addf %604, %760 : vector<8x128xf32>
    %762 = arith.negf %761 : vector<8x128xf32>
    %763 = math.exp %762 : vector<8x128xf32>
    %cst_178 = arith.constant 1.000000e+00 : f32
    %764 = vector.broadcast %cst_178 : f32 to vector<8x128xf32>
    %765 = arith.addf %764, %763 : vector<8x128xf32>
    %766 = arith.divf %764, %765 : vector<8x128xf32>
    %767 = vector.extract_strided_slice %766 {offsets = [0, 0], sizes = [8, 32], strides = [1, 1]} : vector<8x128xf32> to vector<8x32xf32>
    %768 = vector.extract_strided_slice %766 {offsets = [0, 32], sizes = [8, 32], strides = [1, 1]} : vector<8x128xf32> to vector<8x32xf32>
    %769 = vector.extract_strided_slice %766 {offsets = [0, 64], sizes = [8, 32], strides = [1, 1]} : vector<8x128xf32> to vector<8x32xf32>
    %cst_179 = arith.constant 2.000000e+00 : f32
    %770 = vector.broadcast %cst_179 : f32 to vector<8x32xf32>
    %771 = arith.mulf %770, %769 : vector<8x32xf32>
    %cst_180 = arith.constant 1.000000e+00 : f32
    %772 = vector.broadcast %cst_180 : f32 to vector<8x32xf32>
    %773 = arith.subf %771, %772 : vector<8x32xf32>
    %774 = vector.extract_strided_slice %766 {offsets = [0, 96], sizes = [8, 32], strides = [1, 1]} : vector<8x128xf32> to vector<8x32xf32>
    %775 = arith.mulf %768, %756 : vector<8x32xf32>
    %776 = arith.mulf %767, %773 : vector<8x32xf32>
    %777 = arith.addf %775, %776 : vector<8x32xf32>
    %778 = math.tanh %777 : vector<8x32xf32>
    %779 = arith.mulf %774, %778 : vector<8x32xf32>
    %780 = arith.truncf %779 : vector<8x32xf32> to vector<8x32xbf16>
    %cst_181 = arith.constant dense<0.000000e+00> : vector<8x128xf32>
    %781 = tpu.matmul %780, %630, %cst_181 {dimension_numbers = #tpu.dot_dimension_numbers<[1], [0], [0], [1], [0, 0, 1, 1], [], []>} : vector<8x32xbf16>, vector<32x128xbf16>, vector<8x128xf32> -> vector<8x128xf32>
    %782 = arith.addf %629, %781 : vector<8x128xf32>
    %783 = arith.negf %782 : vector<8x128xf32>
    %784 = math.exp %783 : vector<8x128xf32>
    %cst_182 = arith.constant 1.000000e+00 : f32
    %785 = vector.broadcast %cst_182 : f32 to vector<8x128xf32>
    %786 = arith.addf %785, %784 : vector<8x128xf32>
    %787 = arith.divf %785, %786 : vector<8x128xf32>
    %788 = vector.extract_strided_slice %787 {offsets = [0, 0], sizes = [8, 32], strides = [1, 1]} : vector<8x128xf32> to vector<8x32xf32>
    %789 = vector.extract_strided_slice %787 {offsets = [0, 32], sizes = [8, 32], strides = [1, 1]} : vector<8x128xf32> to vector<8x32xf32>
    %790 = vector.extract_strided_slice %787 {offsets = [0, 64], sizes = [8, 32], strides = [1, 1]} : vector<8x128xf32> to vector<8x32xf32>
    %cst_183 = arith.constant 2.000000e+00 : f32
    %791 = vector.broadcast %cst_183 : f32 to vector<8x32xf32>
    %792 = arith.mulf %791, %790 : vector<8x32xf32>
    %cst_184 = arith.constant 1.000000e+00 : f32
    %793 = vector.broadcast %cst_184 : f32 to vector<8x32xf32>
    %794 = arith.subf %792, %793 : vector<8x32xf32>
    %795 = vector.extract_strided_slice %787 {offsets = [0, 96], sizes = [8, 32], strides = [1, 1]} : vector<8x128xf32> to vector<8x32xf32>
    %796 = arith.mulf %789, %777 : vector<8x32xf32>
    %797 = arith.mulf %788, %794 : vector<8x32xf32>
    %798 = arith.addf %796, %797 : vector<8x32xf32>
    %799 = math.tanh %798 : vector<8x32xf32>
    %800 = arith.mulf %795, %799 : vector<8x32xf32>
    %801 = arith.truncf %800 : vector<8x32xf32> to vector<8x32xbf16>
    %c0_185 = arith.constant 0 : index
    %c0_186 = arith.constant 0 : index
    %802 = vector.load %arg13[%c0_185, %c0_186] : memref<32x128xbf16, #tpu.memory_space<vmem>>, vector<32x128xbf16>
    %cst_187 = arith.constant dense<0.000000e+00> : vector<8x128xf32>
    %803 = tpu.matmul %801, %802, %cst_187 {dimension_numbers = #tpu.dot_dimension_numbers<[1], [0], [0], [1], [0, 0, 1, 1], [], []>} : vector<8x32xbf16>, vector<32x128xbf16>, vector<8x128xf32> -> vector<8x128xf32>
    %c0_188 = arith.constant 0 : index
    %c0_189 = arith.constant 0 : index
    %804 = vector.load %arg14[%c0_188, %c0_189] : memref<1x128xf32, #tpu.memory_space<vmem>>, vector<1x128xf32>
    %805 = vector.broadcast %804 : vector<1x128xf32> to vector<8x128xf32>
    %806 = arith.addf %803, %805 : vector<8x128xf32>
    %cst_190 = arith.constant 0.000000e+00 : f32
    %807 = vector.broadcast %cst_190 : f32 to vector<8x128xf32>
    %808 = arith.maximumf %806, %807 : vector<8x128xf32>
    %809 = arith.truncf %808 : vector<8x128xf32> to vector<8x128xbf16>
    %c0_191 = arith.constant 0 : index
    %c0_192 = arith.constant 0 : index
    %810 = vector.load %arg15[%c0_191, %c0_192] : memref<128x64xbf16, #tpu.memory_space<vmem>>, vector<128x64xbf16>
    %cst_193 = arith.constant dense<0.000000e+00> : vector<8x64xf32>
    %811 = tpu.matmul %809, %810, %cst_193 {dimension_numbers = #tpu.dot_dimension_numbers<[1], [0], [0], [1], [0, 0, 1, 1], [], []>} : vector<8x128xbf16>, vector<128x64xbf16>, vector<8x64xf32> -> vector<8x64xf32>
    %c0_194 = arith.constant 0 : index
    %c0_195 = arith.constant 0 : index
    %812 = vector.load %arg16[%c0_194, %c0_195] : memref<1x64xf32, #tpu.memory_space<vmem>>, vector<1x64xf32>
    %813 = vector.broadcast %812 : vector<1x64xf32> to vector<8x64xf32>
    %814 = arith.addf %811, %813 : vector<8x64xf32>
    %cst_196 = arith.constant 0.000000e+00 : f32
    %815 = vector.broadcast %cst_196 : f32 to vector<8x64xf32>
    %816 = arith.maximumf %814, %815 : vector<8x64xf32>
    %c0_197 = arith.constant 0 : index
    %c0_198 = arith.constant 0 : index
    %817 = vector.load %arg17[%c0_197, %c0_198] : memref<1x64xf32, #tpu.memory_space<vmem>>, vector<1x64xf32>
    %818 = vector.broadcast %817 : vector<1x64xf32> to vector<8x64xf32>
    %819 = arith.mulf %816, %818 : vector<8x64xf32>
    %cst_199 = arith.constant dense<0.000000e+00> : vector<8xf32>
    %820 = vector.multi_reduction <add>, %819, %cst_199 [1] : vector<8x64xf32> to vector<8xf32>
    %821 = vector.shape_cast %820 : vector<8xf32> to vector<8x1xf32>
    %c0_200 = arith.constant 0 : index
    %c0_201 = arith.constant 0 : index
    %822 = vector.load %arg18[%c0_200, %c0_201] : memref<1x1xf32, #tpu.memory_space<vmem>>, vector<1x1xf32>
    %823 = vector.broadcast %822 : vector<1x1xf32> to vector<8x1xf32>
    %824 = arith.addf %821, %823 : vector<8x1xf32>
    %c0_202 = arith.constant 0 : index
    %c0_203 = arith.constant 0 : index
    %825 = vector.load %arg19[%c0_202, %c0_203] : memref<8x1xf32, #tpu.memory_space<vmem>>, vector<8x1xf32>
    tpu.vector_store %arg19[%c0_202, %c0_203], %824 {strides = array<i32>} : memref<8x1xf32, #tpu.memory_space<vmem>>, vector<8x1xf32>,
    return
  }
}

</mosaic_0001>

<bundles_post_ra>
// kernel: _lambda_.1
= control target key start
LH: loop header
LB: loop body
LE: loop exit
PB: predicated region body
PF: predicated region fallthrough
CT: control target
= control target key end

     0   :  { %s6054_s0 = inlined_call_operand.vmem [shape: f32[64,16], index: 0, kind: input, shape index: {}]   ;;  %s6055_s1 = inlined_call_operand.vmem [shape: bf16[16,128], index: 1, kind: input, shape index: {}]   ;;  %s6056_s2 = inlined_call_operand.vmem [shape: bf16[32,128], index: 2, kind: input, shape index: {}]   ;;  %s6057_s3 = inlined_call_operand.hbm [shape: f32[1,128], index: 3, kind: input, shape index: {}]   ;;  %s6058_s4 = inlined_call_operand.vmem [shape: bf16[32,128], index: 4, kind: input, shape index: {}]   ;;  %s6059_s5 = inlined_call_operand.vmem [shape: bf16[32,128], index: 5, kind: input, shape index: {}]   ;;  %s6060_s6 = inlined_call_operand.hbm [shape: f32[1,128], index: 6, kind: input, shape index: {}]   ;;  %s6061_s7 = inlined_call_operand.vmem [shape: bf16[32,128], index: 7, kind: input, shape index: {}]   ;;  %s6062_s8 = inlined_call_operand.vmem [shape: bf16[32,128], index: 8, kind: input, shape index: {}]   ;;  %s6063_s9 = inlined_call_operand.hbm [shape: f32[1,128], index: 9, kind: input, shape index: {}]   ;;  %s6064_s10 = inlined_call_operand.vmem [shape: bf16[32,128], index: 10, kind: input, shape index: {}]   ;;  %s6065_s11 = inlined_call_operand.vmem [shape: bf16[32,128], index: 11, kind: input, shape index: {}]   ;;  %s6066_s12 = inlined_call_operand.hbm [shape: f32[1,128], index: 12, kind: input, shape index: {}]   ;;  %s6067_s13 = inlined_call_operand.vmem [shape: bf16[32,128], index: 13, kind: input, shape index: {}]   ;;  %s6068_s14 = inlined_call_operand.hbm [shape: f32[1,128], index: 14, kind: input, shape index: {}]   ;;  %s6069_s15 = inlined_call_operand.vmem [shape: bf16[128,64], index: 15, kind: input, shape index: {}]   ;;  %s6070_s16 = inlined_call_operand.vmem [shape: f32[1,64], index: 16, kind: input, shape index: {}]   ;;  %s6071_s17 = inlined_call_operand.vmem [shape: f32[1,64], index: 17, kind: input, shape index: {}]   ;;  %s6072_s18 = inlined_call_operand.<no memory space> [shape: f32[1,1], index: 18, kind: input, shape index: {}]   ;;  %s6073_s19 = inlined_call_operand.vmem [shape: f32[8,1], index: 19, kind: output, shape index: {}]  }
   0x1   :  { %6077 = sst [smem:[#allocation14_spill]] %s6054_s0  ;;  %v24_v0 = vstv %s6072_s18 }
   0x2   :  { %6078 = sst [smem:[#allocation15_spill]] %s6055_s1  ;;  %25 = vst [vmem:[#allocation2] sm:$0x1] %v24_v0 }
   0x3   :  { %6079 = sst [smem:[#allocation16_spill]] %s6056_s2 }
   0x4   :  { %6080 = sst [smem:[#allocation17_spill]] %s6057_s3 }
   0x5   :  { %26 = vsyncpa [#allocation4], 0 }
   0x6   :  { %27 = vsyncpa [#allocation6], 0 }
   0x7   :  { %28 = vsyncpa [#allocation9], 0  ;;  %s5152_s20 = smov [#allocation5]   ;;  %s5153_s1 = smov [#allocation8]  }
   0x8   :  { %s55_s21 = sshll.u32 %s5152_s20, 4  ;;  %s83_s22 = sshll.u32 %s5153_s1, 4  ;;  %s56_s21 = int_to_ptr.vmem [resolvable:$true] %s55_s21  ;;  %s84_s22 = int_to_ptr.vmem [resolvable:$true] %s83_s22 }
   0x9   :  { %s5036_s24 = scalar_lea.hbm %s6060_s6, 16 }
   0xa   :  { %p5037_p0 = scmp.ne.s32.totalorder %s6060_s6, %s5036_s24  ;;  %p5040_p1 = scmp.lt.u32.totalorder %s5036_s24, %s6060_s6 }
   0xc   :  { %p5042_p2 = pnand %p5040_p1, %p5037_p0 }
   0xe   :  { %5045 = shalt.err (!%p5042_p2)
}
   0xf   :  { %s5046_s27 = scalar_lea.vmem %s56_s21, 16  ;;  %s5050_s28 = scalar_lea.vmem %s56_s21, 32 }
  0x10   :  { %p5047_p3 = scmp.ne.s32.totalorder %s56_s21, %s5046_s27  ;;  %p5051_p4 = scmp.lt.s32.totalorder %s56_s21, %s56_s21 }
  0x11   :  { %p5052_p5 = scmp.lt.s32.totalorder %s5050_s28, %s5046_s27 }
  0x13   :  { %p5053_p6 = por %p5052_p5, %p5051_p4 }
  0x15   :  { %p5054_p7 = pnand %p5053_p6, %p5047_p3 }
  0x17   :  { %5057 = shalt.err (!%p5054_p7)
}
  0x18   :  { %58 = dma.hbm_to_vmem [thread:$0]  %s6060_s6, 16, %s56_s21, [#allocation6]  }
  0x19   :  { %s5058_s1 = scalar_lea.hbm %s6066_s12, 16 }
  0x1a   :  { %p5059_p8 = scmp.ne.s32.totalorder %s6066_s12, %s5058_s1  ;;  %p5062_p9 = scmp.lt.u32.totalorder %s5058_s1, %s6066_s12 }
  0x1c   :  { %p5064_p10 = pnand %p5062_p9, %p5059_p8 }
  0x1e   :  { %5067 = shalt.err (!%p5064_p10)
}
  0x1f   :  { %s5068_s3 = scalar_lea.vmem %s84_s22, 16  ;;  %s5072_s26 = scalar_lea.vmem %s84_s22, 32 }
  0x20   :  { %p5069_p11 = scmp.ne.s32.totalorder %s84_s22, %s5068_s3  ;;  %p5073_p12 = scmp.lt.s32.totalorder %s84_s22, %s84_s22 }
  0x21   :  { %p5074_p13 = scmp.lt.s32.totalorder %s5072_s26, %s5068_s3 }
  0x23   :  { %p5075_p0 = por %p5074_p13, %p5073_p12 }
  0x25   :  { %p5076_p1 = pnand %p5075_p0, %p5069_p11 }
  0x27   :  { %5079 = shalt.err (!%p5076_p1)
}
  0x28   :  { %86 = dma.hbm_to_vmem [thread:$0]  %s6066_s12, 16, %s84_s22, [#allocation9]  }
  0x29   :  { %s5154_s18 = smov [#allocation3]   ;;  %s5155_s28 = smov [#allocation7]  }
  0x2a   :  { %s41_s27 = sshll.u32 %s5154_s18, 4  ;;  %s69_s29 = sshll.u32 %s5155_s28, 4  ;;  %s42_s27 = int_to_ptr.vmem [resolvable:$true] %s41_s27  ;;  %s70_s29 = int_to_ptr.vmem [resolvable:$true] %s69_s29 }
  0x2b   :  { %s6081_s20 = sld [smem:[#allocation17_spill]] }
  0x31   :  { %s5080_s1 = scalar_lea.hbm %s6081_s20, 16 }
  0x32   :  { %p5081_p2 = scmp.ne.s32.totalorder %s6081_s20, %s5080_s1  ;;  %p5084_p3 = scmp.lt.u32.totalorder %s5080_s1, %s6081_s20 }
  0x34   :  { %p5086_p4 = pnand %p5084_p3, %p5081_p2 }
  0x36   :  { %5089 = shalt.err (!%p5086_p4)
}
  0x37   :  { %s5090_s12 = scalar_lea.vmem %s42_s27, 16  ;;  %s5094_s22 = scalar_lea.vmem %s42_s27, 32 }
  0x38   :  { %p5091_p5 = scmp.ne.s32.totalorder %s42_s27, %s5090_s12  ;;  %p5095_p6 = scmp.lt.s32.totalorder %s42_s27, %s42_s27 }
  0x39   :  { %p5096_p7 = scmp.lt.s32.totalorder %s5094_s22, %s5090_s12 }
  0x3b   :  { %p5097_p8 = por %p5096_p7, %p5095_p6 }
  0x3d   :  { %p5098_p9 = pnand %p5097_p8, %p5091_p5 }
  0x3f   :  { %5101 = shalt.err (!%p5098_p9)
}
  0x40   :  { %44 = dma.hbm_to_vmem [thread:$0]  %s6081_s20, 16, %s42_s27, [#allocation4]  }
  0x41   :  { %s5102_s18 = scalar_lea.hbm %s6063_s9, 16 }
  0x42   :  { %p5103_p10 = scmp.ne.s32.totalorder %s6063_s9, %s5102_s18  ;;  %p5106_p11 = scmp.lt.u32.totalorder %s5102_s18, %s6063_s9 }
  0x44   :  { %p5108_p12 = pnand %p5106_p11, %p5103_p10 }
  0x46   :  { %5111 = shalt.err (!%p5108_p12)
}
  0x47   :  { %s5112_s2 = scalar_lea.vmem %s70_s29, 16  ;;  %s5116_s23 = scalar_lea.vmem %s70_s29, 32 }
  0x48   :  { %p5113_p13 = scmp.ne.s32.totalorder %s70_s29, %s5112_s2  ;;  %p5117_p0 = scmp.lt.s32.totalorder %s70_s29, %s70_s29 }
  0x49   :  { %p5118_p1 = scmp.lt.s32.totalorder %s5116_s23, %s5112_s2 }
  0x4b   :  { %p5119_p2 = por %p5118_p1, %p5117_p0 }
  0x4d   :  { %p5120_p3 = pnand %p5119_p2, %p5113_p13 }
  0x4f   :  { %5123 = shalt.err (!%p5120_p3)
}
  0x50   :  { %72 = dma.hbm_to_vmem [thread:$0]  %s6063_s9, 16, %s70_s29, [#allocation6]  }
  0x51   :  { %s5156_s24 = smov [#allocation10]   ;;  %s5124_s3 = scalar_lea.hbm %s6068_s14, 16 }
  0x52   :  { %s95_s25 = sshll.u32 %s5156_s24, 4  ;;  %p5125_p4 = scmp.ne.s32.totalorder %s6068_s14, %s5124_s3  ;;  %s96_s25 = int_to_ptr.vmem [resolvable:$true] %s95_s25 }
  0x53   :  { %p5128_p5 = scmp.lt.u32.totalorder %s5124_s3, %s6068_s14 }
  0x55   :  { %p5130_p6 = pnand %p5128_p5, %p5125_p4 }
  0x57   :  { %5133 = shalt.err (!%p5130_p6)
}
  0x58   :  { %s5134_s28 = scalar_lea.vmem %s96_s25, 16  ;;  %s5138_s9 = scalar_lea.vmem %s96_s25, 32 }
  0x59   :  { %p5135_p7 = scmp.ne.s32.totalorder %s96_s25, %s5134_s28  ;;  %p5139_p8 = scmp.lt.s32.totalorder %s96_s25, %s96_s25 }
  0x5a   :  { %p5140_p9 = scmp.lt.s32.totalorder %s5138_s9, %s5134_s28 }
  0x5c   :  { %p5141_p10 = por %p5140_p9, %p5139_p8 }
  0x5e   :  { %p5142_p11 = pnand %p5141_p10, %p5135_p7 }
  0x60   :  { %5145 = shalt.err (!%p5142_p11)
}
  0x61   :  { %98 = dma.hbm_to_vmem [thread:$0]  %s6068_s14, 16, %s96_s25, [#allocation9]  }
  0x62   :  { %5146 = dma.done.wait [#allocation4], 16  }
  0x63   :  { %5147 = vsyncadd [#allocation4], 4294967280 }
  0x64   :  { %5148 = dma.done.wait [#allocation6], 32  }
  0x65   :  { %5149 = vsyncadd [#allocation6], 4294967264 }
  0x66   :  { %5150 = dma.done.wait [#allocation9], 32  }
  0x67   :  { %5151 = vsyncadd [#allocation9], 4294967264  ;;  %v5157_v1 = vmov 0.0   ;;  %vm5158_vm0 = vmmov 0   ;;  %s6082_s2 = sld [smem:[#allocation15_spill]]  ;;  %s6083_s14 = sld [smem:[#allocation14_spill]] }
  0x68   :  { %4240 = vmatprep.subr.bf16.mxu1 %v5157_v1  ;;  %4244 = vmatprep.mubr.msk.bf16.mxu1 %vm5158_vm0, %v5157_v1  ;;  %vm150_vm1 = vcmask 130048   ;;  %s6084_s21 = sld [smem:[#allocation16_spill]]  ;;  %v5159_v17 = vmov 0   ;;  %v3867_v18 = vld [vmem:[#allocation3] ss:$0 sm:$0xff]  ;;  %s5161_s20 = smov 32  }
  0x69   :  { %v5398_v51 = vld [vmem:[%s6058_s4] sm:$0xff]   ;;  %v5404_v52 = vld [vmem:[%s6058_s4 + $0x8] sm:$0xff]   ;;  %vm249_vm2 = vcmask 261120   ;;  %vm3846_vm3 = vcmask 523264   ;;  %vm3858_vm4 = vcmask 7168  }
  0x6a   :  { %4241 = vmatpush3.bf16.msra.mxu1 %v5398_v51 }
  0x6b   :  { %4242 = vmatprep.subr.bf16.mxu1 %v5157_v1 }
  0x6d   :  { %v4819_v2 = vld [vmem:[%s6082_s2] sm:$0xff]   ;;  %v124_v4 = vld [vmem:[%s6083_s14 + $0x8] sm:$0xff]  ;;  %v125_v5 = vld [vmem:[%s6083_s14 + $0x10] sm:$0xff] }
  0x6e   :  { %v123_v3 = vld [vmem:[%s6083_s14] sm:$0xff]  ;;  %4206 = vmatprep.subr.bf16.mxu0 %v4819_v2  ;;  %v126_v7 = vld [vmem:[%s6083_s14 + $0x18] sm:$0xff]  ;;  %v128_v11 = vld [vmem:[%s6083_s14 + $0x28] sm:$0xff]  ;;  %4243 = vmatpush3.bf16.msra.mxu1 %v5404_v52 }
  0x6f   :  { %v131_v6 = vpack.c.bf16 %v124_v4, %v123_v3  ;;  %4207 = vmatpush3.bf16.msra.mxu0 %v4819_v2  ;;  %v132_v8 = vpack.c.bf16 %v126_v7, %v125_v5  ;;  %v5346_v9 = vld [vmem:[%s6084_s21] sm:$0xff]   ;;  %v129_v13 = vld [vmem:[%s6083_s14 + $0x30] sm:$0xff]  ;;  %v130_v14 = vld [vmem:[%s6083_s14 + $0x38] sm:$0xff]  ;;  %4256 = vmatprep.subr.bf16.mxu1 %v5157_v1 }
  0x70   :  { %v127_v10 = vld [vmem:[%s6083_s14 + $0x20] sm:$0xff]  ;;  %4216 = vmatprep.subr.bf16.mxu0 %v5157_v1  ;;  %v5365_v15 = vld [vmem:[%s6084_s21 + $0x8] sm:$0xff]   ;;  %v134_v16 = vpack.c.bf16 %v130_v14, %v129_v13  ;;  %s5160_s14 = smov 64  }
  0x71   :  { %4208 = vmatprep.mubr.msk.bf16.mxu0 %vm150_vm1, %v131_v6  ;;  %v133_v12 = vpack.c.bf16 %v128_v11, %v127_v10 }
  0x72   :  { %4209 = vmatmul.mubr.msk.bf16.vlgmr.msra.gmra.mrb[0].mxu0 %vm150_vm1, %v132_v8 }
  0x73   :  { %4217 = vmatpush3.bf16.msra.mxu0 %v5346_v9  ;;  %4212 = vmatprep.mubr.msk.bf16.mxu0 %vm150_vm1, %v133_v12 }
  0x74   :  { %4218 = vmatprep.subr.bf16.mxu0 %v5157_v1 }
  0x77   :  { %4219 = vmatpush3.bf16.msra.mxu0 %v5365_v15 }
  0x78   :  { %4224 = vmatprep.subr.bf16.mxu0 %v5157_v1 }
  0x7a   :  { %4213 = vmatmul.mubr.msk.bf16.gmra.mrb[4].mxu0 %vm150_vm1, %v134_v16 }
  0x7b   :  { %4220 = vmatprep.mubr.msk.bf16.mxu0 %vm5158_vm0, %v5157_v1 }
  0x82   :  { %4221 = vmatmul.mubr.bf16.vlgmr.msra.gmra.mrb[8].mxu0 %v5159_v17 }
  0x83   :  { %4228 = vmatprep.mubr.msk.bf16.mxu0 %vm5158_vm0, %v5157_v1  ;;  %4225 = vmatpush3.bf16.msra.mxu0 %v5398_v51 }
  0x84   :  { %4226 = vmatprep.subr.bf16.mxu0 %v5157_v1 }
  0x87   :  { %4227 = vmatpush3.bf16.msra.mxu0 %v5404_v52 }
  0x88   :  { %4232 = vmatprep.subr.bf16.mxu0 %v5157_v1 }
 0x145   :  { %v4210_v19 = vpop.f32.mrb[0].mxu0 }
 0x146   :  { %v5379_v20 = vadd.f32 %v4210_v19, %v3867_v18  ;;  %v197_v21 = vpop.f32.mrb[1].mxu0 }
 0x147   :  { %v4211_v22 = vpop.f32.mrb[2].mxu0  ;;  %v198_v34 = vadd.f32 %v3867_v18, %v197_v21 }
 0x148   :  { %v5381_v23 = vadd.f32 %v4211_v22, %v3867_v18  ;;  %v200_v24 = vpop.f32.mrb[3].mxu0 }
 0x149   :  { %v5383_v25 = vadd.f32 %v3867_v18, %v200_v24 }
 0x14d   :  { %v4214_v26 = vpop.f32.mrb[4].mxu0 }
 0x14e   :  { %v5385_v27 = vadd.f32 %v4214_v26, %v3867_v18  ;;  %v213_v28 = vpop.f32.mrb[5].mxu0 }
 0x14f   :  { %v5387_v29 = vadd.f32 %v3867_v18, %v213_v28  ;;  %v4215_v30 = vpop.f32.mrb[6].mxu0 }
 0x150   :  { %v5389_v31 = vadd.f32 %v4215_v30, %v3867_v18  ;;  %v216_v32 = vpop.f32.mrb[7].mxu0 }
 0x151   :  { %v5391_v33 = vadd.f32 %v3867_v18, %v216_v32 }
 0x155   :  { %v287_v35 = vpop.f32.mrb[8].mxu0 }
 0x156   :  { %v293_v36 = vadd.f32 %v287_v35, %v198_v34  ;;  %v4222_v37 = vpop.f32.mrb[9].mxu0 }
 0x157   :  { %v290_v38 = vpop.f32.mrb[10].mxu0 }
 0x158   :  { %v3875_v39 = vmul.f32 -1.442695, %v293_v36  ;;  %v4223_v40 = vpop.f32.mrb[11].mxu0 }
 0x15a   :  { %4844 = vpow2.f32 %v3875_v39 }
 0x164   :  { %v4845_v41 = vpop.eup %4844 }
 0x165   :  { %v297_v42 = vadd.f32 1.0, %v4845_v41 }
 0x167   :  { %4846 = vrcp.f32 %v297_v42 }
 0x171   :  { %v4847_v43 = vpop.eup %4846 }
 0x172   :  { %v300_v44 = vmul.f32 2.0, %v4847_v43  ;;  %v302_v48 = vmul.f32 0.0, %v4847_v43 }
 0x174   :  { %v3876_v45 = vadd.f32 -1.0, %v300_v44 }
 0x176   :  { %304 = vrot.lane.b32.xlu0 %v3876_v45, %s5160_s14 }
 0x1e8   :  { %v305_v46 = vpop.permute.xlu0 %304 }
 0x1e9   :  { %v307_v47 = vmul.f32 %v4847_v43, %v305_v46 }
 0x1eb   :  { %309 = vrot.lane.b32.xlu0 %v307_v47, %s5161_s20 }
 0x25d   :  { %v310_v49 = vpop.permute.xlu0 %309 }
 0x25e   :  { %v312_v50 = vadd.f32 %v310_v49, %v302_v48 }
 0x260   :  { %4848 = vtanh.f32 %v312_v50 }
 0x26a   :  { %v4849_v53 = vpop.eup %4848 }
 0x26b   :  { %315 = vrot.lane.b32.xlu1 %v4849_v53, %s5160_s14 }
 0x2dd   :  { %v316_v54 = vpop.permute.xlu1 %315 }
 0x2de   :  { %v318_v55 = vmul.f32 %v4847_v43, %v316_v54 }
 0x2e0   :  { %v319_v56 = vpack.c.bf16 %v318_v55, %v318_v55 }
 0x2e2   :  { %327 = vrot.lane.b32.xlu1 %v319_v56, %s5161_s20 }
 0x354   :  { %v328_v57 = vpop.permute.xlu1 %327 }
 0x355   :  { %4229 = vmatmul.mubr.msk.bf16.vlgmr.msra.gmra.mrb[12].mxu0 %vm249_vm2, %v328_v57 }
 0x356   :  { %4233 = vmatpush3.bf16.msra.mxu0 %v5346_v9  ;;  %4236 = vmatprep.mubr.msk.bf16.mxu0 %vm5158_vm0, %v5157_v1 }
 0x357   :  { %4234 = vmatprep.subr.bf16.mxu0 %v5157_v1 }
 0x35a   :  { %4235 = vmatpush3.bf16.msra.mxu0 %v5365_v15 }
 0x35b   :  { %4248 = vmatprep.subr.bf16.mxu0 %v5157_v1 }
 0x35d   :  { %4237 = vmatmul.mubr.msk.bf16.vlgmr.msra.gmra.mrb[16].mxu0 %vm249_vm2, %v328_v57 }
 0x35e   :  { %4249 = vmatpush3.bf16.msra.mxu0 %v5346_v9  ;;  %4252 = vmatprep.mubr.msk.bf16.mxu0 %vm5158_vm0, %v5157_v1 }
 0x35f   :  { %4250 = vmatprep.subr.bf16.mxu0 %v5157_v1 }
 0x362   :  { %4251 = vmatpush3.bf16.msra.mxu0 %v5365_v15 }
 0x363   :  { %4264 = vmatprep.subr.bf16.mxu0 %v5157_v1 }
 0x428   :  { %v5429_v58 = vpop.f32.mrb[12].mxu0 }
 0x429   :  { %v4230_v59 = vpop.f32.mrb[13].mxu0 }
 0x42a   :  { %v381_v60 = vpop.f32.mrb[14].mxu0 }
 0x42b   :  { %v4231_v61 = vpop.f32.mrb[15].mxu0 }
 0x430   :  { %v418_v62 = vpop.f32.mrb[16].mxu0 }
 0x431   :  { %v424_v63 = vadd.f32 %v418_v62, %v5383_v25  ;;  %v4238_v0 = vpop.f32.mrb[17].mxu0 }
 0x432   :  { %v421_v2 = vpop.f32.mrb[18].mxu0 }
 0x433   :  { %v3882_v3 = vmul.f32 -1.442695, %v424_v63  ;;  %v4239_v4 = vpop.f32.mrb[19].mxu0 }
 0x435   :  { %4850 = vpow2.f32 %v3882_v3 }
 0x43f   :  { %v4851_v5 = vpop.eup %4850 }
 0x440   :  { %v428_v6 = vadd.f32 1.0, %v4851_v5 }
 0x442   :  { %4852 = vrcp.f32 %v428_v6 }
 0x44c   :  { %v4853_v7 = vpop.eup %4852 }
 0x44d   :  { %v431_v8 = vmul.f32 2.0, %v4853_v7  ;;  %v433_v13 = vmul.f32 %v4853_v7, %v312_v50 }
 0x44f   :  { %v3883_v10 = vadd.f32 -1.0, %v431_v8 }
 0x451   :  { %435 = vrot.lane.b32.xlu0 %v3883_v10, %s5160_s14 }
 0x4c3   :  { %v436_v11 = vpop.permute.xlu0 %435 }
 0x4c4   :  { %v438_v12 = vmul.f32 %v4853_v7, %v436_v11 }
 0x4c6   :  { %440 = vrot.lane.b32.xlu1 %v438_v12, %s5161_s20 }
 0x538   :  { %v441_v14 = vpop.permute.xlu1 %440 }
 0x539   :  { %v443_v16 = vadd.f32 %v441_v14, %v433_v13 }
 0x53b   :  { %4854 = vtanh.f32 %v443_v16 }
 0x545   :  { %v4855_v18 = vpop.eup %4854 }
 0x546   :  { %446 = vrot.lane.b32.xlu0 %v4855_v18, %s5160_s14 }
 0x5b8   :  { %v447_v19 = vpop.permute.xlu0 %446 }
 0x5b9   :  { %v449_v21 = vmul.f32 %v4853_v7, %v447_v19 }
 0x5bb   :  { %v450_v22 = vpack.c.bf16 %v449_v21, %v449_v21 }
 0x5bd   :  { %452 = vrot.lane.b32.xlu1 %v450_v22, %s5161_s20 }
 0x62f   :  { %v453_v24 = vpop.permute.xlu1 %452 }
 0x630   :  { %4245 = vmatmul.mubr.msk.bf16.vlgmr.msra.gmra.mrb[0].mxu1 %vm249_vm2, %v453_v24  ;;  %4253 = vmatmul.mubr.msk.bf16.vlgmr.msra.gmra.mrb[20].mxu0 %vm249_vm2, %v453_v24 }
 0x631   :  { %4257 = vmatpush3.bf16.msra.mxu1 %v5398_v51  ;;  %4265 = vmatpush3.bf16.msra.mxu0 %v5346_v9 }
 0x632   :  { %4258 = vmatprep.subr.bf16.mxu1 %v5157_v1  ;;  %4266 = vmatprep.subr.bf16.mxu0 %v5157_v1 }
 0x633   :  { %4260 = vmatprep.mubr.msk.bf16.mxu1 %vm5158_vm0, %v5157_v1  ;;  %4268 = vmatprep.mubr.msk.bf16.mxu0 %vm5158_vm0, %v5157_v1 }
 0x635   :  { %4259 = vmatpush3.bf16.msra.mxu1 %v5404_v52  ;;  %4267 = vmatpush3.bf16.msra.mxu0 %v5365_v15 }
 0x636   :  { %4272 = vmatprep.subr.bf16.mxu1 %v5157_v1  ;;  %4280 = vmatprep.subr.bf16.mxu0 %v5157_v1 }
 0x703   :  { %v531_v25 = vpop.f32.mrb[20].mxu0 }
 0x704   :  { %v537_v26 = vadd.f32 %v531_v25, %v5379_v20  ;;  %v4254_v28 = vpop.f32.mrb[21].mxu0 }
 0x705   :  { %v534_v30 = vpop.f32.mrb[22].mxu0 }
 0x706   :  { %v3886_v32 = vmul.f32 -1.442695, %v537_v26  ;;  %v4255_v34 = vpop.f32.mrb[23].mxu0 }
 0x708   :  { %4856 = vpow2.f32 %v3886_v32 }
 0x712   :  { %v4857_v35 = vpop.eup %4856 }
 0x713   :  { %v541_v36 = vadd.f32 1.0, %v4857_v35 }
 0x715   :  { %4858 = vrcp.f32 %v541_v36 }
 0x71f   :  { %v4859_v37 = vpop.eup %4858 }
 0x720   :  { %v544_v38 = vmul.f32 2.0, %v4859_v37  ;;  %v546_v42 = vmul.f32 %v4859_v37, %v443_v16 }
 0x722   :  { %v3887_v39 = vadd.f32 -1.0, %v544_v38 }
 0x724   :  { %548 = vrot.lane.b32.xlu0 %v3887_v39, %s5160_s14 }
 0x796   :  { %v549_v40 = vpop.permute.xlu0 %548 }
 0x797   :  { %v551_v41 = vmul.f32 %v4859_v37, %v549_v40 }
 0x799   :  { %553 = vrot.lane.b32.xlu1 %v551_v41, %s5161_s20 }
 0x80b   :  { %v554_v43 = vpop.permute.xlu1 %553 }
 0x80c   :  { %v556_v20 = vadd.f32 %v554_v43, %v546_v42 }
 0x80e   :  { %4860 = vtanh.f32 %v556_v20 }
 0x818   :  { %v4861_v44 = vpop.eup %4860 }
 0x819   :  { %559 = vrot.lane.b32.xlu0 %v4861_v44, %s5160_s14 }
 0x88b   :  { %v560_v45 = vpop.permute.xlu0 %559 }
 0x88c   :  { %v562_v46 = vmul.f32 %v4859_v37, %v560_v45 }
 0x88e   :  { %v563_v47 = vpack.c.bf16 %v562_v46, %v562_v46 }
 0x890   :  { %565 = vrot.lane.b32.xlu1 %v563_v47, %s5161_s20 }
 0x902   :  { %v566_v48 = vpop.permute.xlu1 %565 }
 0x903   :  { %4261 = vmatmul.mubr.msk.bf16.vlgmr.msra.gmra.mrb[4].mxu1 %vm249_vm2, %v566_v48  ;;  %4269 = vmatmul.mubr.msk.bf16.vlgmr.msra.gmra.mrb[24].mxu0 %vm249_vm2, %v566_v48 }
 0x904   :  { %4273 = vmatpush3.bf16.msra.mxu1 %v5398_v51  ;;  %4281 = vmatpush3.bf16.msra.mxu0 %v5346_v9 }
 0x905   :  { %4274 = vmatprep.subr.bf16.mxu1 %v5157_v1  ;;  %4282 = vmatprep.subr.bf16.mxu0 %v5157_v1 }
 0x906   :  { %4276 = vmatprep.mubr.msk.bf16.mxu1 %vm5158_vm0, %v5157_v1  ;;  %4284 = vmatprep.mubr.msk.bf16.mxu0 %vm5158_vm0, %v5157_v1 }
 0x908   :  { %4275 = vmatpush3.bf16.msra.mxu1 %v5404_v52  ;;  %4283 = vmatpush3.bf16.msra.mxu0 %v5365_v15 }
 0x909   :  { %4288 = vmatprep.subr.bf16.mxu1 %v5157_v1  ;;  %4296 = vmatprep.subr.bf16.mxu0 %v5157_v1 }
 0x9d6   :  { %v644_v49 = vpop.f32.mrb[24].mxu0 }
 0x9d7   :  { %v650_v50 = vadd.f32 %v644_v49, %v5381_v23  ;;  %v4270_v53 = vpop.f32.mrb[25].mxu0 }
 0x9d8   :  { %v647_v54 = vpop.f32.mrb[26].mxu0 }
 0x9d9   :  { %v3890_v55 = vmul.f32 -1.442695, %v650_v50  ;;  %v4271_v56 = vpop.f32.mrb[27].mxu0 }
 0x9db   :  { %4862 = vpow2.f32 %v3890_v55 }
 0x9e5   :  { %v4863_v57 = vpop.eup %4862 }
 0x9e6   :  { %v654_v59 = vadd.f32 1.0, %v4863_v57 }
 0x9e8   :  { %4864 = vrcp.f32 %v654_v59 }
 0x9f2   :  { %v4865_v60 = vpop.eup %4864 }
 0x9f3   :  { %v657_v61 = vmul.f32 2.0, %v4865_v60  ;;  %v659_v2 = vmul.f32 %v4865_v60, %v556_v20 }
 0x9f5   :  { %v3891_v62 = vadd.f32 -1.0, %v657_v61 }
 0x9f7   :  { %661 = vrot.lane.b32.xlu0 %v3891_v62, %s5160_s14 }
 0xa69   :  { %v662_v63 = vpop.permute.xlu0 %661 }
 0xa6a   :  { %v664_v0 = vmul.f32 %v4865_v60, %v662_v63 }
 0xa6c   :  { %666 = vrot.lane.b32.xlu1 %v664_v0, %s5161_s20 }
 0xade   :  { %v667_v3 = vpop.permute.xlu1 %666 }
 0xadf   :  { %v669_v23 = vadd.f32 %v667_v3, %v659_v2 }
 0xae1   :  { %4866 = vtanh.f32 %v669_v23 }
 0xaeb   :  { %v4867_v4 = vpop.eup %4866 }
 0xaec   :  { %672 = vrot.lane.b32.xlu0 %v4867_v4, %s5160_s14 }
 0xb5e   :  { %v673_v5 = vpop.permute.xlu0 %672 }
 0xb5f   :  { %v675_v6 = vmul.f32 %v4865_v60, %v673_v5 }
 0xb61   :  { %v676_v7 = vpack.c.bf16 %v675_v6, %v675_v6 }
 0xb63   :  { %678 = vrot.lane.b32.xlu1 %v676_v7, %s5161_s20 }
 0xbd5   :  { %v679_v8 = vpop.permute.xlu1 %678 }
 0xbd6   :  { %4277 = vmatmul.mubr.msk.bf16.vlgmr.msra.gmra.mrb[8].mxu1 %vm249_vm2, %v679_v8  ;;  %4285 = vmatmul.mubr.msk.bf16.vlgmr.msra.gmra.mrb[28].mxu0 %vm249_vm2, %v679_v8 }
 0xbd7   :  { %4289 = vmatpush3.bf16.msra.mxu1 %v5398_v51  ;;  %4297 = vmatpush3.bf16.msra.mxu0 %v5346_v9 }
 0xbd8   :  { %4290 = vmatprep.subr.bf16.mxu1 %v5157_v1  ;;  %4298 = vmatprep.subr.bf16.mxu0 %v5157_v1 }
 0xbd9   :  { %4292 = vmatprep.mubr.msk.bf16.mxu1 %vm5158_vm0, %v5157_v1  ;;  %4300 = vmatprep.mubr.msk.bf16.mxu0 %vm5158_vm0, %v5157_v1 }
 0xbdb   :  { %4291 = vmatpush3.bf16.msra.mxu1 %v5404_v52  ;;  %4299 = vmatpush3.bf16.msra.mxu0 %v5365_v15 }
 0xbdc   :  { %4304 = vmatprep.subr.bf16.mxu1 %v5157_v1  ;;  %4312 = vmatprep.subr.bf16.mxu0 %v5157_v1 }
 0xca9   :  { %v757_v10 = vpop.f32.mrb[28].mxu0 }
 0xcaa   :  { %v763_v11 = vadd.f32 %v757_v10, %v5387_v29  ;;  %v4286_v12 = vpop.f32.mrb[29].mxu0 }
 0xcab   :  { %v760_v13 = vpop.f32.mrb[30].mxu0 }
 0xcac   :  { %v3894_v14 = vmul.f32 -1.442695, %v763_v11  ;;  %v4287_v16 = vpop.f32.mrb[31].mxu0 }
 0xcae   :  { %4868 = vpow2.f32 %v3894_v14 }
 0xcb8   :  { %v4869_v18 = vpop.eup %4868 }
 0xcb9   :  { %v767_v19 = vadd.f32 1.0, %v4869_v18 }
 0xcbb   :  { %4870 = vrcp.f32 %v767_v19 }
 0xcc5   :  { %v4871_v21 = vpop.eup %4870 }
 0xcc6   :  { %v770_v22 = vmul.f32 2.0, %v4871_v21  ;;  %v772_v28 = vmul.f32 %v4871_v21, %v669_v23 }
 0xcc8   :  { %v3895_v24 = vadd.f32 -1.0, %v770_v22 }
 0xcca   :  { %774 = vrot.lane.b32.xlu0 %v3895_v24, %s5160_s14 }
 0xd3c   :  { %v775_v25 = vpop.permute.xlu0 %774 }
 0xd3d   :  { %v777_v26 = vmul.f32 %v4871_v21, %v775_v25 }
 0xd3f   :  { %779 = vrot.lane.b32.xlu1 %v777_v26, %s5161_s20 }
 0xdb1   :  { %v780_v30 = vpop.permute.xlu1 %779 }
 0xdb2   :  { %v782_v29 = vadd.f32 %v780_v30, %v772_v28 }
 0xdb4   :  { %4872 = vtanh.f32 %v782_v29 }
 0xdbe   :  { %v4873_v32 = vpop.eup %4872 }
 0xdbf   :  { %785 = vrot.lane.b32.xlu0 %v4873_v32, %s5160_s14 }
 0xe31   :  { %v786_v34 = vpop.permute.xlu0 %785 }
 0xe32   :  { %v788_v35 = vmul.f32 %v4871_v21, %v786_v34 }
 0xe34   :  { %v789_v36 = vpack.c.bf16 %v788_v35, %v788_v35 }
 0xe36   :  { %791 = vrot.lane.b32.xlu1 %v789_v36, %s5161_s20 }
 0xea8   :  { %v792_v37 = vpop.permute.xlu1 %791 }
 0xea9   :  { %4293 = vmatmul.mubr.msk.bf16.vlgmr.msra.gmra.mrb[12].mxu1 %vm249_vm2, %v792_v37  ;;  %4301 = vmatmul.mubr.msk.bf16.vlgmr.msra.gmra.mrb[32].mxu0 %vm249_vm2, %v792_v37 }
 0xeaa   :  { %4305 = vmatpush3.bf16.msra.mxu1 %v5398_v51  ;;  %4313 = vmatpush3.bf16.msra.mxu0 %v5346_v9 }
 0xeab   :  { %4306 = vmatprep.subr.bf16.mxu1 %v5157_v1  ;;  %4314 = vmatprep.subr.bf16.mxu0 %v5157_v1 }
 0xeac   :  { %4308 = vmatprep.mubr.msk.bf16.mxu1 %vm5158_vm0, %v5157_v1  ;;  %4316 = vmatprep.mubr.msk.bf16.mxu0 %vm5158_vm0, %v5157_v1 }
 0xeae   :  { %4307 = vmatpush3.bf16.msra.mxu1 %v5404_v52  ;;  %4315 = vmatpush3.bf16.msra.mxu0 %v5365_v15 }
 0xeaf   :  { %4320 = vmatprep.subr.bf16.mxu1 %v5157_v1  ;;  %4328 = vmatprep.subr.bf16.mxu0 %v5157_v1 }
 0xf7c   :  { %v870_v38 = vpop.f32.mrb[32].mxu0 }
 0xf7d   :  { %v876_v39 = vadd.f32 %v870_v38, %v5391_v33  ;;  %v4302_v40 = vpop.f32.mrb[33].mxu0 }
 0xf7e   :  { %v873_v41 = vpop.f32.mrb[34].mxu0 }
 0xf7f   :  { %v3898_v42 = vmul.f32 -1.442695, %v876_v39  ;;  %v4303_v43 = vpop.f32.mrb[35].mxu0  ;;  %v5549_v39 = vld [vmem:[%s6059_s5] sm:$0xff]   ;;  %v5556_v41 = vld [vmem:[%s6059_s5 + $0x8] sm:$0xff]  }
 0xf81   :  { %4874 = vpow2.f32 %v3898_v42  ;;  %v5570_v42 = vld [vmem:[#allocation5] ss:$0 sm:$0xff] }
 0xf82   :  { %v379_v43 = vadd.f32 %v5570_v42, %v5429_v58 }
 0xf8b   :  { %v4875_v20 = vpop.eup %4874 }
 0xf8c   :  { %v880_v44 = vadd.f32 1.0, %v4875_v20 }
 0xf8e   :  { %4876 = vrcp.f32 %v880_v44 }
 0xf98   :  { %v4877_v45 = vpop.eup %4876 }
 0xf99   :  { %v883_v46 = vmul.f32 2.0, %v4877_v45  ;;  %v885_v50 = vmul.f32 %v4877_v45, %v782_v29 }
 0xf9b   :  { %v3899_v47 = vadd.f32 -1.0, %v883_v46 }
 0xf9d   :  { %887 = vrot.lane.b32.xlu0 %v3899_v47, %s5160_s14 }
0x100f   :  { %v888_v48 = vpop.permute.xlu0 %887 }
0x1010   :  { %v890_v49 = vmul.f32 %v4877_v45, %v888_v48 }
0x1012   :  { %892 = vrot.lane.b32.xlu1 %v890_v49, %s5161_s20 }
0x1084   :  { %v893_v53 = vpop.permute.xlu1 %892 }
0x1085   :  { %v895_v33 = vadd.f32 %v893_v53, %v885_v50 }
0x1087   :  { %4878 = vtanh.f32 %v895_v33 }
0x1091   :  { %v4879_v54 = vpop.eup %4878 }
0x1092   :  { %898 = vrot.lane.b32.xlu0 %v4879_v54, %s5160_s14 }
0x1104   :  { %v899_v55 = vpop.permute.xlu0 %898 }
0x1105   :  { %v901_v56 = vmul.f32 %v4877_v45, %v899_v55 }
0x1107   :  { %v902_v57 = vpack.c.bf16 %v901_v56, %v901_v56 }
0x1109   :  { %904 = vrot.lane.b32.xlu1 %v902_v57, %s5161_s20 }
0x117b   :  { %v905_v59 = vpop.permute.xlu1 %904 }
0x117c   :  { %4309 = vmatmul.mubr.msk.bf16.vlgmr.msra.gmra.mrb[16].mxu1 %vm249_vm2, %v905_v59  ;;  %4317 = vmatmul.mubr.msk.bf16.vlgmr.msra.gmra.mrb[36].mxu0 %vm249_vm2, %v905_v59 }
0x117d   :  { %4321 = vmatpush3.bf16.msra.mxu1 %v5398_v51  ;;  %4329 = vmatpush3.bf16.msra.mxu0 %v5346_v9 }
0x117e   :  { %4322 = vmatprep.subr.bf16.mxu1 %v5157_v1  ;;  %4330 = vmatprep.subr.bf16.mxu0 %v5157_v1 }
0x117f   :  { %4324 = vmatprep.mubr.msk.bf16.mxu1 %vm5158_vm0, %v5157_v1  ;;  %4332 = vmatprep.mubr.msk.bf16.mxu0 %vm5158_vm0, %v5157_v1 }
0x1181   :  { %4323 = vmatpush3.bf16.msra.mxu1 %v5404_v52  ;;  %4331 = vmatpush3.bf16.msra.mxu0 %v5365_v15 }
0x1182   :  { %4336 = vmatprep.subr.bf16.mxu1 %v5157_v1  ;;  %4352 = vmatprep.subr.bf16.mxu0 %v5157_v1 }
0x124f   :  { %v983_v60 = vpop.f32.mrb[36].mxu0 }
0x1250   :  { %v989_v9 = vadd.f32 %v983_v60, %v5385_v27  ;;  %v4318_v61 = vpop.f32.mrb[37].mxu0  ;;  %v5579_v60 = vld [vmem:[%s6061_s7] sm:$0xff]  }
0x1251   :  { %v986_v62 = vpop.f32.mrb[38].mxu0 }
0x1252   :  { %v3902_v63 = vmul.f32 -1.442695, %v989_v9  ;;  %v4319_v0 = vpop.f32.mrb[39].mxu0  ;;  %v5585_v9 = vld [vmem:[%s6061_s7 + $0x8] sm:$0xff]  }
0x1254   :  { %4880 = vpow2.f32 %v3902_v63 }
0x125e   :  { %v4881_v2 = vpop.eup %4880 }
0x125f   :  { %v993_v3 = vadd.f32 1.0, %v4881_v2 }
0x1261   :  { %4882 = vrcp.f32 %v993_v3 }
0x126b   :  { %v4883_v23 = vpop.eup %4882 }
0x126c   :  { %v996_v4 = vmul.f32 2.0, %v4883_v23  ;;  %v998_v7 = vmul.f32 %v4883_v23, %v895_v33 }
0x126e   :  { %v3903_v5 = vadd.f32 -1.0, %v996_v4 }
0x1270   :  { %1000 = vrot.lane.b32.xlu0 %v3903_v5, %s5160_s14 }
0x12e2   :  { %v1001_v15 = vpop.permute.xlu0 %1000 }
0x12e3   :  { %v1003_v6 = vmul.f32 %v4883_v23, %v1001_v15 }
0x12e5   :  { %1005 = vrot.lane.b32.xlu1 %v1003_v6, %s5161_s20 }
0x1357   :  { %v1006_v8 = vpop.permute.xlu1 %1005 }
0x1358   :  { %v1008_v27 = vadd.f32 %v1006_v8, %v998_v7 }
0x135a   :  { %4884 = vtanh.f32 %v1008_v27 }
0x1364   :  { %v4885_v10 = vpop.eup %4884 }
0x1365   :  { %1011 = vrot.lane.b32.xlu0 %v4885_v10, %s5160_s14 }
0x13d7   :  { %v1012_v11 = vpop.permute.xlu0 %1011 }
0x13d8   :  { %v1014_v12 = vmul.f32 %v4883_v23, %v1012_v11 }
0x13da   :  { %v1015_v13 = vpack.c.bf16 %v1014_v12, %v1014_v12 }
0x13dc   :  { %1017 = vrot.lane.b32.xlu1 %v1015_v13, %s5161_s20 }
0x144e   :  { %v1018_v14 = vpop.permute.xlu1 %1017 }
0x144f   :  { %4325 = vmatmul.mubr.msk.bf16.vlgmr.msra.gmra.mrb[20].mxu1 %vm249_vm2, %v1018_v14  ;;  %4333 = vmatmul.mubr.msk.bf16.vlgmr.msra.gmra.mrb[40].mxu0 %vm249_vm2, %v1018_v14 }
0x1450   :  { %4337 = vmatpush3.bf16.msra.mxu1 %v5398_v51  ;;  %4340 = vmatprep.mubr.msk.bf16.mxu1 %vm5158_vm0, %v5157_v1 }
0x1451   :  { %4338 = vmatprep.subr.bf16.mxu1 %v5157_v1  ;;  %4356 = vmatprep.mubr.msk.bf16.mxu0 %vm5158_vm0, %v5157_v1 }
0x1452   :  { %4353 = vmatpush3.bf16.msra.mxu0 %v5579_v60 }
0x1453   :  { %4354 = vmatprep.subr.bf16.mxu0 %v5157_v1 }
0x1454   :  { %4339 = vmatpush3.bf16.msra.mxu1 %v5404_v52 }
0x1455   :  { %4344 = vmatprep.subr.bf16.mxu1 %v5157_v1 }
0x1456   :  { %4355 = vmatpush3.bf16.msra.mxu0 %v5585_v9 }
0x1457   :  { %4368 = vmatprep.subr.bf16.mxu0 %v5157_v1 }
0x1522   :  { %v1096_v16 = vpop.f32.mrb[40].mxu0 }
0x1523   :  { %v1102_v18 = vadd.f32 %v1096_v16, %v5389_v31  ;;  %v4334_v19 = vpop.f32.mrb[41].mxu0 }
0x1524   :  { %v1099_v21 = vpop.f32.mrb[42].mxu0 }
0x1525   :  { %v3906_v22 = vmul.f32 -1.442695, %v1102_v18  ;;  %v4335_v24 = vpop.f32.mrb[43].mxu0 }
0x1527   :  { %4886 = vpow2.f32 %v3906_v22 }
0x1531   :  { %v4887_v51 = vpop.eup %4886 }
0x1532   :  { %v1106_v25 = vadd.f32 1.0, %v4887_v51 }
0x1534   :  { %4888 = vrcp.f32 %v1106_v25 }
0x153e   :  { %v4889_v26 = vpop.eup %4888 }
0x153f   :  { %v1109_v28 = vmul.f32 2.0, %v4889_v26  ;;  %v1111_v32 = vmul.f32 %v4889_v26, %v1008_v27 }
0x1541   :  { %v3907_v30 = vadd.f32 -1.0, %v1109_v28 }
0x1543   :  { %1113 = vrot.lane.b32.xlu0 %v3907_v30, %s5160_s14 }
0x15b5   :  { %v1114_v29 = vpop.permute.xlu0 %1113 }
0x15b6   :  { %v1116_v52 = vmul.f32 %v4889_v26, %v1114_v29 }
0x15b8   :  { %1118 = vrot.lane.b32.xlu1 %v1116_v52, %s5161_s20 }
0x162a   :  { %v1119_v34 = vpop.permute.xlu1 %1118 }
0x162b   :  { %v1121_v31 = vadd.f32 %v1119_v34, %v1111_v32 }
0x162d   :  { %4890 = vtanh.f32 %v1121_v31 }
0x1637   :  { %v4891_v35 = vpop.eup %4890 }
0x1638   :  { %1124 = vrot.lane.b32.xlu0 %v4891_v35, %s5160_s14 }
0x16aa   :  { %v1125_v36 = vpop.permute.xlu0 %1124 }
0x16ab   :  { %v1127_v37 = vmul.f32 %v4889_v26, %v1125_v36 }
0x16ad   :  { %v1128_v38 = vpack.c.bf16 %v1127_v37, %v1127_v37 }
0x16af   :  { %1130 = vrot.lane.b32.xlu1 %v1128_v38, %s5161_s20 }
0x1721   :  { %v1131_v40 = vpop.permute.xlu1 %1130 }
0x1722   :  { %4341 = vmatmul.mubr.msk.bf16.vlgmr.msra.gmra.mrb[24].mxu1 %vm249_vm2, %v1131_v40 }
0x1723   :  { %4345 = vmatpush3.bf16.msra.mxu1 %v5549_v39  ;;  %4348 = vmatprep.mubr.msk.bf16.mxu1 %vm5158_vm0, %v5157_v1 }
0x1724   :  { %4346 = vmatprep.subr.bf16.mxu1 %v5157_v1 }
0x1727   :  { %4347 = vmatpush3.bf16.msra.mxu1 %v5556_v41 }
0x1728   :  { %4360 = vmatprep.subr.bf16.mxu1 %v5157_v1 }
0x172a   :  { %4349 = vmatmul.mubr.bf16.vlgmr.msra.gmra.mrb[28].mxu1 %v5159_v17 }
0x172b   :  { %4361 = vmatpush3.bf16.msra.mxu1 %v5549_v39  ;;  %4364 = vmatprep.mubr.msk.bf16.mxu1 %vm5158_vm0, %v5157_v1 }
0x172c   :  { %4362 = vmatprep.subr.bf16.mxu1 %v5157_v1 }
0x172f   :  { %4363 = vmatpush3.bf16.msra.mxu1 %v5556_v41 }
0x1730   :  { %4376 = vmatprep.subr.bf16.mxu1 %v5157_v1 }
0x17fd   :  { %v1230_v20 = vpop.f32.mrb[28].mxu1 }
0x17fe   :  { %v1236_v44 = vadd.f32 %v1230_v20, %v379_v43  ;;  %v4350_v45 = vpop.f32.mrb[29].mxu1 }
0x17ff   :  { %v1233_v46 = vpop.f32.mrb[30].mxu1 }
0x1800   :  { %v3911_v47 = vmul.f32 -1.442695, %v1236_v44  ;;  %v4351_v48 = vpop.f32.mrb[31].mxu1 }
0x1802   :  { %4892 = vpow2.f32 %v3911_v47 }
0x180c   :  { %v4893_v49 = vpop.eup %4892 }
0x180d   :  { %v1240_v50 = vadd.f32 1.0, %v4893_v49 }
0x180f   :  { %4894 = vrcp.f32 %v1240_v50 }
0x1819   :  { %v4895_v53 = vpop.eup %4894 }
0x181a   :  { %v1243_v33 = vmul.f32 2.0, %v4895_v53  ;;  %v1245_v58 = vmul.f32 0.0, %v4895_v53 }
0x181c   :  { %v3912_v54 = vadd.f32 -1.0, %v1243_v33 }
0x181e   :  { %1247 = vrot.lane.b32.xlu0 %v3912_v54, %s5160_s14 }
0x1890   :  { %v1248_v55 = vpop.permute.xlu0 %1247 }
0x1891   :  { %v1250_v56 = vmul.f32 %v4895_v53, %v1248_v55 }
0x1893   :  { %1252 = vrot.lane.b32.xlu1 %v1250_v56, %s5161_s20 }
0x1905   :  { %v1253_v57 = vpop.permute.xlu1 %1252 }
0x1906   :  { %v1255_v59 = vadd.f32 %v1253_v57, %v1245_v58 }
0x1908   :  { %4896 = vtanh.f32 %v1255_v59 }
0x1912   :  { %v4897_v61 = vpop.eup %4896 }
0x1913   :  { %1258 = vrot.lane.b32.xlu0 %v4897_v61, %s5160_s14 }
0x1985   :  { %v1259_v62 = vpop.permute.xlu0 %1258 }
0x1986   :  { %v1261_v63 = vmul.f32 %v4895_v53, %v1259_v62 }
0x1988   :  { %v1262_v0 = vpack.c.bf16 %v1261_v63, %v1261_v63 }
0x198a   :  { %1270 = vrot.lane.b32.xlu1 %v1262_v0, %s5161_s20 }
0x19fc   :  { %v1271_v2 = vpop.permute.xlu1 %1270 }
0x19fd   :  { %4357 = vmatmul.mubr.msk.bf16.vlgmr.msra.gmra.mrb[44].mxu0 %vm249_vm2, %v1271_v2  ;;  %4365 = vmatmul.mubr.msk.bf16.vlgmr.msra.gmra.mrb[0].mxu1 %vm249_vm2, %v1271_v2 }
0x19fe   :  { %4369 = vmatpush3.bf16.msra.mxu0 %v5579_v60  ;;  %4377 = vmatpush3.bf16.msra.mxu1 %v5549_v39 }
0x19ff   :  { %4370 = vmatprep.subr.bf16.mxu0 %v5157_v1  ;;  %4378 = vmatprep.subr.bf16.mxu1 %v5157_v1 }
0x1a00   :  { %4372 = vmatprep.mubr.msk.bf16.mxu0 %vm5158_vm0, %v5157_v1  ;;  %4380 = vmatprep.mubr.msk.bf16.mxu1 %vm5158_vm0, %v5157_v1 }
0x1a02   :  { %4371 = vmatpush3.bf16.msra.mxu0 %v5585_v9  ;;  %4379 = vmatpush3.bf16.msra.mxu1 %v5556_v41 }
0x1a03   :  { %4384 = vmatprep.subr.bf16.mxu0 %v5157_v1  ;;  %4392 = vmatprep.subr.bf16.mxu1 %v5157_v1 }
0x1ad0   :  { %v1361_v3 = vpop.f32.mrb[0].mxu1 }
0x1ad1   :  { %v4694_v23 = vadd.f32 %v5570_v42, %v1361_v3  ;;  %v4366_v4 = vpop.f32.mrb[1].mxu1 }
0x1ad2   :  { %v1364_v5 = vpop.f32.mrb[2].mxu1 }
0x1ad3   :  { %v3918_v15 = vmul.f32 -1.442695, %v4694_v23  ;;  %v4367_v6 = vpop.f32.mrb[3].mxu1 }
0x1ad5   :  { %4898 = vpow2.f32 %v3918_v15 }
0x1adf   :  { %v4899_v7 = vpop.eup %4898 }
0x1ae0   :  { %v1371_v8 = vadd.f32 1.0, %v4899_v7 }
0x1ae2   :  { %4900 = vrcp.f32 %v1371_v8 }
0x1aec   :  { %v4901_v27 = vpop.eup %4900 }
0x1aed   :  { %v1374_v10 = vmul.f32 2.0, %v4901_v27  ;;  %v1376_v14 = vmul.f32 %v4901_v27, %v1255_v59 }
0x1aef   :  { %v3919_v11 = vadd.f32 -1.0, %v1374_v10 }
0x1af1   :  { %1378 = vrot.lane.b32.xlu0 %v3919_v11, %s5160_s14 }
0x1b63   :  { %v1379_v12 = vpop.permute.xlu0 %1378 }
0x1b64   :  { %v1381_v13 = vmul.f32 %v4901_v27, %v1379_v12 }
0x1b66   :  { %1383 = vrot.lane.b32.xlu1 %v1381_v13, %s5161_s20 }
0x1bd8   :  { %v1384_v16 = vpop.permute.xlu1 %1383 }
0x1bd9   :  { %v1386_v18 = vadd.f32 %v1384_v16, %v1376_v14 }
0x1bdb   :  { %4902 = vtanh.f32 %v1386_v18 }
0x1be5   :  { %v4903_v19 = vpop.eup %4902 }
0x1be6   :  { %1389 = vrot.lane.b32.xlu0 %v4903_v19, %s5160_s14 }
0x1c58   :  { %v1390_v21 = vpop.permute.xlu0 %1389 }
0x1c59   :  { %v1392_v22 = vmul.f32 %v4901_v27, %v1390_v21 }
0x1c5b   :  { %v1393_v24 = vpack.c.bf16 %v1392_v22, %v1392_v22 }
0x1c5d   :  { %1395 = vrot.lane.b32.xlu1 %v1393_v24, %s5161_s20 }
0x1ccf   :  { %v1396_v51 = vpop.permute.xlu1 %1395 }
0x1cd0   :  { %4373 = vmatmul.mubr.msk.bf16.vlgmr.msra.gmra.mrb[48].mxu0 %vm249_vm2, %v1396_v51  ;;  %4381 = vmatmul.mubr.msk.bf16.vlgmr.msra.gmra.mrb[4].mxu1 %vm249_vm2, %v1396_v51 }
0x1cd1   :  { %4385 = vmatpush3.bf16.msra.mxu0 %v5579_v60  ;;  %4393 = vmatpush3.bf16.msra.mxu1 %v5549_v39 }
0x1cd2   :  { %4386 = vmatprep.subr.bf16.mxu0 %v5157_v1  ;;  %4394 = vmatprep.subr.bf16.mxu1 %v5157_v1 }
0x1cd3   :  { %4388 = vmatprep.mubr.msk.bf16.mxu0 %vm5158_vm0, %v5157_v1  ;;  %4396 = vmatprep.mubr.msk.bf16.mxu1 %vm5158_vm0, %v5157_v1 }
0x1cd5   :  { %4387 = vmatpush3.bf16.msra.mxu0 %v5585_v9  ;;  %4395 = vmatpush3.bf16.msra.mxu1 %v5556_v41 }
0x1cd6   :  { %4400 = vmatprep.subr.bf16.mxu0 %v5157_v1  ;;  %4408 = vmatprep.subr.bf16.mxu1 %v5157_v1 }
0x1da3   :  { %v1474_v25 = vpop.f32.mrb[4].mxu1 }
0x1da4   :  { %v4695_v26 = vadd.f32 %v5570_v42, %v1474_v25  ;;  %v4382_v28 = vpop.f32.mrb[5].mxu1 }
0x1da5   :  { %v1477_v30 = vpop.f32.mrb[6].mxu1 }
0x1da6   :  { %v3922_v29 = vmul.f32 -1.442695, %v4695_v26  ;;  %v4383_v52 = vpop.f32.mrb[7].mxu1 }
0x1da8   :  { %4904 = vpow2.f32 %v3922_v29 }
0x1db2   :  { %v4905_v32 = vpop.eup %4904 }
0x1db3   :  { %v1484_v34 = vadd.f32 1.0, %v4905_v32 }
0x1db5   :  { %4906 = vrcp.f32 %v1484_v34 }
0x1dbf   :  { %v4907_v31 = vpop.eup %4906 }
0x1dc0   :  { %v1487_v35 = vmul.f32 2.0, %v4907_v31  ;;  %v1489_v40 = vmul.f32 %v4907_v31, %v1386_v18 }
0x1dc2   :  { %v3923_v36 = vadd.f32 -1.0, %v1487_v35 }
0x1dc4   :  { %1491 = vrot.lane.b32.xlu0 %v3923_v36, %s5160_s14 }
0x1e36   :  { %v1492_v37 = vpop.permute.xlu0 %1491 }
0x1e37   :  { %v1494_v38 = vmul.f32 %v4907_v31, %v1492_v37 }
0x1e39   :  { %1496 = vrot.lane.b32.xlu1 %v1494_v38, %s5161_s20 }
0x1eab   :  { %v1497_v43 = vpop.permute.xlu1 %1496 }
0x1eac   :  { %v1499_v20 = vadd.f32 %v1497_v43, %v1489_v40 }
0x1eae   :  { %4908 = vtanh.f32 %v1499_v20 }
0x1eb8   :  { %v4909_v44 = vpop.eup %4908 }
0x1eb9   :  { %1502 = vrot.lane.b32.xlu0 %v4909_v44, %s5160_s14 }
0x1f2b   :  { %v1503_v45 = vpop.permute.xlu0 %1502 }
0x1f2c   :  { %v1505_v46 = vmul.f32 %v4907_v31, %v1503_v45 }
0x1f2e   :  { %v1506_v47 = vpack.c.bf16 %v1505_v46, %v1505_v46 }
0x1f30   :  { %1508 = vrot.lane.b32.xlu1 %v1506_v47, %s5161_s20 }
0x1fa2   :  { %v1509_v48 = vpop.permute.xlu1 %1508 }
0x1fa3   :  { %4389 = vmatmul.mubr.msk.bf16.vlgmr.msra.gmra.mrb[52].mxu0 %vm249_vm2, %v1509_v48  ;;  %4397 = vmatmul.mubr.msk.bf16.vlgmr.msra.gmra.mrb[8].mxu1 %vm249_vm2, %v1509_v48 }
0x1fa4   :  { %4401 = vmatpush3.bf16.msra.mxu0 %v5579_v60  ;;  %4409 = vmatpush3.bf16.msra.mxu1 %v5549_v39 }
0x1fa5   :  { %4402 = vmatprep.subr.bf16.mxu0 %v5157_v1  ;;  %4410 = vmatprep.subr.bf16.mxu1 %v5157_v1 }
0x1fa6   :  { %4404 = vmatprep.mubr.msk.bf16.mxu0 %vm5158_vm0, %v5157_v1  ;;  %4412 = vmatprep.mubr.msk.bf16.mxu1 %vm5158_vm0, %v5157_v1 }
0x1fa8   :  { %4403 = vmatpush3.bf16.msra.mxu0 %v5585_v9  ;;  %4411 = vmatpush3.bf16.msra.mxu1 %v5556_v41 }
0x1fa9   :  { %4416 = vmatprep.subr.bf16.mxu0 %v5157_v1  ;;  %4424 = vmatprep.subr.bf16.mxu1 %v5157_v1 }
0x2076   :  { %v1587_v49 = vpop.f32.mrb[8].mxu1 }
0x2077   :  { %v4696_v50 = vadd.f32 %v5570_v42, %v1587_v49  ;;  %v4398_v53 = vpop.f32.mrb[9].mxu1 }
0x2078   :  { %v1590_v33 = vpop.f32.mrb[10].mxu1 }
0x2079   :  { %v3926_v54 = vmul.f32 -1.442695, %v4696_v50  ;;  %v4399_v55 = vpop.f32.mrb[11].mxu1 }
0x207b   :  { %4910 = vpow2.f32 %v3926_v54 }
0x2085   :  { %v4911_v56 = vpop.eup %4910 }
0x2086   :  { %v1597_v58 = vadd.f32 1.0, %v4911_v56 }
0x2088   :  { %4912 = vrcp.f32 %v1597_v58 }
0x2092   :  { %v4913_v57 = vpop.eup %4912 }
0x2093   :  { %v1600_v59 = vmul.f32 2.0, %v4913_v57  ;;  %v1602_v0 = vmul.f32 %v4913_v57, %v1499_v20 }
0x2095   :  { %v3927_v61 = vadd.f32 -1.0, %v1600_v59 }
0x2097   :  { %1604 = vrot.lane.b32.xlu0 %v3927_v61, %s5160_s14 }
0x2109   :  { %v1605_v62 = vpop.permute.xlu0 %1604 }
0x210a   :  { %v1607_v63 = vmul.f32 %v4913_v57, %v1605_v62 }
0x210c   :  { %1609 = vrot.lane.b32.xlu1 %v1607_v63, %s5161_s20 }
0x217e   :  { %v1610_v2 = vpop.permute.xlu1 %1609 }
0x217f   :  { %v1612_v3 = vadd.f32 %v1610_v2, %v1602_v0 }
0x2181   :  { %4914 = vtanh.f32 %v1612_v3 }
0x218b   :  { %v4915_v23 = vpop.eup %4914 }
0x218c   :  { %1615 = vrot.lane.b32.xlu0 %v4915_v23, %s5160_s14 }
0x21fe   :  { %v1616_v4 = vpop.permute.xlu0 %1615 }
0x21ff   :  { %v1618_v5 = vmul.f32 %v4913_v57, %v1616_v4 }
0x2201   :  { %v1619_v15 = vpack.c.bf16 %v1618_v5, %v1618_v5 }
0x2203   :  { %1621 = vrot.lane.b32.xlu1 %v1619_v15, %s5161_s20 }
0x2275   :  { %v1622_v6 = vpop.permute.xlu1 %1621 }
0x2276   :  { %4405 = vmatmul.mubr.msk.bf16.vlgmr.msra.gmra.mrb[56].mxu0 %vm249_vm2, %v1622_v6  ;;  %4413 = vmatmul.mubr.msk.bf16.vlgmr.msra.gmra.mrb[12].mxu1 %vm249_vm2, %v1622_v6 }
0x2277   :  { %4417 = vmatpush3.bf16.msra.mxu0 %v5579_v60  ;;  %4425 = vmatpush3.bf16.msra.mxu1 %v5549_v39 }
0x2278   :  { %4418 = vmatprep.subr.bf16.mxu0 %v5157_v1  ;;  %4426 = vmatprep.subr.bf16.mxu1 %v5157_v1 }
0x2279   :  { %4420 = vmatprep.mubr.msk.bf16.mxu0 %vm5158_vm0, %v5157_v1  ;;  %4428 = vmatprep.mubr.msk.bf16.mxu1 %vm5158_vm0, %v5157_v1 }
0x227b   :  { %4419 = vmatpush3.bf16.msra.mxu0 %v5585_v9  ;;  %4427 = vmatpush3.bf16.msra.mxu1 %v5556_v41 }
0x227c   :  { %4432 = vmatprep.subr.bf16.mxu0 %v5157_v1  ;;  %4440 = vmatprep.subr.bf16.mxu1 %v5157_v1 }
0x2349   :  { %v1700_v7 = vpop.f32.mrb[12].mxu1 }
0x234a   :  { %v4697_v8 = vadd.f32 %v5570_v42, %v1700_v7  ;;  %v4414_v27 = vpop.f32.mrb[13].mxu1 }
0x234b   :  { %v1703_v10 = vpop.f32.mrb[14].mxu1 }
0x234c   :  { %v3930_v11 = vmul.f32 -1.442695, %v4697_v8  ;;  %v4415_v12 = vpop.f32.mrb[15].mxu1 }
0x234e   :  { %4916 = vpow2.f32 %v3930_v11 }
0x2358   :  { %v4917_v13 = vpop.eup %4916 }
0x2359   :  { %v1710_v14 = vadd.f32 1.0, %v4917_v13 }
0x235b   :  { %4918 = vrcp.f32 %v1710_v14 }
0x2365   :  { %v4919_v16 = vpop.eup %4918 }
0x2366   :  { %v1713_v18 = vmul.f32 2.0, %v4919_v16  ;;  %v1715_v24 = vmul.f32 %v4919_v16, %v1612_v3 }
0x2368   :  { %v3931_v19 = vadd.f32 -1.0, %v1713_v18 }
0x236a   :  { %1717 = vrot.lane.b32.xlu0 %v3931_v19, %s5160_s14 }
0x23dc   :  { %v1718_v21 = vpop.permute.xlu0 %1717 }
0x23dd   :  { %v1720_v22 = vmul.f32 %v4919_v16, %v1718_v21 }
0x23df   :  { %1722 = vrot.lane.b32.xlu1 %v1720_v22, %s5161_s20 }
0x2451   :  { %v1723_v51 = vpop.permute.xlu1 %1722 }
0x2452   :  { %v1725_v25 = vadd.f32 %v1723_v51, %v1715_v24 }
0x2454   :  { %4920 = vtanh.f32 %v1725_v25 }
0x245e   :  { %v4921_v26 = vpop.eup %4920 }
0x245f   :  { %1728 = vrot.lane.b32.xlu0 %v4921_v26, %s5160_s14 }
0x24d1   :  { %v1729_v28 = vpop.permute.xlu0 %1728 }
0x24d2   :  { %v1731_v30 = vmul.f32 %v4919_v16, %v1729_v28 }
0x24d4   :  { %v1732_v29 = vpack.c.bf16 %v1731_v30, %v1731_v30 }
0x24d6   :  { %1734 = vrot.lane.b32.xlu1 %v1732_v29, %s5161_s20 }
0x2548   :  { %v1735_v52 = vpop.permute.xlu1 %1734 }
0x2549   :  { %4421 = vmatmul.mubr.msk.bf16.vlgmr.msra.gmra.mrb[60].mxu0 %vm249_vm2, %v1735_v52  ;;  %4429 = vmatmul.mubr.msk.bf16.vlgmr.msra.gmra.mrb[16].mxu1 %vm249_vm2, %v1735_v52 }
0x254a   :  { %4433 = vmatpush3.bf16.msra.mxu0 %v5579_v60  ;;  %4441 = vmatpush3.bf16.msra.mxu1 %v5549_v39 }
0x254b   :  { %4434 = vmatprep.subr.bf16.mxu0 %v5157_v1  ;;  %4442 = vmatprep.subr.bf16.mxu1 %v5157_v1 }
0x254c   :  { %4436 = vmatprep.mubr.msk.bf16.mxu0 %vm5158_vm0, %v5157_v1  ;;  %4444 = vmatprep.mubr.msk.bf16.mxu1 %vm5158_vm0, %v5157_v1 }
0x254e   :  { %4435 = vmatpush3.bf16.msra.mxu0 %v5585_v9  ;;  %4443 = vmatpush3.bf16.msra.mxu1 %v5556_v41 }
0x254f   :  { %4448 = vmatprep.subr.bf16.mxu0 %v5157_v1  ;;  %4456 = vmatprep.subr.bf16.mxu1 %v5157_v1 }
0x261c   :  { %v1813_v32 = vpop.f32.mrb[16].mxu1 }
0x261d   :  { %v4698_v34 = vadd.f32 %v5570_v42, %v1813_v32  ;;  %v4430_v31 = vpop.f32.mrb[17].mxu1  ;;  %v5724_v32 = vld [vmem:[%s6062_s8] sm:$0xff]  }
0x261e   :  { %v1816_v35 = vpop.f32.mrb[18].mxu1  ;;  %v5731_v31 = vld [vmem:[%s6062_s8 + $0x8] sm:$0xff]  }
0x261f   :  { %v3934_v36 = vmul.f32 -1.442695, %v4698_v34  ;;  %v4431_v37 = vpop.f32.mrb[19].mxu1  ;;  %v5745_v35 = vld [vmem:[#allocation7] ss:$0 sm:$0xff] }
0x2621   :  { %4922 = vpow2.f32 %v3934_v36 }
0x262b   :  { %v4923_v38 = vpop.eup %4922 }
0x262c   :  { %v1823_v40 = vadd.f32 1.0, %v4923_v38 }
0x262e   :  { %4924 = vrcp.f32 %v1823_v40 }
0x2638   :  { %v4925_v43 = vpop.eup %4924 }
0x2639   :  { %v1826_v20 = vmul.f32 2.0, %v4925_v43  ;;  %v1828_v47 = vmul.f32 %v4925_v43, %v1725_v25 }
0x263b   :  { %v3935_v44 = vadd.f32 -1.0, %v1826_v20 }
0x263d   :  { %1830 = vrot.lane.b32.xlu0 %v3935_v44, %s5160_s14 }
0x26af   :  { %v1831_v45 = vpop.permute.xlu0 %1830 }
0x26b0   :  { %v1833_v46 = vmul.f32 %v4925_v43, %v1831_v45 }
0x26b2   :  { %1835 = vrot.lane.b32.xlu1 %v1833_v46, %s5161_s20 }
0x2724   :  { %v1836_v48 = vpop.permute.xlu1 %1835 }
0x2725   :  { %v1838_v49 = vadd.f32 %v1836_v48, %v1828_v47 }
0x2727   :  { %4926 = vtanh.f32 %v1838_v49 }
0x2731   :  { %v4927_v50 = vpop.eup %4926 }
0x2732   :  { %1841 = vrot.lane.b32.xlu0 %v4927_v50, %s5160_s14 }
0x27a4   :  { %v1842_v53 = vpop.permute.xlu0 %1841 }
0x27a5   :  { %v1844_v33 = vmul.f32 %v4925_v43, %v1842_v53 }
0x27a7   :  { %v1845_v54 = vpack.c.bf16 %v1844_v33, %v1844_v33 }
0x27a9   :  { %1847 = vrot.lane.b32.xlu1 %v1845_v54, %s5161_s20 }
0x281b   :  { %v1848_v55 = vpop.permute.xlu1 %1847 }
0x281c   :  { %4437 = vmatmul.mubr.msk.bf16.vlgmr.msra.gmra.mrb[64].mxu0 %vm249_vm2, %v1848_v55  ;;  %4445 = vmatmul.mubr.msk.bf16.vlgmr.msra.gmra.mrb[20].mxu1 %vm249_vm2, %v1848_v55  ;;  %v5753_v55 = vld [vmem:[%s6064_s10] sm:$0xff]  }
0x281d   :  { %4449 = vmatpush3.bf16.msra.mxu0 %v5579_v60  ;;  %4457 = vmatpush3.bf16.msra.mxu1 %v5549_v39 }
0x281e   :  { %4450 = vmatprep.subr.bf16.mxu0 %v5157_v1  ;;  %4458 = vmatprep.subr.bf16.mxu1 %v5157_v1 }
0x281f   :  { %4452 = vmatprep.mubr.msk.bf16.mxu0 %vm5158_vm0, %v5157_v1  ;;  %4460 = vmatprep.mubr.msk.bf16.mxu1 %vm5158_vm0, %v5157_v1 }
0x2821   :  { %4451 = vmatpush3.bf16.msra.mxu0 %v5585_v9  ;;  %4459 = vmatpush3.bf16.msra.mxu1 %v5556_v41 }
0x2822   :  { %4464 = vmatprep.subr.bf16.mxu0 %v5157_v1  ;;  %4480 = vmatprep.subr.bf16.mxu1 %v5157_v1 }
0x28ef   :  { %v1926_v56 = vpop.f32.mrb[20].mxu1 }
0x28f0   :  { %v4699_v39 = vadd.f32 %v5570_v42, %v1926_v56  ;;  %v4446_v58 = vpop.f32.mrb[21].mxu1  ;;  %v5759_v56 = vld [vmem:[%s6064_s10 + $0x8] sm:$0xff]  }
0x28f1   :  { %v1929_v57 = vpop.f32.mrb[22].mxu1 }
0x28f2   :  { %v3938_v59 = vmul.f32 -1.442695, %v4699_v39  ;;  %v4447_v61 = vpop.f32.mrb[23].mxu1 }
0x28f4   :  { %4928 = vpow2.f32 %v3938_v59 }
0x28fe   :  { %v4929_v62 = vpop.eup %4928 }
0x28ff   :  { %v1936_v63 = vadd.f32 1.0, %v4929_v62 }
0x2901   :  { %4930 = vrcp.f32 %v1936_v63 }
0x290b   :  { %v4931_v0 = vpop.eup %4930 }
0x290c   :  { %v1939_v2 = vmul.f32 2.0, %v4931_v0  ;;  %v1941_v4 = vmul.f32 %v4931_v0, %v1838_v49 }
0x290e   :  { %v3939_v3 = vadd.f32 -1.0, %v1939_v2 }
0x2910   :  { %1943 = vrot.lane.b32.xlu0 %v3939_v3, %s5160_s14 }
0x2982   :  { %v1944_v41 = vpop.permute.xlu0 %1943 }
0x2983   :  { %v1946_v23 = vmul.f32 %v4931_v0, %v1944_v41 }
0x2985   :  { %1948 = vrot.lane.b32.xlu1 %v1946_v23, %s5161_s20 }
0x29f7   :  { %v1949_v5 = vpop.permute.xlu1 %1948 }
0x29f8   :  { %v1951_v15 = vadd.f32 %v1949_v5, %v1941_v4 }
0x29fa   :  { %4932 = vtanh.f32 %v1951_v15 }
0x2a04   :  { %v4933_v6 = vpop.eup %4932 }
0x2a05   :  { %1954 = vrot.lane.b32.xlu0 %v4933_v6, %s5160_s14 }
0x2a77   :  { %v1955_v7 = vpop.permute.xlu0 %1954 }
0x2a78   :  { %v1957_v8 = vmul.f32 %v4931_v0, %v1955_v7 }
0x2a7a   :  { %v1958_v27 = vpack.c.bf16 %v1957_v8, %v1957_v8 }
0x2a7c   :  { %1960 = vrot.lane.b32.xlu1 %v1958_v27, %s5161_s20 }
0x2aee   :  { %v1961_v10 = vpop.permute.xlu1 %1960 }
0x2aef   :  { %4453 = vmatmul.mubr.msk.bf16.vlgmr.msra.gmra.mrb[68].mxu0 %vm249_vm2, %v1961_v10  ;;  %4461 = vmatmul.mubr.msk.bf16.vlgmr.msra.gmra.mrb[24].mxu1 %vm249_vm2, %v1961_v10 }
0x2af0   :  { %4465 = vmatpush3.bf16.msra.mxu0 %v5579_v60  ;;  %4468 = vmatprep.mubr.msk.bf16.mxu0 %vm5158_vm0, %v5157_v1 }
0x2af1   :  { %4466 = vmatprep.subr.bf16.mxu0 %v5157_v1  ;;  %4484 = vmatprep.mubr.msk.bf16.mxu1 %vm5158_vm0, %v5157_v1 }
0x2af2   :  { %4481 = vmatpush3.bf16.msra.mxu1 %v5753_v55 }
0x2af3   :  { %4482 = vmatprep.subr.bf16.mxu1 %v5157_v1 }
0x2af4   :  { %4467 = vmatpush3.bf16.msra.mxu0 %v5585_v9 }
0x2af5   :  { %4472 = vmatprep.subr.bf16.mxu0 %v5157_v1 }
0x2af6   :  { %4483 = vmatpush3.bf16.msra.mxu1 %v5759_v56 }
0x2af7   :  { %4496 = vmatprep.subr.bf16.mxu1 %v5157_v1 }
0x2bc2   :  { %v2039_v11 = vpop.f32.mrb[24].mxu1 }
0x2bc3   :  { %v4700_v12 = vadd.f32 %v5570_v42, %v2039_v11  ;;  %v4462_v13 = vpop.f32.mrb[25].mxu1 }
0x2bc4   :  { %v2042_v14 = vpop.f32.mrb[26].mxu1 }
0x2bc5   :  { %v3942_v16 = vmul.f32 -1.442695, %v4700_v12  ;;  %v4463_v18 = vpop.f32.mrb[27].mxu1 }
0x2bc7   :  { %4934 = vpow2.f32 %v3942_v16 }
0x2bd1   :  { %v4935_v60 = vpop.eup %4934 }
0x2bd2   :  { %v2049_v19 = vadd.f32 1.0, %v4935_v60 }
0x2bd4   :  { %4936 = vrcp.f32 %v2049_v19 }
0x2bde   :  { %v4937_v21 = vpop.eup %4936 }
0x2bdf   :  { %v2052_v22 = vmul.f32 2.0, %v4937_v21  ;;  %v2054_v25 = vmul.f32 %v4937_v21, %v1951_v15 }
0x2be1   :  { %v3943_v24 = vadd.f32 -1.0, %v2052_v22 }
0x2be3   :  { %2056 = vrot.lane.b32.xlu0 %v3943_v24, %s5160_s14 }
0x2c55   :  { %v2057_v51 = vpop.permute.xlu0 %2056 }
0x2c56   :  { %v2059_v9 = vmul.f32 %v4937_v21, %v2057_v51 }
0x2c58   :  { %2061 = vrot.lane.b32.xlu1 %v2059_v9, %s5161_s20 }
0x2cca   :  { %v2062_v26 = vpop.permute.xlu1 %2061 }
0x2ccb   :  { %v2064_v42 = vadd.f32 %v2062_v26, %v2054_v25 }
0x2ccd   :  { %4938 = vtanh.f32 %v2064_v42 }
0x2cd7   :  { %v4939_v28 = vpop.eup %4938 }
0x2cd8   :  { %2067 = vrot.lane.b32.xlu0 %v4939_v28, %s5160_s14 }
0x2d4a   :  { %v2068_v30 = vpop.permute.xlu0 %2067 }
0x2d4b   :  { %v2070_v29 = vmul.f32 %v4937_v21, %v2068_v30 }
0x2d4d   :  { %v2071_v52 = vpack.c.bf16 %v2070_v29, %v2070_v29 }
0x2d4f   :  { %2073 = vrot.lane.b32.xlu1 %v2071_v52, %s5161_s20 }
0x2dc1   :  { %v2074_v34 = vpop.permute.xlu1 %2073 }
0x2dc2   :  { %4469 = vmatmul.mubr.msk.bf16.vlgmr.msra.gmra.mrb[72].mxu0 %vm249_vm2, %v2074_v34 }
0x2dc3   :  { %4473 = vmatpush3.bf16.msra.mxu0 %v5724_v32  ;;  %4476 = vmatprep.mubr.msk.bf16.mxu0 %vm5158_vm0, %v5157_v1 }
0x2dc4   :  { %4474 = vmatprep.subr.bf16.mxu0 %v5157_v1 }
0x2dc7   :  { %4475 = vmatpush3.bf16.msra.mxu0 %v5731_v31 }
0x2dc8   :  { %4488 = vmatprep.subr.bf16.mxu0 %v5157_v1 }
0x2dca   :  { %4477 = vmatmul.mubr.bf16.vlgmr.msra.gmra.mrb[44].mxu0 %v5159_v17 }
0x2dcb   :  { %4489 = vmatpush3.bf16.msra.mxu0 %v5724_v32  ;;  %4492 = vmatprep.mubr.msk.bf16.mxu0 %vm5158_vm0, %v5157_v1 }
0x2dcc   :  { %4490 = vmatprep.subr.bf16.mxu0 %v5157_v1 }
0x2dcf   :  { %4491 = vmatpush3.bf16.msra.mxu0 %v5731_v31 }
0x2dd0   :  { %4504 = vmatprep.subr.bf16.mxu0 %v5157_v1 }
0x2e9d   :  { %v2173_v36 = vpop.f32.mrb[44].mxu0 }
0x2e9e   :  { %v4701_v37 = vadd.f32 %v5745_v35, %v2173_v36  ;;  %v4478_v38 = vpop.f32.mrb[45].mxu0 }
0x2e9f   :  { %v2176_v40 = vpop.f32.mrb[46].mxu0 }
0x2ea0   :  { %v3947_v43 = vmul.f32 -1.442695, %v4701_v37  ;;  %v4479_v20 = vpop.f32.mrb[47].mxu0 }
0x2ea2   :  { %4940 = vpow2.f32 %v3947_v43 }
0x2eac   :  { %v4941_v44 = vpop.eup %4940 }
0x2ead   :  { %v2183_v45 = vadd.f32 1.0, %v4941_v44 }
0x2eaf   :  { %4942 = vrcp.f32 %v2183_v45 }
0x2eb9   :  { %v4943_v46 = vpop.eup %4942 }
0x2eba   :  { %v2186_v47 = vmul.f32 2.0, %v4943_v46  ;;  %v2188_v53 = vmul.f32 0.0, %v4943_v46 }
0x2ebc   :  { %v3948_v48 = vadd.f32 -1.0, %v2186_v47 }
0x2ebe   :  { %2190 = vrot.lane.b32.xlu0 %v3948_v48, %s5160_s14 }
0x2f30   :  { %v2191_v49 = vpop.permute.xlu0 %2190 }
0x2f31   :  { %v2193_v50 = vmul.f32 %v4943_v46, %v2191_v49 }
0x2f33   :  { %2195 = vrot.lane.b32.xlu1 %v2193_v50, %s5161_s20 }
0x2fa5   :  { %v2196_v33 = vpop.permute.xlu1 %2195 }
0x2fa6   :  { %v2198_v54 = vadd.f32 %v2196_v33, %v2188_v53 }
0x2fa8   :  { %4944 = vtanh.f32 %v2198_v54 }
0x2fb2   :  { %v4945_v39 = vpop.eup %4944 }
0x2fb3   :  { %2201 = vrot.lane.b32.xlu0 %v4945_v39, %s5160_s14 }
0x3025   :  { %v2202_v58 = vpop.permute.xlu0 %2201 }
0x3026   :  { %v2204_v57 = vmul.f32 %v4943_v46, %v2202_v58 }
0x3028   :  { %v2205_v59 = vpack.c.bf16 %v2204_v57, %v2204_v57 }
0x302a   :  { %2213 = vrot.lane.b32.xlu1 %v2205_v59, %s5161_s20 }
0x309c   :  { %v2214_v61 = vpop.permute.xlu1 %2213 }
0x309d   :  { %4485 = vmatmul.mubr.msk.bf16.vlgmr.msra.gmra.mrb[32].mxu1 %vm249_vm2, %v2214_v61  ;;  %4493 = vmatmul.mubr.msk.bf16.vlgmr.msra.gmra.mrb[48].mxu0 %vm249_vm2, %v2214_v61 }
0x309e   :  { %4497 = vmatpush3.bf16.msra.mxu1 %v5753_v55  ;;  %4505 = vmatpush3.bf16.msra.mxu0 %v5724_v32 }
0x309f   :  { %4498 = vmatprep.subr.bf16.mxu1 %v5157_v1  ;;  %4506 = vmatprep.subr.bf16.mxu0 %v5157_v1 }
0x30a0   :  { %4500 = vmatprep.mubr.msk.bf16.mxu1 %vm5158_vm0, %v5157_v1  ;;  %4508 = vmatprep.mubr.msk.bf16.mxu0 %vm5158_vm0, %v5157_v1 }
0x30a2   :  { %4499 = vmatpush3.bf16.msra.mxu1 %v5759_v56  ;;  %4507 = vmatpush3.bf16.msra.mxu0 %v5731_v31 }
0x30a3   :  { %4512 = vmatprep.subr.bf16.mxu1 %v5157_v1  ;;  %4520 = vmatprep.subr.bf16.mxu0 %v5157_v1 }
0x3170   :  { %v2304_v62 = vpop.f32.mrb[48].mxu0 }
0x3171   :  { %v4702_v63 = vadd.f32 %v5745_v35, %v2304_v62  ;;  %v4494_v0 = vpop.f32.mrb[49].mxu0 }
0x3172   :  { %v2307_v2 = vpop.f32.mrb[50].mxu0 }
0x3173   :  { %v3954_v3 = vmul.f32 -1.442695, %v4702_v63  ;;  %v4495_v41 = vpop.f32.mrb[51].mxu0 }
0x3175   :  { %4946 = vpow2.f32 %v3954_v3 }
0x317f   :  { %v4947_v23 = vpop.eup %4946 }
0x3180   :  { %v2314_v4 = vadd.f32 1.0, %v4947_v23 }
0x3182   :  { %4948 = vrcp.f32 %v2314_v4 }
0x318c   :  { %v4949_v5 = vpop.eup %4948 }
0x318d   :  { %v2317_v15 = vmul.f32 2.0, %v4949_v5  ;;  %v2319_v27 = vmul.f32 %v4949_v5, %v2198_v54 }
0x318f   :  { %v3955_v6 = vadd.f32 -1.0, %v2317_v15 }
0x3191   :  { %2321 = vrot.lane.b32.xlu0 %v3955_v6, %s5160_s14 }
0x3203   :  { %v2322_v7 = vpop.permute.xlu0 %2321 }
0x3204   :  { %v2324_v8 = vmul.f32 %v4949_v5, %v2322_v7 }
0x3206   :  { %2326 = vrot.lane.b32.xlu1 %v2324_v8, %s5161_s20 }
0x3278   :  { %v2327_v10 = vpop.permute.xlu1 %2326 }
0x3279   :  { %v2329_v11 = vadd.f32 %v2327_v10, %v2319_v27 }
0x327b   :  { %4950 = vtanh.f32 %v2329_v11 }
0x3285   :  { %v4951_v12 = vpop.eup %4950 }
0x3286   :  { %2332 = vrot.lane.b32.xlu0 %v4951_v12, %s5160_s14 }
0x32f8   :  { %v2333_v13 = vpop.permute.xlu0 %2332 }
0x32f9   :  { %v2335_v14 = vmul.f32 %v4949_v5, %v2333_v13 }
0x32fb   :  { %v2336_v16 = vpack.c.bf16 %v2335_v14, %v2335_v14 }
0x32fd   :  { %2338 = vrot.lane.b32.xlu1 %v2336_v16, %s5161_s20 }
0x336f   :  { %v2339_v18 = vpop.permute.xlu1 %2338 }
0x3370   :  { %4501 = vmatmul.mubr.msk.bf16.vlgmr.msra.gmra.mrb[36].mxu1 %vm249_vm2, %v2339_v18  ;;  %4509 = vmatmul.mubr.msk.bf16.vlgmr.msra.gmra.mrb[52].mxu0 %vm249_vm2, %v2339_v18 }
0x3371   :  { %4513 = vmatpush3.bf16.msra.mxu1 %v5753_v55  ;;  %4521 = vmatpush3.bf16.msra.mxu0 %v5724_v32 }
0x3372   :  { %4514 = vmatprep.subr.bf16.mxu1 %v5157_v1  ;;  %4522 = vmatprep.subr.bf16.mxu0 %v5157_v1 }
0x3373   :  { %4516 = vmatprep.mubr.msk.bf16.mxu1 %vm5158_vm0, %v5157_v1  ;;  %4524 = vmatprep.mubr.msk.bf16.mxu0 %vm5158_vm0, %v5157_v1 }
0x3375   :  { %4515 = vmatpush3.bf16.msra.mxu1 %v5759_v56  ;;  %4523 = vmatpush3.bf16.msra.mxu0 %v5731_v31 }
0x3376   :  { %4528 = vmatprep.subr.bf16.mxu1 %v5157_v1  ;;  %4536 = vmatprep.subr.bf16.mxu0 %v5157_v1 }
0x3443   :  { %v2417_v60 = vpop.f32.mrb[52].mxu0 }
0x3444   :  { %v4703_v19 = vadd.f32 %v5745_v35, %v2417_v60  ;;  %v4510_v21 = vpop.f32.mrb[53].mxu0 }
0x3445   :  { %v2420_v22 = vpop.f32.mrb[54].mxu0 }
0x3446   :  { %v3958_v24 = vmul.f32 -1.442695, %v4703_v19  ;;  %v4511_v51 = vpop.f32.mrb[55].mxu0 }
0x3448   :  { %4952 = vpow2.f32 %v3958_v24 }
0x3452   :  { %v4953_v9 = vpop.eup %4952 }
0x3453   :  { %v2427_v25 = vadd.f32 1.0, %v4953_v9 }
0x3455   :  { %4954 = vrcp.f32 %v2427_v25 }
0x345f   :  { %v4955_v26 = vpop.eup %4954 }
0x3460   :  { %v2430_v42 = vmul.f32 2.0, %v4955_v26  ;;  %v2432_v52 = vmul.f32 %v4955_v26, %v2329_v11 }
0x3462   :  { %v3959_v28 = vadd.f32 -1.0, %v2430_v42 }
0x3464   :  { %2434 = vrot.lane.b32.xlu0 %v3959_v28, %s5160_s14 }
0x34d6   :  { %v2435_v30 = vpop.permute.xlu0 %2434 }
0x34d7   :  { %v2437_v29 = vmul.f32 %v4955_v26, %v2435_v30 }
0x34d9   :  { %2439 = vrot.lane.b32.xlu1 %v2437_v29, %s5161_s20 }
0x354b   :  { %v2440_v34 = vpop.permute.xlu1 %2439 }
0x354c   :  { %v2442_v36 = vadd.f32 %v2440_v34, %v2432_v52 }
0x354e   :  { %4956 = vtanh.f32 %v2442_v36 }
0x3558   :  { %v4957_v37 = vpop.eup %4956 }
0x3559   :  { %2445 = vrot.lane.b32.xlu0 %v4957_v37, %s5160_s14 }
0x35cb   :  { %v2446_v38 = vpop.permute.xlu0 %2445 }
0x35cc   :  { %v2448_v40 = vmul.f32 %v4955_v26, %v2446_v38 }
0x35ce   :  { %v2449_v43 = vpack.c.bf16 %v2448_v40, %v2448_v40 }
0x35d0   :  { %2451 = vrot.lane.b32.xlu1 %v2449_v43, %s5161_s20 }
0x3642   :  { %v2452_v20 = vpop.permute.xlu1 %2451 }
0x3643   :  { %4517 = vmatmul.mubr.msk.bf16.vlgmr.msra.gmra.mrb[40].mxu1 %vm249_vm2, %v2452_v20  ;;  %4525 = vmatmul.mubr.msk.bf16.vlgmr.msra.gmra.mrb[56].mxu0 %vm249_vm2, %v2452_v20 }
0x3644   :  { %4529 = vmatpush3.bf16.msra.mxu1 %v5753_v55  ;;  %4537 = vmatpush3.bf16.msra.mxu0 %v5724_v32 }
0x3645   :  { %4530 = vmatprep.subr.bf16.mxu1 %v5157_v1  ;;  %4538 = vmatprep.subr.bf16.mxu0 %v5157_v1 }
0x3646   :  { %4532 = vmatprep.mubr.msk.bf16.mxu1 %vm5158_vm0, %v5157_v1  ;;  %4540 = vmatprep.mubr.msk.bf16.mxu0 %vm5158_vm0, %v5157_v1 }
0x3648   :  { %4531 = vmatpush3.bf16.msra.mxu1 %v5759_v56  ;;  %4539 = vmatpush3.bf16.msra.mxu0 %v5731_v31 }
0x3649   :  { %4544 = vmatprep.subr.bf16.mxu1 %v5157_v1  ;;  %4552 = vmatprep.subr.bf16.mxu0 %v5157_v1 }
0x3716   :  { %v2530_v44 = vpop.f32.mrb[56].mxu0 }
0x3717   :  { %v4704_v45 = vadd.f32 %v5745_v35, %v2530_v44  ;;  %v4526_v46 = vpop.f32.mrb[57].mxu0 }
0x3718   :  { %v2533_v47 = vpop.f32.mrb[58].mxu0 }
0x3719   :  { %v3962_v48 = vmul.f32 -1.442695, %v4704_v45  ;;  %v4527_v49 = vpop.f32.mrb[59].mxu0 }
0x371b   :  { %4958 = vpow2.f32 %v3962_v48 }
0x3725   :  { %v4959_v50 = vpop.eup %4958 }
0x3726   :  { %v2540_v53 = vadd.f32 1.0, %v4959_v50 }
0x3728   :  { %4960 = vrcp.f32 %v2540_v53 }
0x3732   :  { %v4961_v33 = vpop.eup %4960 }
0x3733   :  { %v2543_v54 = vmul.f32 2.0, %v4961_v33  ;;  %v2545_v59 = vmul.f32 %v4961_v33, %v2442_v36 }
0x3735   :  { %v3963_v39 = vadd.f32 -1.0, %v2543_v54 }
0x3737   :  { %2547 = vrot.lane.b32.xlu0 %v3963_v39, %s5160_s14 }
0x37a9   :  { %v2548_v58 = vpop.permute.xlu0 %2547 }
0x37aa   :  { %v2550_v57 = vmul.f32 %v4961_v33, %v2548_v58 }
0x37ac   :  { %2552 = vrot.lane.b32.xlu1 %v2550_v57, %s5161_s20 }
0x381e   :  { %v2553_v61 = vpop.permute.xlu1 %2552 }
0x381f   :  { %v2555_v62 = vadd.f32 %v2553_v61, %v2545_v59 }
0x3821   :  { %4962 = vtanh.f32 %v2555_v62 }
0x382b   :  { %v4963_v63 = vpop.eup %4962 }
0x382c   :  { %2558 = vrot.lane.b32.xlu0 %v4963_v63, %s5160_s14 }
0x389e   :  { %v2559_v0 = vpop.permute.xlu0 %2558 }
0x389f   :  { %v2561_v2 = vmul.f32 %v4961_v33, %v2559_v0 }
0x38a1   :  { %v2562_v3 = vpack.c.bf16 %v2561_v2, %v2561_v2 }
0x38a3   :  { %2564 = vrot.lane.b32.xlu1 %v2562_v3, %s5161_s20 }
0x3915   :  { %v2565_v41 = vpop.permute.xlu1 %2564 }
0x3916   :  { %4533 = vmatmul.mubr.msk.bf16.vlgmr.msra.gmra.mrb[44].mxu1 %vm249_vm2, %v2565_v41  ;;  %4541 = vmatmul.mubr.msk.bf16.vlgmr.msra.gmra.mrb[60].mxu0 %vm249_vm2, %v2565_v41 }
0x3917   :  { %4545 = vmatpush3.bf16.msra.mxu1 %v5753_v55  ;;  %4553 = vmatpush3.bf16.msra.mxu0 %v5724_v32 }
0x3918   :  { %4546 = vmatprep.subr.bf16.mxu1 %v5157_v1  ;;  %4554 = vmatprep.subr.bf16.mxu0 %v5157_v1 }
0x3919   :  { %4548 = vmatprep.mubr.msk.bf16.mxu1 %vm5158_vm0, %v5157_v1  ;;  %4556 = vmatprep.mubr.msk.bf16.mxu0 %vm5158_vm0, %v5157_v1 }
0x391b   :  { %4547 = vmatpush3.bf16.msra.mxu1 %v5759_v56  ;;  %4555 = vmatpush3.bf16.msra.mxu0 %v5731_v31 }
0x391c   :  { %4560 = vmatprep.subr.bf16.mxu1 %v5157_v1  ;;  %4568 = vmatprep.subr.bf16.mxu0 %v5157_v1 }
0x39e9   :  { %v2643_v23 = vpop.f32.mrb[60].mxu0 }
0x39ea   :  { %v4705_v4 = vadd.f32 %v5745_v35, %v2643_v23  ;;  %v4542_v5 = vpop.f32.mrb[61].mxu0 }
0x39eb   :  { %v2646_v15 = vpop.f32.mrb[62].mxu0 }
0x39ec   :  { %v3966_v6 = vmul.f32 -1.442695, %v4705_v4  ;;  %v4543_v7 = vpop.f32.mrb[63].mxu0 }
0x39ee   :  { %4964 = vpow2.f32 %v3966_v6 }
0x39f8   :  { %v4965_v8 = vpop.eup %4964 }
0x39f9   :  { %v2653_v27 = vadd.f32 1.0, %v4965_v8 }
0x39fb   :  { %4966 = vrcp.f32 %v2653_v27 }
0x3a05   :  { %v4967_v10 = vpop.eup %4966 }
0x3a06   :  { %v2656_v11 = vmul.f32 2.0, %v4967_v10  ;;  %v2658_v16 = vmul.f32 %v4967_v10, %v2555_v62 }
0x3a08   :  { %v3967_v12 = vadd.f32 -1.0, %v2656_v11 }
0x3a0a   :  { %2660 = vrot.lane.b32.xlu0 %v3967_v12, %s5160_s14 }
0x3a7c   :  { %v2661_v13 = vpop.permute.xlu0 %2660 }
0x3a7d   :  { %v2663_v14 = vmul.f32 %v4967_v10, %v2661_v13 }
0x3a7f   :  { %2665 = vrot.lane.b32.xlu1 %v2663_v14, %s5161_s20 }
0x3af1   :  { %v2666_v18 = vpop.permute.xlu1 %2665 }
0x3af2   :  { %v2668_v60 = vadd.f32 %v2666_v18, %v2658_v16 }
0x3af4   :  { %4968 = vtanh.f32 %v2668_v60 }
0x3afe   :  { %v4969_v19 = vpop.eup %4968 }
0x3aff   :  { %2671 = vrot.lane.b32.xlu0 %v4969_v19, %s5160_s14 }
0x3b71   :  { %v2672_v21 = vpop.permute.xlu0 %2671 }
0x3b72   :  { %v2674_v22 = vmul.f32 %v4967_v10, %v2672_v21 }
0x3b74   :  { %v2675_v24 = vpack.c.bf16 %v2674_v22, %v2674_v22 }
0x3b76   :  { %2677 = vrot.lane.b32.xlu1 %v2675_v24, %s5161_s20 }
0x3be8   :  { %v2678_v51 = vpop.permute.xlu1 %2677 }
0x3be9   :  { %4549 = vmatmul.mubr.msk.bf16.vlgmr.msra.gmra.mrb[48].mxu1 %vm249_vm2, %v2678_v51  ;;  %4557 = vmatmul.mubr.msk.bf16.vlgmr.msra.gmra.mrb[64].mxu0 %vm249_vm2, %v2678_v51 }
0x3bea   :  { %4561 = vmatpush3.bf16.msra.mxu1 %v5753_v55  ;;  %4569 = vmatpush3.bf16.msra.mxu0 %v5724_v32 }
0x3beb   :  { %4562 = vmatprep.subr.bf16.mxu1 %v5157_v1  ;;  %4570 = vmatprep.subr.bf16.mxu0 %v5157_v1 }
0x3bec   :  { %4564 = vmatprep.mubr.msk.bf16.mxu1 %vm5158_vm0, %v5157_v1  ;;  %4572 = vmatprep.mubr.msk.bf16.mxu0 %vm5158_vm0, %v5157_v1 }
0x3bee   :  { %4563 = vmatpush3.bf16.msra.mxu1 %v5759_v56  ;;  %4571 = vmatpush3.bf16.msra.mxu0 %v5731_v31 }
0x3bef   :  { %4576 = vmatprep.subr.bf16.mxu1 %v5157_v1  ;;  %4584 = vmatprep.subr.bf16.mxu0 %v5157_v1 }
0x3cbc   :  { %v2756_v9 = vpop.f32.mrb[64].mxu0 }
0x3cbd   :  { %v4706_v25 = vadd.f32 %v5745_v35, %v2756_v9  ;;  %v4558_v26 = vpop.f32.mrb[65].mxu0  ;;  %v5898_v9 = vld [vmem:[%s6065_s11] sm:$0xff]  }
0x3cbe   :  { %v2759_v42 = vpop.f32.mrb[66].mxu0  ;;  %v5905_v26 = vld [vmem:[%s6065_s11 + $0x8] sm:$0xff]  }
0x3cbf   :  { %v3970_v28 = vmul.f32 -1.442695, %v4706_v25  ;;  %v4559_v30 = vpop.f32.mrb[67].mxu0  ;;  %v5919_v42 = vld [vmem:[#allocation8] ss:$0 sm:$0xff] }
0x3cc1   :  { %4970 = vpow2.f32 %v3970_v28 }
0x3ccb   :  { %v4971_v29 = vpop.eup %4970 }
0x3ccc   :  { %v2766_v52 = vadd.f32 1.0, %v4971_v29 }
0x3cce   :  { %4972 = vrcp.f32 %v2766_v52 }
0x3cd8   :  { %v4973_v34 = vpop.eup %4972 }
0x3cd9   :  { %v2769_v36 = vmul.f32 2.0, %v4973_v34  ;;  %v2771_v43 = vmul.f32 %v4973_v34, %v2668_v60 }
0x3cdb   :  { %v3971_v37 = vadd.f32 -1.0, %v2769_v36 }
0x3cdd   :  { %2773 = vrot.lane.b32.xlu0 %v3971_v37, %s5160_s14 }
0x3d4f   :  { %v2774_v38 = vpop.permute.xlu0 %2773 }
0x3d50   :  { %v2776_v40 = vmul.f32 %v4973_v34, %v2774_v38 }
0x3d52   :  { %2778 = vrot.lane.b32.xlu1 %v2776_v40, %s5161_s20 }
0x3dc4   :  { %v2779_v20 = vpop.permute.xlu1 %2778 }
0x3dc5   :  { %v2781_v44 = vadd.f32 %v2779_v20, %v2771_v43 }
0x3dc7   :  { %4974 = vtanh.f32 %v2781_v44 }
0x3dd1   :  { %v4975_v45 = vpop.eup %4974 }
0x3dd2   :  { %2784 = vrot.lane.b32.xlu0 %v4975_v45, %s5160_s14 }
0x3e44   :  { %v2785_v46 = vpop.permute.xlu0 %2784 }
0x3e45   :  { %v2787_v47 = vmul.f32 %v4973_v34, %v2785_v46 }
0x3e47   :  { %v2788_v48 = vpack.c.bf16 %v2787_v47, %v2787_v47 }
0x3e49   :  { %2790 = vrot.lane.b32.xlu1 %v2788_v48, %s5161_s20 }
0x3ebb   :  { %v2791_v49 = vpop.permute.xlu1 %2790 }
0x3ebc   :  { %4565 = vmatmul.mubr.msk.bf16.vlgmr.msra.gmra.mrb[52].mxu1 %vm249_vm2, %v2791_v49  ;;  %4573 = vmatmul.mubr.msk.bf16.vlgmr.msra.gmra.mrb[68].mxu0 %vm249_vm2, %v2791_v49 }
0x3ebd   :  { %4577 = vmatpush3.bf16.msra.mxu1 %v5753_v55  ;;  %4585 = vmatpush3.bf16.msra.mxu0 %v5724_v32 }
0x3ebe   :  { %4578 = vmatprep.subr.bf16.mxu1 %v5157_v1  ;;  %4586 = vmatprep.subr.bf16.mxu0 %v5157_v1 }
0x3ebf   :  { %4580 = vmatprep.mubr.msk.bf16.mxu1 %vm5158_vm0, %v5157_v1  ;;  %4588 = vmatprep.mubr.msk.bf16.mxu0 %vm5158_vm0, %v5157_v1 }
0x3ec1   :  { %4579 = vmatpush3.bf16.msra.mxu1 %v5759_v56  ;;  %4587 = vmatpush3.bf16.msra.mxu0 %v5731_v31 }
0x3ec2   :  { %4592 = vmatprep.subr.bf16.mxu1 %v5157_v1  ;;  %4664 = vmatprep.subr.bf16.mxu0 %v5157_v1 }
0x3f8f   :  { %v2869_v50 = vpop.f32.mrb[68].mxu0 }
0x3f90   :  { %v4707_v32 = vadd.f32 %v5745_v35, %v2869_v50  ;;  %v4574_v53 = vpop.f32.mrb[69].mxu0 }
0x3f91   :  { %v2872_v33 = vpop.f32.mrb[70].mxu0 }
0x3f92   :  { %v3974_v54 = vmul.f32 -1.442695, %v4707_v32  ;;  %v4575_v39 = vpop.f32.mrb[71].mxu0 }
0x3f94   :  { %4976 = vpow2.f32 %v3974_v54 }
0x3f9e   :  { %v4977_v58 = vpop.eup %4976 }
0x3f9f   :  { %v2879_v57 = vadd.f32 1.0, %v4977_v58 }
0x3fa1   :  { %4978 = vrcp.f32 %v2879_v57 }
0x3fab   :  { %v4979_v59 = vpop.eup %4978 }
0x3fac   :  { %v2882_v61 = vmul.f32 2.0, %v4979_v59  ;;  %v2884_v0 = vmul.f32 %v4979_v59, %v2781_v44 }
0x3fae   :  { %v3975_v62 = vadd.f32 -1.0, %v2882_v61 }
0x3fb0   :  { %2886 = vrot.lane.b32.xlu0 %v3975_v62, %s5160_s14 }
0x4022   :  { %v2887_v31 = vpop.permute.xlu0 %2886 }
0x4023   :  { %v2889_v63 = vmul.f32 %v4979_v59, %v2887_v31 }
0x4025   :  { %2891 = vrot.lane.b32.xlu1 %v2889_v63, %s5161_s20 }
0x4097   :  { %v2892_v2 = vpop.permute.xlu1 %2891 }
0x4098   :  { %v2894_v3 = vadd.f32 %v2892_v2, %v2884_v0 }
0x409a   :  { %4980 = vtanh.f32 %v2894_v3 }
0x40a4   :  { %v4981_v41 = vpop.eup %4980 }
0x40a5   :  { %2897 = vrot.lane.b32.xlu0 %v4981_v41, %s5160_s14 }
0x4117   :  { %v2898_v23 = vpop.permute.xlu0 %2897 }
0x4118   :  { %v2900_v4 = vmul.f32 %v4979_v59, %v2898_v23 }
0x411a   :  { %v2901_v5 = vpack.c.bf16 %v2900_v4, %v2900_v4 }
0x411c   :  { %2903 = vrot.lane.b32.xlu1 %v2901_v5, %s5161_s20 }
0x418e   :  { %v2904_v15 = vpop.permute.xlu1 %2903 }
0x418f   :  { %4581 = vmatmul.mubr.msk.bf16.vlgmr.msra.gmra.mrb[56].mxu1 %vm249_vm2, %v2904_v15  ;;  %4589 = vmatmul.mubr.msk.bf16.vlgmr.msra.gmra.mrb[72].mxu0 %vm249_vm2, %v2904_v15 }
0x4190   :  { %4593 = vmatpush3.bf16.msra.mxu1 %v5753_v55  ;;  %4596 = vmatprep.mubr.msk.bf16.mxu1 %vm5158_vm0, %v5157_v1 }
0x4191   :  { %4594 = vmatprep.subr.bf16.mxu1 %v5157_v1  ;;  %4668 = vmatprep.mubr.msk.bf16.mxu0 %vm5158_vm0, %v5157_v1 }
0x4194   :  { %4595 = vmatpush3.bf16.msra.mxu1 %v5759_v56 }
0x4195   :  { %4600 = vmatprep.subr.bf16.mxu1 %v5157_v1 }
0x4262   :  { %v2982_v6 = vpop.f32.mrb[72].mxu0 }
0x4263   :  { %v4708_v7 = vadd.f32 %v5745_v35, %v2982_v6  ;;  %v4590_v8 = vpop.f32.mrb[73].mxu0 }
0x4264   :  { %v2985_v27 = vpop.f32.mrb[74].mxu0 }
0x4265   :  { %v3978_v10 = vmul.f32 -1.442695, %v4708_v7  ;;  %v4591_v11 = vpop.f32.mrb[75].mxu0 }
0x4267   :  { %4982 = vpow2.f32 %v3978_v10 }
0x4271   :  { %v4983_v55 = vpop.eup %4982 }
0x4272   :  { %v2992_v12 = vadd.f32 1.0, %v4983_v55 }
0x4274   :  { %4984 = vrcp.f32 %v2992_v12 }
0x427e   :  { %v4985_v13 = vpop.eup %4984 }
0x427f   :  { %v2995_v14 = vmul.f32 2.0, %v4985_v13  ;;  %v2997_v60 = vmul.f32 %v4985_v13, %v2894_v3 }
0x4281   :  { %v3979_v16 = vadd.f32 -1.0, %v2995_v14 }
0x4283   :  { %2999 = vrot.lane.b32.xlu0 %v3979_v16, %s5160_s14 }
0x42f5   :  { %v3000_v18 = vpop.permute.xlu0 %2999 }
0x42f6   :  { %v3002_v56 = vmul.f32 %v4985_v13, %v3000_v18 }
0x42f8   :  { %3004 = vrot.lane.b32.xlu1 %v3002_v56, %s5161_s20 }
0x436a   :  { %v3005_v19 = vpop.permute.xlu1 %3004 }
0x436b   :  { %v3007_v35 = vadd.f32 %v3005_v19, %v2997_v60 }
0x436d   :  { %4986 = vtanh.f32 %v3007_v35 }
0x4377   :  { %v4987_v21 = vpop.eup %4986 }
0x4378   :  { %3010 = vrot.lane.b32.xlu0 %v4987_v21, %s5160_s14 }
0x43ea   :  { %v3011_v22 = vpop.permute.xlu0 %3010 }
0x43eb   :  { %v3013_v24 = vmul.f32 %v4985_v13, %v3011_v22 }
0x43ed   :  { %v3014_v51 = vpack.c.bf16 %v3013_v24, %v3013_v24 }
0x43ef   :  { %3016 = vrot.lane.b32.xlu1 %v3014_v51, %s5161_s20 }
0x4461   :  { %v3017_v25 = vpop.permute.xlu1 %3016 }
0x4462   :  { %4597 = vmatmul.mubr.msk.bf16.vlgmr.msra.gmra.mrb[60].mxu1 %vm249_vm2, %v3017_v25 }
0x4463   :  { %4601 = vmatpush3.bf16.msra.mxu1 %v5898_v9  ;;  %4604 = vmatprep.mubr.msk.bf16.mxu1 %vm5158_vm0, %v5157_v1 }
0x4464   :  { %4602 = vmatprep.subr.bf16.mxu1 %v5157_v1 }
0x4467   :  { %4603 = vmatpush3.bf16.msra.mxu1 %v5905_v26 }
0x4468   :  { %4608 = vmatprep.subr.bf16.mxu1 %v5157_v1 }
0x446a   :  { %4605 = vmatmul.mubr.bf16.vlgmr.msra.gmra.mrb[32].mxu1 %v5159_v17 }
0x446b   :  { %4609 = vmatpush3.bf16.msra.mxu1 %v5898_v9  ;;  %4612 = vmatprep.mubr.msk.bf16.mxu1 %vm5158_vm0, %v5157_v1 }
0x446c   :  { %4610 = vmatprep.subr.bf16.mxu1 %v5157_v1 }
0x446f   :  { %4611 = vmatpush3.bf16.msra.mxu1 %v5905_v26 }
0x4470   :  { %4616 = vmatprep.subr.bf16.mxu1 %v5157_v1 }
0x453d   :  { %v3111_v28 = vpop.f32.mrb[32].mxu1 }
0x453e   :  { %v4709_v30 = vadd.f32 %v5919_v42, %v3111_v28  ;;  %v4606_v29 = vpop.f32.mrb[33].mxu1 }
0x453f   :  { %v3114_v52 = vpop.f32.mrb[34].mxu1 }
0x4540   :  { %v3983_v34 = vmul.f32 -1.442695, %v4709_v30  ;;  %v4607_v17 = vpop.f32.mrb[35].mxu1 }
0x4542   :  { %4988 = vpow2.f32 %v3983_v34 }
0x454c   :  { %v4989_v36 = vpop.eup %4988 }
0x454d   :  { %v3121_v37 = vadd.f32 1.0, %v4989_v36 }
0x454f   :  { %4990 = vrcp.f32 %v3121_v37 }
0x4559   :  { %v4991_v38 = vpop.eup %4990 }
0x455a   :  { %v3124_v40 = vmul.f32 2.0, %v4991_v38  ;;  %v3126_v45 = vmul.f32 0.0, %v4991_v38 }
0x455c   :  { %v3984_v43 = vadd.f32 -1.0, %v3124_v40 }
0x455e   :  { %3128 = vrot.lane.b32.xlu0 %v3984_v43, %s5160_s14 }
0x45d0   :  { %v3129_v20 = vpop.permute.xlu0 %3128 }
0x45d1   :  { %v3131_v44 = vmul.f32 %v4991_v38, %v3129_v20 }
0x45d3   :  { %3133 = vrot.lane.b32.xlu1 %v3131_v44, %s5161_s20 }
0x4645   :  { %v3134_v46 = vpop.permute.xlu1 %3133 }
0x4646   :  { %v3136_v47 = vadd.f32 %v3134_v46, %v3126_v45 }
0x4648   :  { %4992 = vtanh.f32 %v3136_v47 }
0x4652   :  { %v4993_v48 = vpop.eup %4992 }
0x4653   :  { %3139 = vrot.lane.b32.xlu0 %v4993_v48, %s5160_s14 }
0x46c5   :  { %v3140_v49 = vpop.permute.xlu0 %3139 }
0x46c6   :  { %v3142_v50 = vmul.f32 %v4991_v38, %v3140_v49 }
0x46c8   :  { %v3143_v32 = vpack.c.bf16 %v3142_v50, %v3142_v50 }
0x46ca   :  { %3145 = vrot.lane.b32.xlu1 %v3143_v32, %s5161_s20 }
0x473c   :  { %v3146_v53 = vpop.permute.xlu1 %3145 }
0x473d   :  { %4613 = vmatmul.mubr.msk.bf16.vlgmr.msra.gmra.mrb[36].mxu1 %vm249_vm2, %v3146_v53 }
0x473e   :  { %4617 = vmatpush3.bf16.msra.mxu1 %v5898_v9  ;;  %4620 = vmatprep.mubr.msk.bf16.mxu1 %vm5158_vm0, %v5157_v1 }
0x473f   :  { %4618 = vmatprep.subr.bf16.mxu1 %v5157_v1 }
0x4742   :  { %4619 = vmatpush3.bf16.msra.mxu1 %v5905_v26 }
0x4743   :  { %4624 = vmatprep.subr.bf16.mxu1 %v5157_v1 }
0x4810   :  { %v3184_v33 = vpop.f32.mrb[36].mxu1 }
0x4811   :  { %v4710_v54 = vadd.f32 %v5919_v42, %v3184_v33  ;;  %v4614_v39 = vpop.f32.mrb[37].mxu1 }
0x4812   :  { %v3187_v58 = vpop.f32.mrb[38].mxu1 }
0x4813   :  { %v3986_v57 = vmul.f32 -1.442695, %v4710_v54  ;;  %v4615_v59 = vpop.f32.mrb[39].mxu1 }
0x4815   :  { %4994 = vpow2.f32 %v3986_v57 }
0x481f   :  { %v4995_v61 = vpop.eup %4994 }
0x4820   :  { %v3194_v62 = vadd.f32 1.0, %v4995_v61 }
0x4822   :  { %4996 = vrcp.f32 %v3194_v62 }
0x482c   :  { %v4997_v31 = vpop.eup %4996 }
0x482d   :  { %v3197_v63 = vmul.f32 2.0, %v4997_v31  ;;  %v3199_v41 = vmul.f32 %v4997_v31, %v3136_v47 }
0x482f   :  { %v3987_v0 = vadd.f32 -1.0, %v3197_v63 }
0x4831   :  { %3201 = vrot.lane.b32.xlu0 %v3987_v0, %s5160_s14 }
0x48a3   :  { %v3202_v2 = vpop.permute.xlu0 %3201 }
0x48a4   :  { %v3204_v3 = vmul.f32 %v4997_v31, %v3202_v2 }
0x48a6   :  { %3206 = vrot.lane.b32.xlu1 %v3204_v3, %s5161_s20 }
0x4918   :  { %v3207_v23 = vpop.permute.xlu1 %3206 }
0x4919   :  { %v3209_v4 = vadd.f32 %v3207_v23, %v3199_v41 }
0x491b   :  { %4998 = vtanh.f32 %v3209_v4 }
0x4925   :  { %v4999_v5 = vpop.eup %4998 }
0x4926   :  { %3212 = vrot.lane.b32.xlu0 %v4999_v5, %s5160_s14 }
0x4998   :  { %v3213_v15 = vpop.permute.xlu0 %3212 }
0x4999   :  { %v3215_v6 = vmul.f32 %v4997_v31, %v3213_v15 }
0x499b   :  { %v3216_v7 = vpack.c.bf16 %v3215_v6, %v3215_v6 }
0x499d   :  { %3218 = vrot.lane.b32.xlu1 %v3216_v7, %s5161_s20 }
0x4a0f   :  { %v3219_v8 = vpop.permute.xlu1 %3218 }
0x4a10   :  { %4621 = vmatmul.mubr.msk.bf16.vlgmr.msra.gmra.mrb[40].mxu1 %vm249_vm2, %v3219_v8 }
0x4a11   :  { %4625 = vmatpush3.bf16.msra.mxu1 %v5898_v9  ;;  %4628 = vmatprep.mubr.msk.bf16.mxu1 %vm5158_vm0, %v5157_v1 }
0x4a12   :  { %4626 = vmatprep.subr.bf16.mxu1 %v5157_v1 }
0x4a15   :  { %4627 = vmatpush3.bf16.msra.mxu1 %v5905_v26 }
0x4a16   :  { %4632 = vmatprep.subr.bf16.mxu1 %v5157_v1 }
0x4ae3   :  { %v3257_v27 = vpop.f32.mrb[40].mxu1 }
0x4ae4   :  { %v4711_v10 = vadd.f32 %v5919_v42, %v3257_v27  ;;  %v4622_v11 = vpop.f32.mrb[41].mxu1 }
0x4ae5   :  { %v3260_v55 = vpop.f32.mrb[42].mxu1 }
0x4ae6   :  { %v3989_v12 = vmul.f32 -1.442695, %v4711_v10  ;;  %v4623_v13 = vpop.f32.mrb[43].mxu1 }
0x4ae8   :  { %5000 = vpow2.f32 %v3989_v12 }
0x4af2   :  { %v5001_v14 = vpop.eup %5000 }
0x4af3   :  { %v3267_v16 = vadd.f32 1.0, %v5001_v14 }
0x4af5   :  { %5002 = vrcp.f32 %v3267_v16 }
0x4aff   :  { %v5003_v18 = vpop.eup %5002 }
0x4b00   :  { %v3270_v56 = vmul.f32 2.0, %v5003_v18  ;;  %v3272_v21 = vmul.f32 %v5003_v18, %v3209_v4 }
0x4b02   :  { %v3990_v60 = vadd.f32 -1.0, %v3270_v56 }
0x4b04   :  { %3274 = vrot.lane.b32.xlu0 %v3990_v60, %s5160_s14 }
0x4b76   :  { %v3275_v19 = vpop.permute.xlu0 %3274 }
0x4b77   :  { %v3277_v35 = vmul.f32 %v5003_v18, %v3275_v19 }
0x4b79   :  { %3279 = vrot.lane.b32.xlu1 %v3277_v35, %s5161_s20 }
0x4beb   :  { %v3280_v22 = vpop.permute.xlu1 %3279 }
0x4bec   :  { %v3282_v24 = vadd.f32 %v3280_v22, %v3272_v21 }
0x4bee   :  { %5004 = vtanh.f32 %v3282_v24 }
0x4bf8   :  { %v5005_v51 = vpop.eup %5004 }
0x4bf9   :  { %3285 = vrot.lane.b32.xlu0 %v5005_v51, %s5160_s14 }
0x4c6b   :  { %v3286_v25 = vpop.permute.xlu0 %3285 }
0x4c6c   :  { %v3288_v28 = vmul.f32 %v5003_v18, %v3286_v25 }
0x4c6e   :  { %v3289_v30 = vpack.c.bf16 %v3288_v28, %v3288_v28 }
0x4c70   :  { %3291 = vrot.lane.b32.xlu1 %v3289_v30, %s5161_s20 }
0x4ce2   :  { %v3292_v29 = vpop.permute.xlu1 %3291 }
0x4ce3   :  { %4629 = vmatmul.mubr.msk.bf16.vlgmr.msra.gmra.mrb[44].mxu1 %vm249_vm2, %v3292_v29 }
0x4ce4   :  { %4633 = vmatpush3.bf16.msra.mxu1 %v5898_v9  ;;  %4636 = vmatprep.mubr.msk.bf16.mxu1 %vm5158_vm0, %v5157_v1 }
0x4ce5   :  { %4634 = vmatprep.subr.bf16.mxu1 %v5157_v1 }
0x4ce8   :  { %4635 = vmatpush3.bf16.msra.mxu1 %v5905_v26 }
0x4ce9   :  { %4640 = vmatprep.subr.bf16.mxu1 %v5157_v1 }
0x4db6   :  { %v3330_v52 = vpop.f32.mrb[44].mxu1 }
0x4db7   :  { %v4712_v34 = vadd.f32 %v5919_v42, %v3330_v52  ;;  %v4630_v17 = vpop.f32.mrb[45].mxu1 }
0x4db8   :  { %v3333_v36 = vpop.f32.mrb[46].mxu1 }
0x4db9   :  { %v3992_v37 = vmul.f32 -1.442695, %v4712_v34  ;;  %v4631_v38 = vpop.f32.mrb[47].mxu1 }
0x4dbb   :  { %5006 = vpow2.f32 %v3992_v37 }
0x4dc5   :  { %v5007_v40 = vpop.eup %5006 }
0x4dc6   :  { %v3340_v43 = vadd.f32 1.0, %v5007_v40 }
0x4dc8   :  { %5008 = vrcp.f32 %v3340_v43 }
0x4dd2   :  { %v5009_v20 = vpop.eup %5008 }
0x4dd3   :  { %v3343_v44 = vmul.f32 2.0, %v5009_v20  ;;  %v3345_v48 = vmul.f32 %v5009_v20, %v3282_v24 }
0x4dd5   :  { %v3993_v45 = vadd.f32 -1.0, %v3343_v44 }
0x4dd7   :  { %3347 = vrot.lane.b32.xlu0 %v3993_v45, %s5160_s14 }
0x4e49   :  { %v3348_v46 = vpop.permute.xlu0 %3347 }
0x4e4a   :  { %v3350_v47 = vmul.f32 %v5009_v20, %v3348_v46 }
0x4e4c   :  { %3352 = vrot.lane.b32.xlu1 %v3350_v47, %s5161_s20 }
0x4ebe   :  { %v3353_v49 = vpop.permute.xlu1 %3352 }
0x4ebf   :  { %v3355_v50 = vadd.f32 %v3353_v49, %v3345_v48 }
0x4ec1   :  { %5010 = vtanh.f32 %v3355_v50 }
0x4ecb   :  { %v5011_v32 = vpop.eup %5010 }
0x4ecc   :  { %3358 = vrot.lane.b32.xlu0 %v5011_v32, %s5160_s14 }
0x4f3e   :  { %v3359_v53 = vpop.permute.xlu0 %3358 }
0x4f3f   :  { %v3361_v33 = vmul.f32 %v5009_v20, %v3359_v53 }
0x4f41   :  { %v3362_v54 = vpack.c.bf16 %v3361_v33, %v3361_v33 }
0x4f43   :  { %3364 = vrot.lane.b32.xlu1 %v3362_v54, %s5161_s20 }
0x4fb5   :  { %v3365_v39 = vpop.permute.xlu1 %3364 }
0x4fb6   :  { %4637 = vmatmul.mubr.msk.bf16.vlgmr.msra.gmra.mrb[48].mxu1 %vm249_vm2, %v3365_v39 }
0x4fb7   :  { %4641 = vmatpush3.bf16.msra.mxu1 %v5898_v9  ;;  %4644 = vmatprep.mubr.msk.bf16.mxu1 %vm5158_vm0, %v5157_v1 }
0x4fb8   :  { %4642 = vmatprep.subr.bf16.mxu1 %v5157_v1 }
0x4fbb   :  { %4643 = vmatpush3.bf16.msra.mxu1 %v5905_v26 }
0x4fbc   :  { %4648 = vmatprep.subr.bf16.mxu1 %v5157_v1 }
0x5089   :  { %v3403_v58 = vpop.f32.mrb[48].mxu1 }
0x508a   :  { %v4713_v57 = vadd.f32 %v5919_v42, %v3403_v58  ;;  %v4638_v59 = vpop.f32.mrb[49].mxu1 }
0x508b   :  { %v3406_v61 = vpop.f32.mrb[50].mxu1 }
0x508c   :  { %v3995_v62 = vmul.f32 -1.442695, %v4713_v57  ;;  %v4639_v31 = vpop.f32.mrb[51].mxu1 }
0x508e   :  { %5012 = vpow2.f32 %v3995_v62 }
0x5098   :  { %v5013_v63 = vpop.eup %5012 }
0x5099   :  { %v3413_v0 = vadd.f32 1.0, %v5013_v63 }
0x509b   :  { %5014 = vrcp.f32 %v3413_v0 }
0x50a5   :  { %v5015_v2 = vpop.eup %5014 }
0x50a6   :  { %v3416_v3 = vmul.f32 2.0, %v5015_v2  ;;  %v3418_v5 = vmul.f32 %v5015_v2, %v3355_v50 }
0x50a8   :  { %v3996_v41 = vadd.f32 -1.0, %v3416_v3 }
0x50aa   :  { %3420 = vrot.lane.b32.xlu0 %v3996_v41, %s5160_s14 }
0x511c   :  { %v3421_v23 = vpop.permute.xlu0 %3420 }
0x511d   :  { %v3423_v4 = vmul.f32 %v5015_v2, %v3421_v23 }
0x511f   :  { %3425 = vrot.lane.b32.xlu1 %v3423_v4, %s5161_s20 }
0x5191   :  { %v3426_v15 = vpop.permute.xlu1 %3425 }
0x5192   :  { %v3428_v6 = vadd.f32 %v3426_v15, %v3418_v5 }
0x5194   :  { %5016 = vtanh.f32 %v3428_v6 }
0x519e   :  { %v5017_v7 = vpop.eup %5016 }
0x519f   :  { %3431 = vrot.lane.b32.xlu0 %v5017_v7, %s5160_s14  ;;  %v4834_v7 = vld [vmem:[%s6067_s13] sm:$0xff]  }
0x51a0   :  { %4665 = vmatpush3.bf16.msra.mxu0 %v4834_v7 }
0x51a1   :  { %4666 = vmatprep.subr.bf16.mxu0 %v5157_v1 }
0x5211   :  { %v3432_v8 = vpop.permute.xlu0 %3431 }
0x5212   :  { %v3434_v27 = vmul.f32 %v5015_v2, %v3432_v8  ;;  %v4835_v8 = vld [vmem:[%s6067_s13 + $0x8] sm:$0xff]  }
0x5213   :  { %4667 = vmatpush3.bf16.msra.mxu0 %v4835_v8 }
0x5214   :  { %v3435_v10 = vpack.c.bf16 %v3434_v27, %v3434_v27  ;;  %4672 = vmatprep.subr.bf16.mxu0 %v5157_v1 }
0x5216   :  { %3437 = vrot.lane.b32.xlu1 %v3435_v10, %s5161_s20 }
0x5288   :  { %v3438_v11 = vpop.permute.xlu1 %3437 }
0x5289   :  { %4645 = vmatmul.mubr.msk.bf16.vlgmr.msra.gmra.mrb[52].mxu1 %vm249_vm2, %v3438_v11 }
0x528a   :  { %4649 = vmatpush3.bf16.msra.mxu1 %v5898_v9  ;;  %4652 = vmatprep.mubr.msk.bf16.mxu1 %vm5158_vm0, %v5157_v1 }
0x528b   :  { %4650 = vmatprep.subr.bf16.mxu1 %v5157_v1 }
0x528e   :  { %4651 = vmatpush3.bf16.msra.mxu1 %v5905_v26 }
0x528f   :  { %4656 = vmatprep.subr.bf16.mxu1 %v5157_v1 }
0x535c   :  { %v3476_v55 = vpop.f32.mrb[52].mxu1 }
0x535d   :  { %v4714_v12 = vadd.f32 %v5919_v42, %v3476_v55  ;;  %v4646_v13 = vpop.f32.mrb[53].mxu1 }
0x535e   :  { %v3479_v14 = vpop.f32.mrb[54].mxu1 }
0x535f   :  { %v3998_v16 = vmul.f32 -1.442695, %v4714_v12  ;;  %v4647_v18 = vpop.f32.mrb[55].mxu1  ;;  %v4836_v12 = vld [vmem:[%s6069_s15] sm:$0xff]   ;;  %v4837_v14 = vld [vmem:[%s6069_s15 + $0x8] sm:$0xff]  }
0x5360   :  { %v4839_v18 = vld [vmem:[%s6069_s15 + $0x18] sm:$0xff]  }
0x5361   :  { %5018 = vpow2.f32 %v3998_v16  ;;  %v4838_v16 = vld [vmem:[%s6069_s15 + $0x10] sm:$0xff]  }
0x536b   :  { %v5019_v56 = vpop.eup %5018 }
0x536c   :  { %v3486_v60 = vadd.f32 1.0, %v5019_v56  ;;  %v4840_v56 = vld [vmem:[%s6069_s15 + $0x20] sm:$0xff]  }
0x536e   :  { %5020 = vrcp.f32 %v3486_v60  ;;  %v4841_v60 = vld [vmem:[%s6069_s15 + $0x28] sm:$0xff]  }
0x5378   :  { %v5021_v19 = vpop.eup %5020 }
0x5379   :  { %v3489_v35 = vmul.f32 2.0, %v5021_v19  ;;  %v3491_v51 = vmul.f32 %v5021_v19, %v3428_v6 }
0x537b   :  { %v3999_v21 = vadd.f32 -1.0, %v3489_v35  ;;  %v4843_v35 = vld [vmem:[%s6069_s15 + $0x38] sm:$0xff]  }
0x537d   :  { %3493 = vrot.lane.b32.xlu0 %v3999_v21, %s5160_s14  ;;  %v4006_v21 = vld [vmem:[#allocation10] ss:$0 sm:$0xff] }
0x53ef   :  { %v3494_v22 = vpop.permute.xlu0 %3493 }
0x53f0   :  { %v3496_v24 = vmul.f32 %v5021_v19, %v3494_v22 }
0x53f2   :  { %3498 = vrot.lane.b32.xlu1 %v3496_v24, %s5161_s20 }
0x5464   :  { %v3499_v25 = vpop.permute.xlu1 %3498 }
0x5465   :  { %v3501_v28 = vadd.f32 %v3499_v25, %v3491_v51 }
0x5467   :  { %5022 = vtanh.f32 %v3501_v28 }
0x5471   :  { %v5023_v30 = vpop.eup %5022 }
0x5472   :  { %3504 = vrot.lane.b32.xlu0 %v5023_v30, %s5160_s14 }
0x54e4   :  { %v3505_v29 = vpop.permute.xlu0 %3504 }
0x54e5   :  { %v3507_v52 = vmul.f32 %v5021_v19, %v3505_v29  ;;  %v4842_v19 = vld [vmem:[%s6069_s15 + $0x30] sm:$0xff]  }
0x54e7   :  { %v3508_v34 = vpack.c.bf16 %v3507_v52, %v3507_v52  ;;  %v4010_v52 = vld [vmem:[%s6070_s16] ss:$0 sm:$0xff] }
0x54e9   :  { %3510 = vrot.lane.b32.xlu1 %v3508_v34, %s5161_s20 }
0x555b   :  { %v3511_v17 = vpop.permute.xlu1 %3510 }
0x555c   :  { %4653 = vmatmul.mubr.msk.bf16.vlgmr.msra.gmra.mrb[56].mxu1 %vm249_vm2, %v3511_v17 }
0x555d   :  { %4657 = vmatpush3.bf16.msra.mxu1 %v5898_v9  ;;  %4660 = vmatprep.mubr.msk.bf16.mxu1 %vm5158_vm0, %v5157_v1 }
0x555e   :  { %4658 = vmatprep.subr.bf16.mxu1 %v5157_v1 }
0x5561   :  { %4659 = vmatpush3.bf16.msra.mxu1 %v5905_v26 }
0x562f   :  { %v3549_v36 = vpop.f32.mrb[56].mxu1 }
0x5630   :  { %v4715_v37 = vadd.f32 %v5919_v42, %v3549_v36  ;;  %v4654_v38 = vpop.f32.mrb[57].mxu1  ;;  %v4019_v36 = vld [vmem:[%s6071_s17] ss:$0 sm:$0xff] }
0x5631   :  { %v3552_v40 = vpop.f32.mrb[58].mxu1 }
0x5632   :  { %v4001_v43 = vmul.f32 -1.442695, %v4715_v37  ;;  %v4655_v20 = vpop.f32.mrb[59].mxu1 }
0x5634   :  { %5024 = vpow2.f32 %v4001_v43 }
0x563e   :  { %v5025_v44 = vpop.eup %5024 }
0x563f   :  { %v3559_v45 = vadd.f32 1.0, %v5025_v44  ;;  %v4020_v44 = vld [vmem:[#allocation2] ss:$0 sm:$0xff] }
0x5641   :  { %5026 = vrcp.f32 %v3559_v45 }
0x564b   :  { %v5027_v46 = vpop.eup %5026 }
0x564c   :  { %v3562_v9 = vmul.f32 2.0, %v5027_v46  ;;  %v3564_v26 = vmul.f32 %v5027_v46, %v3501_v28 }
0x564e   :  { %v4002_v47 = vadd.f32 -1.0, %v3562_v9 }
0x5650   :  { %3566 = vrot.lane.b32.xlu0 %v4002_v47, %s5160_s14 }
0x56c2   :  { %v3567_v48 = vpop.permute.xlu0 %3566 }
0x56c3   :  { %v3569_v49 = vmul.f32 %v5027_v46, %v3567_v48 }
0x56c5   :  { %3571 = vrot.lane.b32.xlu1 %v3569_v49, %s5161_s20 }
0x5737   :  { %v3572_v50 = vpop.permute.xlu1 %3571 }
0x5738   :  { %v3574_v32 = vadd.f32 %v3572_v50, %v3564_v26 }
0x573a   :  { %5028 = vtanh.f32 %v3574_v32 }
0x5744   :  { %v5029_v53 = vpop.eup %5028 }
0x5745   :  { %3577 = vrot.lane.b32.xlu0 %v5029_v53, %s5160_s14 }
0x57b7   :  { %v3578_v33 = vpop.permute.xlu0 %3577 }
0x57b8   :  { %v3580_v54 = vmul.f32 %v5027_v46, %v3578_v33 }
0x57ba   :  { %v3581_v39 = vpack.c.bf16 %v3580_v54, %v3580_v54 }
0x57bc   :  { %3583 = vrot.lane.b32.xlu1 %v3581_v39, %s5161_s20 }
0x582e   :  { %v3584_v58 = vpop.permute.xlu1 %3583 }
0x582f   :  { %4661 = vmatmul.mubr.msk.bf16.vlgmr.msra.gmra.mrb[60].mxu1 %vm249_vm2, %v3584_v58 }
0x5902   :  { %v3622_v57 = vpop.f32.mrb[60].mxu1 }
0x5903   :  { %v4716_v59 = vadd.f32 %v5919_v42, %v3622_v57  ;;  %v4662_v61 = vpop.f32.mrb[61].mxu1 }
0x5904   :  { %v3625_v62 = vpop.f32.mrb[62].mxu1 }
0x5905   :  { %v4004_v31 = vmul.f32 -1.442695, %v4716_v59  ;;  %v4663_v63 = vpop.f32.mrb[63].mxu1 }
0x5907   :  { %5030 = vpow2.f32 %v4004_v31 }
0x5911   :  { %v5031_v0 = vpop.eup %5030 }
0x5912   :  { %v3632_v2 = vadd.f32 1.0, %v5031_v0 }
0x5914   :  { %5032 = vrcp.f32 %v3632_v2 }
0x591e   :  { %v5033_v3 = vpop.eup %5032 }
0x591f   :  { %v3635_v41 = vmul.f32 2.0, %v5033_v3  ;;  %v3637_v15 = vmul.f32 %v5033_v3, %v3574_v32 }
0x5921   :  { %v4005_v23 = vadd.f32 -1.0, %v3635_v41 }
0x5923   :  { %3639 = vrot.lane.b32.xlu0 %v4005_v23, %s5160_s14 }
0x5995   :  { %v3640_v4 = vpop.permute.xlu0 %3639 }
0x5996   :  { %v3642_v5 = vmul.f32 %v5033_v3, %v3640_v4 }
0x5998   :  { %3644 = vrot.lane.b32.xlu1 %v3642_v5, %s5161_s20 }
0x5a0a   :  { %v3645_v6 = vpop.permute.xlu1 %3644 }
0x5a0b   :  { %v3647_v42 = vadd.f32 %v3645_v6, %v3637_v15 }
0x5a0d   :  { %5034 = vtanh.f32 %v3647_v42 }
0x5a17   :  { %v5035_v27 = vpop.eup %5034 }
0x5a18   :  { %3650 = vrot.lane.b32.xlu0 %v5035_v27, %s5160_s14 }
0x5a8a   :  { %v3651_v10 = vpop.permute.xlu0 %3650 }
0x5a8b   :  { %v3653_v11 = vmul.f32 %v5033_v3, %v3651_v10 }
0x5a8d   :  { %v3654_v55 = vpack.c.bf16 %v3653_v11, %v3653_v11 }
0x5a8f   :  { %3667 = vrot.lane.b32.xlu1 %v3654_v55, %s5161_s20 }
0x5b01   :  { %v3668_v13 = vpop.permute.xlu1 %3667 }
0x5b02   :  { %4669 = vmatmul.mubr.msk.bf16.vlgmr.msra.gmra.mrb[76].mxu0 %vm249_vm2, %v3668_v13 }
0x5b03   :  { %4673 = vmatpush3.bf16.msra.mxu0 %v4836_v12  ;;  %4688 = vmatprep.mubr.msk.bf16.mxu0 %vm5158_vm0, %v5157_v1 }
0x5b04   :  { %4674 = vmatprep.subr.bf16.mxu0 %v5157_v1 }
0x5b07   :  { %4675 = vmatpush3.bf16.msra.mxu0 %v4837_v14 }
0x5b08   :  { %4676 = vmatprep.subr.bf16.mxu0 %v5157_v1 }
0x5b0b   :  { %4677 = vmatpush3.bf16.msra.mxu0 %v4838_v16 }
0x5b0c   :  { %4678 = vmatprep.subr.bf16.mxu0 %v5157_v1 }
0x5b0f   :  { %4679 = vmatpush3.bf16.msra.mxu0 %v4839_v18 }
0x5b10   :  { %4680 = vmatprep.subr.bf16.mxu0 %v5157_v1 }
0x5b13   :  { %4681 = vmatpush3.bf16.msra.mxu0 %v4840_v56 }
0x5b14   :  { %4682 = vmatprep.subr.bf16.mxu0 %v5157_v1 }
0x5b17   :  { %4683 = vmatpush3.bf16.msra.mxu0 %v4841_v60 }
0x5b18   :  { %4684 = vmatprep.subr.bf16.mxu0 %v5157_v1 }
0x5b1b   :  { %4685 = vmatpush3.bf16.msra.mxu0 %v4842_v19 }
0x5b1c   :  { %4686 = vmatprep.subr.bf16.mxu0 %v5157_v1 }
0x5b1f   :  { %4687 = vmatpush3.bf16.msra.mxu0 %v4843_v35 }
0x5bd5   :  { %v3718_v22 = vpop.f32.mrb[76].mxu0 }
0x5bd6   :  { %v3719_v24 = vadd.f32 %v4006_v21, %v3718_v22  ;;  %v4670_v51 = vpop.f32.mrb[77].mxu0 }
0x5bd7   :  { %v3721_v25 = vpop.f32.mrb[78].mxu0 }
0x5bd8   :  { %v3724_v28 = vmax.f32 %v3719_v24, 0.0  ;;  %v4671_v30 = vpop.f32.mrb[79].mxu0 }
0x5bda   :  { %v3725_v29 = vpack.c.bf16 %v3724_v28, %v3724_v28 }
0x5bdc   :  { %4689 = vmatmul.mubr.bf16.vlgmr.msra.gmra.mrb[80].mxu0 %v3725_v29 }
0x5caf   :  { %v3831_v34 = vpop.f32.mrb[80].mxu0 }
0x5cb0   :  { %v3832_v1 = vadd.f32 %v4010_v52, %v3831_v34  ;;  %v4690_v17 = vpop.f32.mrb[81].mxu0 }
0x5cb1   :  { %v3834_v37 = vpop.f32.mrb[82].mxu0 }
0x5cb2   :  { %v3837_v38 = vmax.f32 %v3832_v1, 0.0  ;;  %v4691_v40 = vpop.f32.mrb[83].mxu0 }
0x5cb4   :  { %v3845_v43 = vmul.f32 %v4019_v36, %v3837_v38 }
0x5cb6   :  { %v3847_v20 = vsel %vm3846_vm3, %v3845_v43, 0.0 }
0x5cb7   :  { %3848 = vadd.xlane.f32.xlu0 %v3847_v20 }
0x5d44   :  { %v3849_v45 = vpop.xlane.xlu0 %3848 }
0x5d45   :  { %v3857_v46 = vadd.f32 %v4020_v44, %v3849_v45 }
0x5d47   :  { %3859 = vst.msk [vmem:[%s6073_s19] sm:$0xff] %vm3858_vm4, %v3857_v46 }
0x5d48   :  { %3864 = vsyncpa [#allocation4], 1 }
0x5d49   :  { %3865 = vsyncpa [#allocation6], 1 }
0x5d4a   :  { %3866 = vsyncpa [#allocation9], 1 }

</bundles_post_ra>
